<compile_context>
chip_gen: v7x
topology: tpu7x:2x2x1
jax: 0.10.0
libtpu: 0.0.40
codegen_flags: <defaults>
</compile_context>

<pallas_src>
import jax
import jax.numpy as jnp
from jax import lax
from jax.experimental import pallas as pl
from jax.experimental.pallas import tpu as pltpu

IGNORE_LABEL = 255
LABEL_SMOOTH = 0.2          # ABL uses LSSCE(lb_smooth=0.2) for the 8-way direction loss
MAX_N_RATIO = 1.0 / 100.0
MAX_CLIP_DIST = 20.0
MAX_DIS_PAD = 1e5           # "max_dis" padding value used in get_direction_gt_predkl

# Per-generation VMEM budget (v7x: 64 MiB physical -> ~56 MiB scoped; v5e/v6e: 128 -> ~112 MiB).
try:
    _VMEM_CAP = int(getattr(pltpu.get_tpu_info(), "vmem_capacity_bytes", 64 * 1024 * 1024))
except Exception:
    _VMEM_CAP = 64 * 1024 * 1024
_VMEM_LIMIT = int(min((_VMEM_CAP * 7) // 8, 112 * 1024 * 1024))
_BIG_VMEM = _VMEM_CAP >= 96 * 1024 * 1024

# H-tile (row) preferences.  Kernel A (softmax/CE/KL) can take bigger tiles than Kernel C
# (direction loss), which keeps several C-channel temporaries live at once.
_PREFS_A = (128, 64, 256, 32) if _BIG_VMEM else (64, 32, 128)
_PREFS_C = (64, 32) if _BIG_VMEM else (32, 64)


def _pick_tile(H, prefs):
    for t in prefs:
        if H % t == 0:
            return t
    if H % 8 == 0 and H > 8:
        return 8            # also what the toy test hits -> exercises all halo/seam paths
    return H


# direction order from ABL.get_direction_gt_predkl:
#   | 4| 0| 5|
#   | 2| 8| 3|
#   | 6| 1| 7|
_DIRS = [(1, 0), (-1, 0), (0, -1), (0, 1), (-1, 1), (1, 1), (-1, -1), (1, -1), (0, 0)]


# ---------------------------------------------------------------------------
# In-register shift helpers.  Circular part uses pltpu.roll (XLU, co-issues with VALU work)
# whenever the rolled axis is (8,128)-layout aligned; otherwise the previously validated
# slice+concat fallback is used (that is what the small toy shapes take).
# ---------------------------------------------------------------------------
def _use_xlu_roll(shape, axis):
    nd = len(shape)
    if axis == nd - 1:
        return shape[axis] % 128 == 0
    if axis == nd - 2:
        return shape[axis] % 8 == 0 and shape[nd - 1] % 128 == 0
    return False


def _roll(x, d, axis):
    """Circular shift: y[i] = x[(i + d) % n] along `axis` (d static)."""
    n = x.shape[axis]
    k = d % n
    if k == 0:
        return x
    if _use_xlu_roll(x.shape, axis):
        return pltpu.roll(x, (-d) % n, axis=axis)       # jnp.roll semantics
    a = lax.slice_in_dim(x, k, n, axis=axis)
    b = lax.slice_in_dim(x, 0, k, axis=axis)
    return jnp.concatenate([a, b], axis=axis)


def _axis_iota(shape, axis):
    s = [1] * len(shape)
    s[axis] = shape[axis]
    return lax.broadcasted_iota(jnp.int32, tuple(s), axis)


def _shift(x, d, axis, fill):
    """y[i] = x[i + d] along `axis`; out-of-range positions take `fill`
    (a constant, or the string 'edge' for edge replication)."""
    if d == 0:
        return x
    n = x.shape[axis]
    y = _roll(x, d, axis)
    idx = _axis_iota(x.shape, axis)
    if d > 0:
        ok = idx < n - d
        edge = lax.slice_in_dim(x, n - 1, n, axis=axis)
    else:
        ok = idx >= -d
        edge = lax.slice_in_dim(x, 0, 1, axis=axis)
    fillv = edge if isinstance(fill, str) else jnp.full_like(edge, fill)
    return jnp.where(ok, y, fillv)


def _shift_rows(x, d, axis, boundary):
    """y[i] = x[i + d] (|d| == 1) along `axis`; the single out-of-range row is replaced by
    `boundary` (size-1 along `axis`, broadcastable against x).  Used for cross-tile halos."""
    n = x.shape[axis]
    y = _roll(x, d, axis)
    idx = _axis_iota(x.shape, axis)
    ok = (idx < n - d) if d > 0 else (idx >= -d)
    return jnp.where(ok, y, boundary)


# ---------------------------------------------------------------------------
# Kernel A (fused): channel softmax + CE NLL partial sums + KL boundary map
#   grid = (B, H // th); an 8-row halo block supplies the first row of the next tile for the
#   kl_ud seam (masked on the last tile).
# ---------------------------------------------------------------------------
def _make_fused_logits_kernel(use_halo):
    def kernel(*refs):
        if use_halo:
            logits_ref, halo_ref, tgt_ref, probs_ref, kl_ref, nll_ref = refs
        else:
            logits_ref, tgt_ref, probs_ref, kl_ref, nll_ref = refs
            halo_ref = None

        th_idx = pl.program_id(1)
        n_th = pl.num_programs(1)
        last_tile = th_idx == n_th - 1

        x = logits_ref[...].astype(jnp.float32)           # (1, C, TH, W)
        _, C, TH, W = x.shape

        z = x - jnp.max(x, axis=1, keepdims=True)
        ez = jnp.exp(z)
        se = jnp.sum(ez, axis=1, keepdims=True)
        sm = ez * (1.0 / se)
        lsm = z - jnp.log(se)
        # probs stays f32: a bf16 store would halve this HBM write but perturbs the downstream
        # Lovasz sort order, so it is left as an opt-in change.
        probs_ref[...] = sm

        # --- cross-entropy NLL partial sum (no one-hot; balanced select tree over C) ---
        # NOTE: nn.CrossEntropyLoss() in the reference has no ignore_index; labels outside
        # [0, C) contribute 0 here and still count in the mean denominator.
        tgt = tgt_ref[...]                                # (1, TH, W) int32
        terms = [jnp.where(tgt == c, lsm[:, c, :, :], 0.0) for c in range(C)]
        while len(terms) > 1:
            nxt = [terms[i] + terms[i + 1] for i in range(0, len(terms) - 1, 2)]
            if len(terms) % 2:
                nxt.append(terms[-1])
            terms = nxt
        nll_ref[...] = jnp.full((1, 1, 8, 128), -jnp.sum(terms[0]), jnp.float32)

        # --- KL boundary map: kl_ud[h] = sum_c sm[h]*(lsm[h]-lsm[h+1]); kl_lr analogous ---
        ne = jnp.sum(sm * lsm, axis=1)                    # (1, TH, W)
        if use_halo:
            hrow = halo_ref[:, :, 0:1, :].astype(jnp.float32)   # first row of the next tile
            hz = hrow - jnp.max(hrow, axis=1, keepdims=True)
            h_lsm = hz - jnp.log(jnp.sum(jnp.exp(hz), axis=1, keepdims=True))
        else:
            h_lsm = lsm[:, :, TH - 1:TH, :]               # unused value (masked below)
        lsm_dn = _shift_rows(lsm, 1, 2, h_lsm)            # lsm at row h+1 (halo across the seam)
        lsm_rt = _shift(lsm, 1, 3, 0.0)                   # lsm at col w+1 (masked below)
        kl_ud = ne - jnp.sum(sm * lsm_dn, axis=1)
        kl_lr = ne - jnp.sum(sm * lsm_rt, axis=1)

        row_iota = _axis_iota((1, TH, W), 1)
        col_iota = _axis_iota((1, TH, W), 2)
        kl_ud = jnp.where(jnp.logical_or(row_iota < TH - 1, jnp.logical_not(last_tile)),
                          kl_ud, 0.0)
        kl_lr = jnp.where(col_iota < W - 1, kl_lr, 0.0)
        kl_ref[...] = kl_ud + kl_lr                       # single full lane-dense store

    return kernel


def fused_softmax_nll_kl(logits, targets):
    B, C, H, W = logits.shape
    th = _pick_tile(H, _PREFS_A)
    n_t = H // th
    use_halo = n_t > 1                                    # th is a multiple of 8 when n_t > 1

    in_specs = [pl.BlockSpec((1, C, th, W), lambda b, i: (b, 0, i, 0))]
    inputs = [logits]
    if use_halo:
        nblk = H // 8
        tb = th // 8
        in_specs.append(pl.BlockSpec(
            (1, C, 8, W), lambda b, i: (b, 0, jnp.minimum((i + 1) * tb, nblk - 1), 0)))
        inputs.append(logits)
    in_specs.append(pl.BlockSpec((1, th, W), lambda b, i: (b, i, 0)))
    inputs.append(targets)

    return pl.pallas_call(
        _make_fused_logits_kernel(use_halo),
        out_shape=(jax.ShapeDtypeStruct((B, C, H, W), jnp.float32),
                   jax.ShapeDtypeStruct((B, H, W), jnp.float32),
                   jax.ShapeDtypeStruct((B, n_t, 8, 128), jnp.float32)),
        grid=(B, n_t),
        in_specs=in_specs,
        out_specs=(pl.BlockSpec((1, C, th, W), lambda b, i: (b, 0, i, 0)),
                   pl.BlockSpec((1, th, W), lambda b, i: (b, i, 0)),
                   pl.BlockSpec((1, 1, 8, 128), lambda b, i: (b, i, 0, 0))),
        compiler_params=pltpu.CompilerParams(
            dimension_semantics=("parallel", "parallel"),
            vmem_limit_bytes=_VMEM_LIMIT),
    )(*inputs)


# ---------------------------------------------------------------------------
# Kernel B: gt2boundary + streaming exact Euclidean distance transform
#   row pass: min-plus prefix doubling along lanes; column pass: fori_loop reading an
#   O(H*W) scratch 8 rows at a time with the 8 inner steps unrolled.
# ---------------------------------------------------------------------------
def _dist_map_kernel(tgt_ref, out_ref, f_ref):
    _, H, W = tgt_ref.shape
    gt = tgt_ref[...]                                     # (1, H, W) int32

    h_iota = _axis_iota((1, H, W), 1)
    w_iota = _axis_iota((1, H, W), 2)
    gt_dn = _shift(gt, 1, 1, 0)
    gt_rt = _shift(gt, 1, 2, 0)
    ud = jnp.logical_and(gt_dn != gt, h_iota < H - 1)
    lr = jnp.logical_and(gt_rt != gt, w_iota < W - 1)
    boundary = jnp.logical_or(jnp.logical_or(ud, lr), gt == IGNORE_LABEL)

    BIG = 1e9
    # 1D distance along each row (lane axis) via min-plus prefix doubling.
    dl = jnp.where(boundary, 0.0, jnp.float32(BIG))
    dr = dl
    s = 1
    while s < W:
        dl = jnp.minimum(dl, _shift(dl, -s, 2, BIG) + s)
        dr = jnp.minimum(dr, _shift(dr, s, 2, BIG) + s)
        s *= 2
    rowd = jnp.minimum(jnp.minimum(dl, dr), 1e4)          # explicit cap (no-boundary rows)
    f_ref[...] = rowd * rowd                              # f[k, j] = row-wise squared dist

    # column pass: d2[i, j] = min_k f[k, j] + (i - k)^2
    # TODO(synk): the search could be windowed to ~MAX_CLIP_DIST rows for a ~12x cut, but that
    # changes direction-argmin results far from GT boundaries, so the exact pass is kept.
    i_f = h_iota.astype(jnp.float32)                      # (1, H, 1)
    d2_init = jnp.full((1, H, W), BIG, jnp.float32)

    if H % 8 == 0:
        def body8(k8, d2):
            base = pl.multiple_of(k8 * 8, 8)
            blk = f_ref[:, pl.ds(base, 8), :]             # (1, 8, W) -- one aligned 8-row read
            for j in range(8):                            # unrolled
                frow = blk[:, j:j + 1, :]
                dk = i_f - (k8 * 8 + j).astype(jnp.float32)
                d2 = jnp.minimum(d2, frow + dk * dk)
            return d2
        d2 = lax.fori_loop(0, H // 8, body8, d2_init)
    else:
        def body1(k, d2):
            frow = f_ref[:, pl.ds(k, 1), :]
            dk = i_f - k.astype(jnp.float32)
            return jnp.minimum(d2, frow + dk * dk)
        d2 = lax.fori_loop(0, H, body1, d2_init)

    d = jnp.minimum(jnp.sqrt(d2), 1e4)                    # explicit cap
    out_ref[...] = jnp.where(boundary, 0.0, jnp.maximum(d - 1.0, 0.0))


def gt_dist_maps(targets):
    B, H, W = targets.shape
    # grid=(B,) "parallel": with B>=2 both v7x TensorCores get work; the EDT passes need whole
    # rows / columns, so spatial tiling is not applicable here.
    return pl.pallas_call(
        _dist_map_kernel,
        out_shape=jax.ShapeDtypeStruct((B, H, W), jnp.float32),
        grid=(B,),
        in_specs=[pl.BlockSpec((1, H, W), lambda b: (b, 0, 0))],
        out_specs=pl.BlockSpec((1, H, W), lambda b: (b, 0, 0)),
        scratch_shapes=[pltpu.VMEM((1, H, W), jnp.float32)],
        compiler_params=pltpu.CompilerParams(
            dimension_semantics=("parallel",), vmem_limit_bytes=_VMEM_LIMIT),
    )(targets)


# ---------------------------------------------------------------------------
# Kernel C: fused threshold-dilation + direction GT + neighbour KL + streaming LSSCE
#   grid = (B, H // th) with 1-row halos (8-row halo blocks) on logits / dist / kl_bin.
#   Outputs are per-tile partial sums of (loss*weight*valid) and of valid.
# ---------------------------------------------------------------------------
def _make_direction_kernel(use_halo):
    def kernel(*refs):
        if use_halo:
            (lg_ref, lgu_ref, lgd_ref, dist_ref, du_ref, dd_ref,
             kb_ref, kbu_ref, kbd_ref, wl_ref, valid_ref) = refs
        else:
            lg_ref, dist_ref, kb_ref, wl_ref, valid_ref = refs
            lgu_ref = lgd_ref = du_ref = dd_ref = kbu_ref = kbd_ref = None

        ti = pl.program_id(1)
        n_t = pl.num_programs(1)
        first_tile = ti == 0
        last_tile = ti == n_t - 1

        x = lg_ref[...].astype(jnp.float32)               # (1, C, TH, W)
        _, C, TH, W = x.shape
        z = x - jnp.max(x, axis=1, keepdims=True)
        ez = jnp.exp(z)
        se = jnp.sum(ez, axis=1, keepdims=True)
        lsm = z - jnp.log(se)                             # centre log-softmax
        p = ez * (1.0 / se)                               # softmax, hoisted out of the dir loop
        ne = jnp.sum(p * lsm, axis=1)                     # (1, TH, W): sum_c p * log p

        def row_stats(row_logits):                        # (1, C, 1, W) -> softmax, neg-entropy
            rz = row_logits - jnp.max(row_logits, axis=1, keepdims=True)
            rez = jnp.exp(rz)
            rse = jnp.sum(rez, axis=1, keepdims=True)
            rp = rez * (1.0 / rse)
            rne = jnp.sum(rp * (rz - jnp.log(rse)), axis=1)
            return rp, rne

        # Adjacent rows: neighbouring tile rows inside the image, edge-replication / padding at
        # the true image borders.
        p_row0, ne_row0 = p[:, :, 0:1, :], ne[:, 0:1, :]
        p_rowL, ne_rowL = p[:, :, TH - 1:TH, :], ne[:, TH - 1:TH, :]
        if use_halo:
            hu = lgu_ref.shape[2]
            up_p, up_ne = row_stats(lgu_ref[:, :, hu - 1:hu, :].astype(jnp.float32))
            dn_p, dn_ne = row_stats(lgd_ref[:, :, 0:1, :].astype(jnp.float32))
            p_up = jnp.where(first_tile, p_row0, up_p)
            ne_up = jnp.where(first_tile, ne_row0, up_ne)
            p_dn = jnp.where(last_tile, p_rowL, dn_p)
            ne_dn = jnp.where(last_tile, ne_rowL, dn_ne)
            hd = du_ref.shape[1]
            dist_up = jnp.where(first_tile, jnp.float32(MAX_DIS_PAD), du_ref[:, hd - 1:hd, :])
            dist_dn = jnp.where(last_tile, jnp.float32(MAX_DIS_PAD), dd_ref[:, 0:1, :])
            hk = kbu_ref.shape[1]
            kb_up = jnp.where(first_tile, jnp.float32(0.0), kbu_ref[:, hk - 1:hk, :])
            kb_dn = jnp.where(last_tile, jnp.float32(0.0), kbd_ref[:, 0:1, :])
        else:
            p_up, ne_up, p_dn, ne_dn = p_row0, ne_row0, p_rowL, ne_rowL
            dist_up = jnp.full((1, 1, W), MAX_DIS_PAD, jnp.float32)
            dist_dn = dist_up
            kb_up = jnp.zeros((1, 1, W), jnp.float32)
            kb_dn = kb_up

        # predicted boundary: 3x3 zero-padded dilation of the thresholded KL map, separable.
        kb = kb_ref[...]
        rowmax = jnp.maximum(kb, jnp.maximum(_shift_rows(kb, -1, 1, kb_up),
                                             _shift_rows(kb, 1, 1, kb_dn)))
        dil = jnp.maximum(rowmax, jnp.maximum(_shift(rowmax, -1, 2, 0.0),
                                              _shift(rowmax, 1, 2, 0.0)))
        pred_boundary = dil > 0.0

        dist = dist_ref[...]                              # (1, TH, W)
        dist_rows = {0: dist,
                     -1: _shift_rows(dist, -1, 1, dist_up),
                     1: _shift_rows(dist, 1, 1, dist_dn)}
        p_rows = {0: p,
                  -1: _shift_rows(p, -1, 2, p_up),
                  1: _shift_rows(p, 1, 2, p_dn)}
        ne_rows = {0: ne,
                   -1: _shift_rows(ne, -1, 1, ne_up),
                   1: _shift_rows(ne, 1, 1, ne_dn)}

        # Streaming pass over the 9 directions: argmin of neighbour distances plus an online
        # logsumexp / running-sum / running-pick for the 8-way label-smoothed CE.
        best_val = jnp.full((1, TH, W), jnp.inf, jnp.float32)
        best_idx = jnp.zeros((1, TH, W), jnp.int32)
        mmax = jnp.full((1, TH, W), -1e30, jnp.float32)
        ssum = jnp.zeros((1, TH, W), jnp.float32)
        sum_kl = jnp.zeros((1, TH, W), jnp.float32)
        pick = jnp.zeros((1, TH, W), jnp.float32)

        for d, (dx, dy) in enumerate(_DIRS):
            nb_dist = dist_rows[dx]
            if dy != 0:
                nb_dist = _shift(nb_dist, dy, 2, MAX_DIS_PAD)
            upd = nb_dist < best_val                      # strict '<' == first-occurrence argmin
            if d < 8:
                nb_p = p_rows[dx]
                nb_ne = ne_rows[dx]
                if dy != 0:
                    nb_p = _shift(nb_p, dy, 3, "edge")
                    nb_ne = _shift(nb_ne, dy, 2, "edge")
                # kl_div(center, neighbour).sum(C) = sum_c p_nb*(lsm_nb - lsm)
                #                                  = ne_nb - sum_c p_nb * lsm   (exp hoisted)
                kl_d = nb_ne - jnp.sum(nb_p * lsm, axis=1)
                new_m = jnp.maximum(mmax, kl_d)
                ssum = ssum * jnp.exp(mmax - new_m) + jnp.exp(kl_d - new_m)
                mmax = new_m
                sum_kl = sum_kl + kl_d
                pick = jnp.where(upd, kl_d, pick)
            best_idx = jnp.where(upd, jnp.int32(d), best_idx)
            best_val = jnp.where(upd, nb_dist, best_val)

        # label-smoothed softmax CE over the 8 direction "logits" (LSSCE V1, lb_smooth=0.2):
        # gt class weight = 1 - smooth, others = smooth / 8
        lse8 = mmax + jnp.log(ssum)
        lsm_gt = pick - lse8
        sum_lsm8 = sum_kl - 8.0 * lse8
        lb_pos = 1.0 - LABEL_SMOOTH
        lb_neg = LABEL_SMOOTH / 8.0
        loss = -((lb_pos - lb_neg) * lsm_gt + lb_neg * sum_lsm8)

        weight_ce = jnp.minimum(dist, MAX_CLIP_DIST) * (1.0 / MAX_CLIP_DIST)
        validf = jnp.logical_and(pred_boundary, best_idx != 8).astype(jnp.float32)
        wl_ref[...] = jnp.full((1, 1, 8, 128), jnp.sum(loss * weight_ce * validf), jnp.float32)
        valid_ref[...] = jnp.full((1, 1, 8, 128), jnp.sum(validf), jnp.float32)

    return kernel


def abl_direction_maps(logits, dist_maps, kl_bin):
    B, C, H, W = logits.shape
    th = _pick_tile(H, _PREFS_C)
    n_t = H // th
    use_halo = n_t > 1                                    # th is a multiple of 8 when n_t > 1

    lg_spec = pl.BlockSpec((1, C, th, W), lambda b, i: (b, 0, i, 0))
    d_spec = pl.BlockSpec((1, th, W), lambda b, i: (b, i, 0))
    if use_halo:
        nblk = H // 8
        tb = th // 8
        up = lambda i: jnp.maximum(i * tb - 1, 0)
        dn = lambda i: jnp.minimum((i + 1) * tb, nblk - 1)
        in_specs = [
            lg_spec,
            pl.BlockSpec((1, C, 8, W), lambda b, i: (b, 0, up(i), 0)),
            pl.BlockSpec((1, C, 8, W), lambda b, i: (b, 0, dn(i), 0)),
            d_spec,
            pl.BlockSpec((1, 8, W), lambda b, i: (b, up(i), 0)),
            pl.BlockSpec((1, 8, W), lambda b, i: (b, dn(i), 0)),
            d_spec,
            pl.BlockSpec((1, 8, W), lambda b, i: (b, up(i), 0)),
            pl.BlockSpec((1, 8, W), lambda b, i: (b, dn(i), 0)),
        ]
        inputs = (logits, logits, logits, dist_maps, dist_maps, dist_maps,
                  kl_bin, kl_bin, kl_bin)
    else:
        in_specs = [lg_spec, d_spec, d_spec]
        inputs = (logits, dist_maps, kl_bin)

    return pl.pallas_call(
        _make_direction_kernel(use_halo),
        out_shape=(jax.ShapeDtypeStruct((B, n_t, 8, 128), jnp.float32),
                   jax.ShapeDtypeStruct((B, n_t, 8, 128), jnp.float32)),
        grid=(B, n_t),
        in_specs=in_specs,
        out_specs=(pl.BlockSpec((1, 1, 8, 128), lambda b, i: (b, i, 0, 0)),
                   pl.BlockSpec((1, 1, 8, 128), lambda b, i: (b, i, 0, 0))),
        compiler_params=pltpu.CompilerParams(
            dimension_semantics=("parallel", "parallel"),
            vmem_limit_bytes=_VMEM_LIMIT),
    )(*inputs)


# ---------------------------------------------------------------------------
# Plain-JAX glue: adaptive eps (one top-k), Lovasz extension (sort-based), means
# ---------------------------------------------------------------------------
def _adaptive_eps(kl_combine, max_N):
    # Reproduces exactly: eps = 1e-5; while (kl > eps).sum() > max_N: eps *= 1.2
    # (max_N = h*w*ratio as in the reference, even though the count runs over the batch).
    # count(kl > eps) > max_N  <=>  eps < t  where t is the (floor(max_N)+1)-th largest value,
    # so a single top-k replaces the ~60 serial full-map reductions on the critical path.
    flat = kl_combine.reshape(-1)
    total = flat.shape[0]
    k = int(max_N) + 1
    if k > total:
        return jnp.float32(1e-5)
    t = lax.top_k(flat, k)[0][k - 1]
    return lax.while_loop(lambda e: e < t, lambda e: e * 1.2, jnp.float32(1e-5))


# TODO(synk): sort/cumsum-based Lovasz extension stays in plain JAX (no clean Pallas sort on
# TPU); it consumes the softmax output of the fused Pallas kernel, vectorized over classes.
def _lovasz_softmax(probas, labels):
    B, C, H, W = probas.shape
    p = jnp.transpose(probas, (0, 2, 3, 1)).reshape(-1, C)            # (N, C)
    l = labels.reshape(-1)
    fg = (l[:, None] == jnp.arange(C)[None, :]).astype(jnp.float32)   # (N, C)
    errors = jnp.abs(fg - p)
    order = jnp.argsort(-errors, axis=0)                              # per-class descending
    errors_sorted = jnp.take_along_axis(errors, order, axis=0)
    fg_sorted = jnp.take_along_axis(fg, order, axis=0)
    gts = jnp.sum(fg_sorted, axis=0)                                  # (C,)
    inter = gts[None, :] - jnp.cumsum(fg_sorted, axis=0)
    union = gts[None, :] + jnp.cumsum(1.0 - fg_sorted, axis=0)
    jaccard = 1.0 - inter / union
    grad = jnp.concatenate([jaccard[:1], jaccard[1:] - jaccard[:-1]], axis=0)
    losses = jnp.sum(errors_sorted * grad, axis=0)                    # (C,)
    present = (jnp.sum(fg, axis=0) > 0).astype(jnp.float32)
    return jnp.sum(losses * present) / jnp.maximum(jnp.sum(present), 1.0)


@jax.jit
def abl_ce_iou_loss(logits, targets):
    B, C, H, W = logits.shape
    # TODO(synk): the reference bilinearly resizes logits when their spatial size differs from
    # the target's; matching (H, W) is assumed here.

    # fused Pallas kernel: softmax probs + CE NLL partial sums + KL boundary map
    probs, kl_combine, nll_sums = fused_softmax_nll_kl(logits, targets)

    # --- ABL ---
    dist_maps = gt_dist_maps(targets)                       # Pallas: gt2boundary + streaming EDT
    eps = _adaptive_eps(kl_combine, H * W * MAX_N_RATIO)    # glue: one top-k + scalar recurrence
    kl_bin = (kl_combine > eps).astype(jnp.float32)
    wl_sums, valid_sums = abl_direction_maps(logits, dist_maps, kl_bin)  # Pallas (tiled)
    # Original module returns None when no predicted boundary exists; here that case (and an
    # empty valid set) simply contributes 0 to keep the loss well defined.
    abl = jnp.sum(wl_sums[:, :, 0, 0]) / jnp.maximum(jnp.sum(valid_sums[:, :, 0, 0]), 1.0)

    # --- CrossEntropy (nn.CrossEntropyLoss, mean over all pixels, no ignore_index) ---
    ce = jnp.sum(nll_sums[:, :, 0, 0]) / float(B * H * W)

    # --- Lovasz-Softmax ---
    lov = _lovasz_softmax(probs, targets)

    return abl + ce + lov


if __name__ == "__main__":
    key = jax.random.PRNGKey(0)
    B, C, H, W = 2, 4, 16, 16
    k1, k2 = jax.random.split(key)
    logits = jax.random.normal(k1, (B, C, H, W), dtype=jnp.float32)
    targets = jax.random.randint(k2, (B, H, W), 0, C, dtype=jnp.int32)

    loss = abl_ce_iou_loss(logits, targets)
    loss = jax.block_until_ready(loss)
    if not bool(jnp.isfinite(loss)):
        raise RuntimeError(f"non-finite loss: {loss}")
    print("KERNEL_OK")
</pallas_src>

<mosaic_0001>
module attributes {stable_mosaic.version = 11 : i64} {
  func.func private @main(%arg0: i32) attributes {dimension_semantics = [#tpu.dimension_semantics<core_parallel>], iteration_bounds = array<i64: 2>, tpu.core_type = #tpu.core_type<sc_scalar_subcore>, window_params = []} {
    return
  }
}

module attributes {stable_mosaic.version = 11 : i64} {
  func.func private @main(%arg0: i32) attributes {dimension_semantics = [#tpu.dimension_semantics<core_parallel>], iteration_bounds = array<i64: 2>, tpu.core_type = #tpu.core_type<sc_scalar_subcore>, window_params = []} {
    return
  }
}

module attributes {stable_mosaic.version = 11 : i64} {
  func.func @kernel(%arg0: i32, %arg1: i32, %arg2: memref<1x4x8x16xf32, #tpu.memory_space<vmem>>, %arg3: memref<1x4x8x16xf32, #tpu.memory_space<vmem>>, %arg4: memref<1x8x16xi32, #tpu.memory_space<vmem>>, %arg5: memref<1x4x8x16xf32, #tpu.memory_space<vmem>>, %arg6: memref<1x8x16xf32, #tpu.memory_space<vmem>>, %arg7: memref<1x1x8x128xf32, #tpu.memory_space<vmem>>) attributes {dimension_semantics = [#tpu.dimension_semantics<parallel>, #tpu.dimension_semantics<parallel>], iteration_bounds = array<i64: 2, 2>, scalar_prefetch = 0 : i64, scratch_operands = 0 : i64, tpu.core_type = #tpu.core_type<tc>, window_params = [{transform_indices = @transform_0, window_bounds = array<i64: 1, 4, 8, 16>}, {transform_indices = @transform_1, window_bounds = array<i64: 1, 4, 8, 16>}, {transform_indices = @transform_2, window_bounds = array<i64: 1, 8, 16>}, {transform_indices = @transform_3, window_bounds = array<i64: 1, 4, 8, 16>}, {transform_indices = @transform_4, window_bounds = array<i64: 1, 8, 16>}, {transform_indices = @transform_5, window_bounds = array<i64: 1, 1, 8, 128>}]} {
    %c1_i32 = arith.constant 1 : i32
    %0 = arith.cmpi eq, %arg1, %c1_i32 : i32
    %c0 = arith.constant 0 : index
    %c0_0 = arith.constant 0 : index
    %c0_1 = arith.constant 0 : index
    %c0_2 = arith.constant 0 : index
    %1 = vector.load %arg2[%c0, %c0_0, %c0_1, %c0_2] : memref<1x4x8x16xf32, #tpu.memory_space<vmem>>, vector<1x4x8x16xf32>
    %cst = arith.constant dense<0xFF800000> : vector<1x8x16xf32>
    %2 = vector.multi_reduction <maximumf>, %1, %cst [1] : vector<1x4x8x16xf32> to vector<1x8x16xf32>
    %3 = vector.shape_cast %2 : vector<1x8x16xf32> to vector<1x1x8x16xf32>
    %4 = vector.broadcast %3 : vector<1x1x8x16xf32> to vector<1x4x8x16xf32>
    %5 = arith.subf %1, %4 : vector<1x4x8x16xf32>
    %6 = math.exp %5 : vector<1x4x8x16xf32>
    %cst_3 = arith.constant dense<0.000000e+00> : vector<1x8x16xf32>
    %7 = vector.multi_reduction <add>, %6, %cst_3 [1] : vector<1x4x8x16xf32> to vector<1x8x16xf32>
    %8 = vector.shape_cast %7 : vector<1x8x16xf32> to vector<1x1x8x16xf32>
    %cst_4 = arith.constant 1.000000e+00 : f32
    %9 = vector.broadcast %cst_4 : f32 to vector<1x1x8x16xf32>
    %10 = arith.divf %9, %8 : vector<1x1x8x16xf32>
    %11 = vector.broadcast %10 : vector<1x1x8x16xf32> to vector<1x4x8x16xf32>
    %12 = arith.mulf %6, %11 : vector<1x4x8x16xf32>
    %13 = math.log %8 : vector<1x1x8x16xf32>
    %14 = vector.broadcast %13 : vector<1x1x8x16xf32> to vector<1x4x8x16xf32>
    %15 = arith.subf %5, %14 : vector<1x4x8x16xf32>
    %c0_5 = arith.constant 0 : index
    %c0_6 = arith.constant 0 : index
    %c0_7 = arith.constant 0 : index
    %c0_8 = arith.constant 0 : index
    %16 = vector.load %arg5[%c0_5, %c0_6, %c0_7, %c0_8] : memref<1x4x8x16xf32, #tpu.memory_space<vmem>>, vector<1x4x8x16xf32>
    tpu.vector_store %arg5[%c0_5, %c0_6, %c0_7, %c0_8], %12 {strides = array<i32>} : memref<1x4x8x16xf32, #tpu.memory_space<vmem>>, vector<1x4x8x16xf32>,
    %c0_9 = arith.constant 0 : index
    %c0_10 = arith.constant 0 : index
    %c0_11 = arith.constant 0 : index
    %17 = vector.load %arg4[%c0_9, %c0_10, %c0_11] : memref<1x8x16xi32, #tpu.memory_space<vmem>>, vector<1x8x16xi32>
    %c0_i32 = arith.constant 0 : i32
    %18 = vector.broadcast %c0_i32 : i32 to vector<1x8x16xi32>
    %19 = arith.cmpi eq, %17, %18 : vector<1x8x16xi32>
    %20 = vector.extract_strided_slice %15 {offsets = [0, 0, 0, 0], sizes = [1, 1, 8, 16], strides = [1, 1, 1, 1]} : vector<1x4x8x16xf32> to vector<1x1x8x16xf32>
    %21 = vector.shape_cast %20 : vector<1x1x8x16xf32> to vector<1x8x16xf32>
    %cst_12 = arith.constant 0.000000e+00 : f32
    %22 = vector.broadcast %cst_12 : f32 to vector<1x8x16xf32>
    %23 = arith.select %19, %21, %22 : vector<1x8x16xi1>, vector<1x8x16xf32>
    %c1_i32_13 = arith.constant 1 : i32
    %24 = vector.broadcast %c1_i32_13 : i32 to vector<1x8x16xi32>
    %25 = arith.cmpi eq, %17, %24 : vector<1x8x16xi32>
    %26 = vector.extract_strided_slice %15 {offsets = [0, 1, 0, 0], sizes = [1, 1, 8, 16], strides = [1, 1, 1, 1]} : vector<1x4x8x16xf32> to vector<1x1x8x16xf32>
    %27 = vector.shape_cast %26 : vector<1x1x8x16xf32> to vector<1x8x16xf32>
    %cst_14 = arith.constant 0.000000e+00 : f32
    %28 = vector.broadcast %cst_14 : f32 to vector<1x8x16xf32>
    %29 = arith.select %25, %27, %28 : vector<1x8x16xi1>, vector<1x8x16xf32>
    %c2_i32 = arith.constant 2 : i32
    %30 = vector.broadcast %c2_i32 : i32 to vector<1x8x16xi32>
    %31 = arith.cmpi eq, %17, %30 : vector<1x8x16xi32>
    %32 = vector.extract_strided_slice %15 {offsets = [0, 2, 0, 0], sizes = [1, 1, 8, 16], strides = [1, 1, 1, 1]} : vector<1x4x8x16xf32> to vector<1x1x8x16xf32>
    %33 = vector.shape_cast %32 : vector<1x1x8x16xf32> to vector<1x8x16xf32>
    %cst_15 = arith.constant 0.000000e+00 : f32
    %34 = vector.broadcast %cst_15 : f32 to vector<1x8x16xf32>
    %35 = arith.select %31, %33, %34 : vector<1x8x16xi1>, vector<1x8x16xf32>
    %c3_i32 = arith.constant 3 : i32
    %36 = vector.broadcast %c3_i32 : i32 to vector<1x8x16xi32>
    %37 = arith.cmpi eq, %17, %36 : vector<1x8x16xi32>
    %38 = vector.extract_strided_slice %15 {offsets = [0, 3, 0, 0], sizes = [1, 1, 8, 16], strides = [1, 1, 1, 1]} : vector<1x4x8x16xf32> to vector<1x1x8x16xf32>
    %39 = vector.shape_cast %38 : vector<1x1x8x16xf32> to vector<1x8x16xf32>
    %cst_16 = arith.constant 0.000000e+00 : f32
    %40 = vector.broadcast %cst_16 : f32 to vector<1x8x16xf32>
    %41 = arith.select %37, %39, %40 : vector<1x8x16xi1>, vector<1x8x16xf32>
    %42 = arith.addf %23, %29 : vector<1x8x16xf32>
    %43 = arith.addf %35, %41 : vector<1x8x16xf32>
    %44 = arith.addf %42, %43 : vector<1x8x16xf32>
    %45 = vector.shape_cast %44 : vector<1x8x16xf32> to vector<1x1x8x16xf32>
    %cst_17 = arith.constant dense<0.000000e+00> : vector<1xf32>
    %46 = vector.multi_reduction <add>, %45, %cst_17 [1, 2, 3] : vector<1x1x8x16xf32> to vector<1xf32>
    %47 = vector.shape_cast %46 : vector<1xf32> to vector<1x1x1x1xf32>
    %48 = vector.extract %47[0, 0, 0, 0] : f32 from vector<1x1x1x1xf32>
    %cst_18 = arith.constant 0.000000e+00 : f32
    %49 = arith.subf %cst_18, %48 : f32
    %50 = vector.broadcast %49 : f32 to vector<1x1x8x128xf32>
    %c0_19 = arith.constant 0 : index
    %c0_20 = arith.constant 0 : index
    %c0_21 = arith.constant 0 : index
    %c0_22 = arith.constant 0 : index
    %51 = vector.load %arg7[%c0_19, %c0_20, %c0_21, %c0_22] : memref<1x1x8x128xf32, #tpu.memory_space<vmem>>, vector<1x1x8x128xf32>
    tpu.vector_store %arg7[%c0_19, %c0_20, %c0_21, %c0_22], %50 {strides = array<i32>} : memref<1x1x8x128xf32, #tpu.memory_space<vmem>>, vector<1x1x8x128xf32>,
    %52 = arith.mulf %12, %15 : vector<1x4x8x16xf32>
    %cst_23 = arith.constant dense<0.000000e+00> : vector<1x8x16xf32>
    %53 = vector.multi_reduction <add>, %52, %cst_23 [1] : vector<1x4x8x16xf32> to vector<1x8x16xf32>
    %c0_24 = arith.constant 0 : index
    %c0_25 = arith.constant 0 : index
    %c0_26 = arith.constant 0 : index
    %c0_27 = arith.constant 0 : index
    %54 = vector.load %arg3[%c0_24, %c0_25, %c0_26, %c0_27] : memref<1x4x8x16xf32, #tpu.memory_space<vmem>>, vector<1x4x1x16xf32>
    %cst_28 = arith.constant dense<0xFF800000> : vector<1x1x16xf32>
    %55 = vector.multi_reduction <maximumf>, %54, %cst_28 [1] : vector<1x4x1x16xf32> to vector<1x1x16xf32>
    %56 = vector.shape_cast %55 : vector<1x1x16xf32> to vector<1x1x1x16xf32>
    %57 = vector.broadcast %56 : vector<1x1x1x16xf32> to vector<1x4x1x16xf32>
    %58 = arith.subf %54, %57 : vector<1x4x1x16xf32>
    %59 = math.exp %58 : vector<1x4x1x16xf32>
    %cst_29 = arith.constant dense<0.000000e+00> : vector<1x1x16xf32>
    %60 = vector.multi_reduction <add>, %59, %cst_29 [1] : vector<1x4x1x16xf32> to vector<1x1x16xf32>
    %61 = vector.shape_cast %60 : vector<1x1x16xf32> to vector<1x1x1x16xf32>
    %62 = math.log %61 : vector<1x1x1x16xf32>
    %63 = vector.broadcast %62 : vector<1x1x1x16xf32> to vector<1x4x1x16xf32>
    %64 = arith.subf %58, %63 : vector<1x4x1x16xf32>
    %65 = vector.extract_strided_slice %15 {offsets = [0, 0, 1, 0], sizes = [1, 4, 7, 16], strides = [1, 1, 1, 1]} : vector<1x4x8x16xf32> to vector<1x4x7x16xf32>
    %66 = vector.extract_strided_slice %15 {offsets = [0, 0, 0, 0], sizes = [1, 4, 1, 16], strides = [1, 1, 1, 1]} : vector<1x4x8x16xf32> to vector<1x4x1x16xf32>
    %67 = tpu.concatenate %65, %66 in 2 : vector<1x4x7x16xf32>, vector<1x4x1x16xf32> -> vector<1x4x8x16xf32>
    %68 = tpu.iota {dimensions = array<i32: 2>} : vector<1x1x8x1xi32>
    %c7_i32 = arith.constant 7 : i32
    %69 = vector.broadcast %c7_i32 : i32 to vector<1x1x8x1xi32>
    %70 = arith.cmpi slt, %68, %69 : vector<1x1x8x1xi32>
    %71 = vector.shape_cast %70 : vector<1x1x8x1xi1> to vector<1x1x8x1xi1>
    %72 = vector.broadcast %71 : vector<1x1x8x1xi1> to vector<1x4x8x16xi1>
    %73 = vector.shape_cast %64 : vector<1x4x1x16xf32> to vector<1x4x1x16xf32>
    %74 = vector.broadcast %73 : vector<1x4x1x16xf32> to vector<1x4x8x16xf32>
    %75 = arith.select %72, %67, %74 : vector<1x4x8x16xi1>, vector<1x4x8x16xf32>
    %76 = vector.extract_strided_slice %15 {offsets = [0, 0, 0, 1], sizes = [1, 4, 8, 15], strides = [1, 1, 1, 1]} : vector<1x4x8x16xf32> to vector<1x4x8x15xf32>
    %77 = vector.extract_strided_slice %15 {offsets = [0, 0, 0, 0], sizes = [1, 4, 8, 1], strides = [1, 1, 1, 1]} : vector<1x4x8x16xf32> to vector<1x4x8x1xf32>
    %78 = tpu.concatenate %76, %77 in 3 : vector<1x4x8x15xf32>, vector<1x4x8x1xf32> -> vector<1x4x8x16xf32>
    %79 = tpu.iota {dimensions = array<i32: 3>} : vector<1x1x1x16xi32>
    %c15_i32 = arith.constant 15 : i32
    %80 = vector.broadcast %c15_i32 : i32 to vector<1x1x1x16xi32>
    %81 = arith.cmpi slt, %79, %80 : vector<1x1x1x16xi32>
    %cst_30 = arith.constant 0.000000e+00 : f32
    %82 = vector.broadcast %cst_30 : f32 to vector<1x4x8x1xf32>
    %83 = vector.shape_cast %81 : vector<1x1x1x16xi1> to vector<1x1x1x16xi1>
    %84 = vector.broadcast %83 : vector<1x1x1x16xi1> to vector<1x4x8x16xi1>
    %85 = vector.shape_cast %82 : vector<1x4x8x1xf32> to vector<1x4x8x1xf32>
    %86 = vector.broadcast %85 : vector<1x4x8x1xf32> to vector<1x4x8x16xf32>
    %87 = arith.select %84, %78, %86 : vector<1x4x8x16xi1>, vector<1x4x8x16xf32>
    %88 = arith.mulf %12, %75 : vector<1x4x8x16xf32>
    %cst_31 = arith.constant dense<0.000000e+00> : vector<1x8x16xf32>
    %89 = vector.multi_reduction <add>, %88, %cst_31 [1] : vector<1x4x8x16xf32> to vector<1x8x16xf32>
    %90 = arith.subf %53, %89 : vector<1x8x16xf32>
    %91 = arith.mulf %12, %87 : vector<1x4x8x16xf32>
    %cst_32 = arith.constant dense<0.000000e+00> : vector<1x8x16xf32>
    %92 = vector.multi_reduction <add>, %91, %cst_32 [1] : vector<1x4x8x16xf32> to vector<1x8x16xf32>
    %93 = arith.subf %53, %92 : vector<1x8x16xf32>
    %94 = tpu.iota {dimensions = array<i32: 1>} : vector<1x8x1xi32>
    %95 = tpu.iota {dimensions = array<i32: 2>} : vector<1x1x16xi32>
    %c7_i32_33 = arith.constant 7 : i32
    %96 = vector.broadcast %c7_i32_33 : i32 to vector<1x8x1xi32>
    %97 = arith.cmpi slt, %94, %96 : vector<1x8x1xi32>
    %true = arith.constant true
    %98 = arith.xori %0, %true : i1
    %99 = vector.broadcast %98 : i1 to vector<1x8x1xi1>
    %100 = arith.ori %97, %99 : vector<1x8x1xi1>
    %cst_34 = arith.constant 0.000000e+00 : f32
    %101 = vector.shape_cast %100 : vector<1x8x1xi1> to vector<1x8x1xi1>
    %102 = vector.broadcast %101 : vector<1x8x1xi1> to vector<1x8x16xi1>
    %103 = vector.broadcast %cst_34 : f32 to vector<1x8x16xf32>
    %104 = arith.select %102, %90, %103 : vector<1x8x16xi1>, vector<1x8x16xf32>
    %c15_i32_35 = arith.constant 15 : i32
    %105 = vector.broadcast %c15_i32_35 : i32 to vector<1x1x16xi32>
    %106 = arith.cmpi slt, %95, %105 : vector<1x1x16xi32>
    %cst_36 = arith.constant 0.000000e+00 : f32
    %107 = vector.shape_cast %106 : vector<1x1x16xi1> to vector<1x1x16xi1>
    %108 = vector.broadcast %107 : vector<1x1x16xi1> to vector<1x8x16xi1>
    %109 = vector.broadcast %cst_36 : f32 to vector<1x8x16xf32>
    %110 = arith.select %108, %93, %109 : vector<1x8x16xi1>, vector<1x8x16xf32>
    %111 = arith.addf %104, %110 : vector<1x8x16xf32>
    %c0_37 = arith.constant 0 : index
    %c0_38 = arith.constant 0 : index
    %c0_39 = arith.constant 0 : index
    %112 = vector.load %arg6[%c0_37, %c0_38, %c0_39] : memref<1x8x16xf32, #tpu.memory_space<vmem>>, vector<1x8x16xf32>
    tpu.vector_store %arg6[%c0_37, %c0_38, %c0_39], %111 {strides = array<i32>} : memref<1x8x16xf32, #tpu.memory_space<vmem>>, vector<1x8x16xf32>,
    return
  }
  func.func @transform_0(%arg0: i32, %arg1: i32) -> (i32, i32, i32, i32) {
    %c0_i32 = arith.constant 0 : i32
    %c0_i32_0 = arith.constant 0 : i32
    %c0_i32_1 = arith.constant 0 : i32
    return %arg0, %c0_i32, %arg1, %c0_i32_0 : i32, i32, i32, i32
  }
  func.func @transform_1(%arg0: i32, %arg1: i32) -> (i32, i32, i32, i32) {
    %c1_i32 = arith.constant 1 : i32
    %0 = arith.addi %arg1, %c1_i32 : i32
    %c1_i32_0 = arith.constant 1 : i32
    %1 = arith.muli %0, %c1_i32_0 : i32
    %c1_i32_1 = arith.constant 1 : i32
    %2 = arith.minsi %1, %c1_i32_1 : i32
    %c0_i32 = arith.constant 0 : i32
    %c0_i32_2 = arith.constant 0 : i32
    %c0_i32_3 = arith.constant 0 : i32
    return %arg0, %c0_i32, %2, %c0_i32_2 : i32, i32, i32, i32
  }
  func.func @transform_2(%arg0: i32, %arg1: i32) -> (i32, i32, i32) {
    %c0_i32 = arith.constant 0 : i32
    %c0_i32_0 = arith.constant 0 : i32
    return %arg0, %arg1, %c0_i32 : i32, i32, i32
  }
  func.func @transform_3(%arg0: i32, %arg1: i32) -> (i32, i32, i32, i32) {
    %c0_i32 = arith.constant 0 : i32
    %c0_i32_0 = arith.constant 0 : i32
    %c0_i32_1 = arith.constant 0 : i32
    return %arg0, %c0_i32, %arg1, %c0_i32_0 : i32, i32, i32, i32
  }
  func.func @transform_4(%arg0: i32, %arg1: i32) -> (i32, i32, i32) {
    %c0_i32 = arith.constant 0 : i32
    %c0_i32_0 = arith.constant 0 : i32
    return %arg0, %arg1, %c0_i32 : i32, i32, i32
  }
  func.func @transform_5(%arg0: i32, %arg1: i32) -> (i32, i32, i32, i32) {
    %c0_i32 = arith.constant 0 : i32
    %c0_i32_0 = arith.constant 0 : i32
    %c0_i32_1 = arith.constant 0 : i32
    return %arg0, %arg1, %c0_i32, %c0_i32_0 : i32, i32, i32, i32
  }
}

module attributes {stable_mosaic.version = 11 : i64} {
  func.func @_dist_map_kernel(%arg0: i32, %arg1: memref<1x16x16xi32, #tpu.memory_space<vmem>>, %arg2: memref<1x16x16xf32, #tpu.memory_space<vmem>>, %arg3: memref<1x16x16xf32, #tpu.memory_space<vmem>>) attributes {dimension_semantics = [#tpu.dimension_semantics<parallel>], iteration_bounds = array<i64: 2>, scalar_prefetch = 0 : i64, scratch_operands = 1 : i64, tpu.core_type = #tpu.core_type<tc>, window_params = [{transform_indices = @transform_0, window_bounds = array<i64: 1, 16, 16>}, {transform_indices = @transform_1, window_bounds = array<i64: 1, 16, 16>}]} {
    %c0 = arith.constant 0 : index
    %c0_0 = arith.constant 0 : index
    %c0_1 = arith.constant 0 : index
    %0 = vector.load %arg1[%c0, %c0_0, %c0_1] : memref<1x16x16xi32, #tpu.memory_space<vmem>>, vector<1x16x16xi32>
    %1 = tpu.iota {dimensions = array<i32: 1>} : vector<1x16x1xi32>
    %2 = tpu.iota {dimensions = array<i32: 2>} : vector<1x1x16xi32>
    %3 = vector.extract_strided_slice %0 {offsets = [0, 1, 0], sizes = [1, 15, 16], strides = [1, 1, 1]} : vector<1x16x16xi32> to vector<1x15x16xi32>
    %4 = vector.extract_strided_slice %0 {offsets = [0, 0, 0], sizes = [1, 1, 16], strides = [1, 1, 1]} : vector<1x16x16xi32> to vector<1x1x16xi32>
    %5 = tpu.concatenate %3, %4 in 1 : vector<1x15x16xi32>, vector<1x1x16xi32> -> vector<1x16x16xi32>
    %6 = tpu.iota {dimensions = array<i32: 1>} : vector<1x16x1xi32>
    %c15_i32 = arith.constant 15 : i32
    %7 = vector.broadcast %c15_i32 : i32 to vector<1x16x1xi32>
    %8 = arith.cmpi slt, %6, %7 : vector<1x16x1xi32>
    %c0_i32 = arith.constant 0 : i32
    %9 = vector.broadcast %c0_i32 : i32 to vector<1x1x16xi32>
    %10 = vector.shape_cast %8 : vector<1x16x1xi1> to vector<1x16x1xi1>
    %11 = vector.broadcast %10 : vector<1x16x1xi1> to vector<1x16x16xi1>
    %12 = vector.shape_cast %9 : vector<1x1x16xi32> to vector<1x1x16xi32>
    %13 = vector.broadcast %12 : vector<1x1x16xi32> to vector<1x16x16xi32>
    %14 = arith.select %11, %5, %13 : vector<1x16x16xi1>, vector<1x16x16xi32>
    %15 = vector.extract_strided_slice %0 {offsets = [0, 0, 1], sizes = [1, 16, 15], strides = [1, 1, 1]} : vector<1x16x16xi32> to vector<1x16x15xi32>
    %16 = vector.extract_strided_slice %0 {offsets = [0, 0, 0], sizes = [1, 16, 1], strides = [1, 1, 1]} : vector<1x16x16xi32> to vector<1x16x1xi32>
    %17 = tpu.concatenate %15, %16 in 2 : vector<1x16x15xi32>, vector<1x16x1xi32> -> vector<1x16x16xi32>
    %18 = tpu.iota {dimensions = array<i32: 2>} : vector<1x1x16xi32>
    %c15_i32_2 = arith.constant 15 : i32
    %19 = vector.broadcast %c15_i32_2 : i32 to vector<1x1x16xi32>
    %20 = arith.cmpi slt, %18, %19 : vector<1x1x16xi32>
    %c0_i32_3 = arith.constant 0 : i32
    %21 = vector.broadcast %c0_i32_3 : i32 to vector<1x16x1xi32>
    %22 = vector.shape_cast %20 : vector<1x1x16xi1> to vector<1x1x16xi1>
    %23 = vector.broadcast %22 : vector<1x1x16xi1> to vector<1x16x16xi1>
    %24 = vector.shape_cast %21 : vector<1x16x1xi32> to vector<1x16x1xi32>
    %25 = vector.broadcast %24 : vector<1x16x1xi32> to vector<1x16x16xi32>
    %26 = arith.select %23, %17, %25 : vector<1x16x16xi1>, vector<1x16x16xi32>
    %27 = arith.cmpi ne, %14, %0 : vector<1x16x16xi32>
    %c15_i32_4 = arith.constant 15 : i32
    %28 = vector.broadcast %c15_i32_4 : i32 to vector<1x16x1xi32>
    %29 = arith.cmpi slt, %1, %28 : vector<1x16x1xi32>
    %30 = vector.broadcast %29 : vector<1x16x1xi1> to vector<1x16x16xi1>
    %31 = arith.andi %27, %30 : vector<1x16x16xi1>
    %32 = arith.cmpi ne, %26, %0 : vector<1x16x16xi32>
    %c15_i32_5 = arith.constant 15 : i32
    %33 = vector.broadcast %c15_i32_5 : i32 to vector<1x1x16xi32>
    %34 = arith.cmpi slt, %2, %33 : vector<1x1x16xi32>
    %35 = vector.broadcast %34 : vector<1x1x16xi1> to vector<1x16x16xi1>
    %36 = arith.andi %32, %35 : vector<1x16x16xi1>
    %37 = arith.ori %31, %36 : vector<1x16x16xi1>
    %c255_i32 = arith.constant 255 : i32
    %38 = vector.broadcast %c255_i32 : i32 to vector<1x16x16xi32>
    %39 = arith.cmpi eq, %0, %38 : vector<1x16x16xi32>
    %40 = arith.ori %37, %39 : vector<1x16x16xi1>
    %cst = arith.constant 0.000000e+00 : f32
    %cst_6 = arith.constant 1.000000e+09 : f32
    %41 = vector.broadcast %cst : f32 to vector<1x16x16xf32>
    %42 = vector.broadcast %cst_6 : f32 to vector<1x16x16xf32>
    %43 = arith.select %40, %41, %42 : vector<1x16x16xi1>, vector<1x16x16xf32>
    %44 = vector.extract_strided_slice %43 {offsets = [0, 0, 15], sizes = [1, 16, 1], strides = [1, 1, 1]} : vector<1x16x16xf32> to vector<1x16x1xf32>
    %45 = vector.extract_strided_slice %43 {offsets = [0, 0, 0], sizes = [1, 16, 15], strides = [1, 1, 1]} : vector<1x16x16xf32> to vector<1x16x15xf32>
    %46 = tpu.concatenate %44, %45 in 2 : vector<1x16x1xf32>, vector<1x16x15xf32> -> vector<1x16x16xf32>
    %47 = tpu.iota {dimensions = array<i32: 2>} : vector<1x1x16xi32>
    %c1_i32 = arith.constant 1 : i32
    %48 = vector.broadcast %c1_i32 : i32 to vector<1x1x16xi32>
    %49 = arith.cmpi sge, %47, %48 : vector<1x1x16xi32>
    %cst_7 = arith.constant 1.000000e+09 : f32
    %50 = vector.broadcast %cst_7 : f32 to vector<1x16x1xf32>
    %51 = vector.shape_cast %49 : vector<1x1x16xi1> to vector<1x1x16xi1>
    %52 = vector.broadcast %51 : vector<1x1x16xi1> to vector<1x16x16xi1>
    %53 = vector.shape_cast %50 : vector<1x16x1xf32> to vector<1x16x1xf32>
    %54 = vector.broadcast %53 : vector<1x16x1xf32> to vector<1x16x16xf32>
    %55 = arith.select %52, %46, %54 : vector<1x16x16xi1>, vector<1x16x16xf32>
    %cst_8 = arith.constant 1.000000e+00 : f32
    %56 = vector.broadcast %cst_8 : f32 to vector<1x16x16xf32>
    %57 = arith.addf %55, %56 : vector<1x16x16xf32>
    %58 = arith.minimumf %43, %57 : vector<1x16x16xf32>
    %59 = vector.extract_strided_slice %43 {offsets = [0, 0, 1], sizes = [1, 16, 15], strides = [1, 1, 1]} : vector<1x16x16xf32> to vector<1x16x15xf32>
    %60 = vector.extract_strided_slice %43 {offsets = [0, 0, 0], sizes = [1, 16, 1], strides = [1, 1, 1]} : vector<1x16x16xf32> to vector<1x16x1xf32>
    %61 = tpu.concatenate %59, %60 in 2 : vector<1x16x15xf32>, vector<1x16x1xf32> -> vector<1x16x16xf32>
    %62 = tpu.iota {dimensions = array<i32: 2>} : vector<1x1x16xi32>
    %c15_i32_9 = arith.constant 15 : i32
    %63 = vector.broadcast %c15_i32_9 : i32 to vector<1x1x16xi32>
    %64 = arith.cmpi slt, %62, %63 : vector<1x1x16xi32>
    %cst_10 = arith.constant 1.000000e+09 : f32
    %65 = vector.broadcast %cst_10 : f32 to vector<1x16x1xf32>
    %66 = vector.shape_cast %64 : vector<1x1x16xi1> to vector<1x1x16xi1>
    %67 = vector.broadcast %66 : vector<1x1x16xi1> to vector<1x16x16xi1>
    %68 = vector.shape_cast %65 : vector<1x16x1xf32> to vector<1x16x1xf32>
    %69 = vector.broadcast %68 : vector<1x16x1xf32> to vector<1x16x16xf32>
    %70 = arith.select %67, %61, %69 : vector<1x16x16xi1>, vector<1x16x16xf32>
    %cst_11 = arith.constant 1.000000e+00 : f32
    %71 = vector.broadcast %cst_11 : f32 to vector<1x16x16xf32>
    %72 = arith.addf %70, %71 : vector<1x16x16xf32>
    %73 = arith.minimumf %43, %72 : vector<1x16x16xf32>
    %74 = vector.extract_strided_slice %58 {offsets = [0, 0, 14], sizes = [1, 16, 2], strides = [1, 1, 1]} : vector<1x16x16xf32> to vector<1x16x2xf32>
    %75 = vector.extract_strided_slice %58 {offsets = [0, 0, 0], sizes = [1, 16, 14], strides = [1, 1, 1]} : vector<1x16x16xf32> to vector<1x16x14xf32>
    %76 = tpu.concatenate %74, %75 in 2 : vector<1x16x2xf32>, vector<1x16x14xf32> -> vector<1x16x16xf32>
    %77 = tpu.iota {dimensions = array<i32: 2>} : vector<1x1x16xi32>
    %c2_i32 = arith.constant 2 : i32
    %78 = vector.broadcast %c2_i32 : i32 to vector<1x1x16xi32>
    %79 = arith.cmpi sge, %77, %78 : vector<1x1x16xi32>
    %cst_12 = arith.constant 1.000000e+09 : f32
    %80 = vector.broadcast %cst_12 : f32 to vector<1x16x1xf32>
    %81 = vector.shape_cast %79 : vector<1x1x16xi1> to vector<1x1x16xi1>
    %82 = vector.broadcast %81 : vector<1x1x16xi1> to vector<1x16x16xi1>
    %83 = vector.shape_cast %80 : vector<1x16x1xf32> to vector<1x16x1xf32>
    %84 = vector.broadcast %83 : vector<1x16x1xf32> to vector<1x16x16xf32>
    %85 = arith.select %82, %76, %84 : vector<1x16x16xi1>, vector<1x16x16xf32>
    %cst_13 = arith.constant 2.000000e+00 : f32
    %86 = vector.broadcast %cst_13 : f32 to vector<1x16x16xf32>
    %87 = arith.addf %85, %86 : vector<1x16x16xf32>
    %88 = arith.minimumf %58, %87 : vector<1x16x16xf32>
    %89 = vector.extract_strided_slice %73 {offsets = [0, 0, 2], sizes = [1, 16, 14], strides = [1, 1, 1]} : vector<1x16x16xf32> to vector<1x16x14xf32>
    %90 = vector.extract_strided_slice %73 {offsets = [0, 0, 0], sizes = [1, 16, 2], strides = [1, 1, 1]} : vector<1x16x16xf32> to vector<1x16x2xf32>
    %91 = tpu.concatenate %89, %90 in 2 : vector<1x16x14xf32>, vector<1x16x2xf32> -> vector<1x16x16xf32>
    %92 = tpu.iota {dimensions = array<i32: 2>} : vector<1x1x16xi32>
    %c14_i32 = arith.constant 14 : i32
    %93 = vector.broadcast %c14_i32 : i32 to vector<1x1x16xi32>
    %94 = arith.cmpi slt, %92, %93 : vector<1x1x16xi32>
    %cst_14 = arith.constant 1.000000e+09 : f32
    %95 = vector.broadcast %cst_14 : f32 to vector<1x16x1xf32>
    %96 = vector.shape_cast %94 : vector<1x1x16xi1> to vector<1x1x16xi1>
    %97 = vector.broadcast %96 : vector<1x1x16xi1> to vector<1x16x16xi1>
    %98 = vector.shape_cast %95 : vector<1x16x1xf32> to vector<1x16x1xf32>
    %99 = vector.broadcast %98 : vector<1x16x1xf32> to vector<1x16x16xf32>
    %100 = arith.select %97, %91, %99 : vector<1x16x16xi1>, vector<1x16x16xf32>
    %cst_15 = arith.constant 2.000000e+00 : f32
    %101 = vector.broadcast %cst_15 : f32 to vector<1x16x16xf32>
    %102 = arith.addf %100, %101 : vector<1x16x16xf32>
    %103 = arith.minimumf %73, %102 : vector<1x16x16xf32>
    %104 = vector.extract_strided_slice %88 {offsets = [0, 0, 12], sizes = [1, 16, 4], strides = [1, 1, 1]} : vector<1x16x16xf32> to vector<1x16x4xf32>
    %105 = vector.extract_strided_slice %88 {offsets = [0, 0, 0], sizes = [1, 16, 12], strides = [1, 1, 1]} : vector<1x16x16xf32> to vector<1x16x12xf32>
    %106 = tpu.concatenate %104, %105 in 2 : vector<1x16x4xf32>, vector<1x16x12xf32> -> vector<1x16x16xf32>
    %107 = tpu.iota {dimensions = array<i32: 2>} : vector<1x1x16xi32>
    %c4_i32 = arith.constant 4 : i32
    %108 = vector.broadcast %c4_i32 : i32 to vector<1x1x16xi32>
    %109 = arith.cmpi sge, %107, %108 : vector<1x1x16xi32>
    %cst_16 = arith.constant 1.000000e+09 : f32
    %110 = vector.broadcast %cst_16 : f32 to vector<1x16x1xf32>
    %111 = vector.shape_cast %109 : vector<1x1x16xi1> to vector<1x1x16xi1>
    %112 = vector.broadcast %111 : vector<1x1x16xi1> to vector<1x16x16xi1>
    %113 = vector.shape_cast %110 : vector<1x16x1xf32> to vector<1x16x1xf32>
    %114 = vector.broadcast %113 : vector<1x16x1xf32> to vector<1x16x16xf32>
    %115 = arith.select %112, %106, %114 : vector<1x16x16xi1>, vector<1x16x16xf32>
    %cst_17 = arith.constant 4.000000e+00 : f32
    %116 = vector.broadcast %cst_17 : f32 to vector<1x16x16xf32>
    %117 = arith.addf %115, %116 : vector<1x16x16xf32>
    %118 = arith.minimumf %88, %117 : vector<1x16x16xf32>
    %119 = vector.extract_strided_slice %103 {offsets = [0, 0, 4], sizes = [1, 16, 12], strides = [1, 1, 1]} : vector<1x16x16xf32> to vector<1x16x12xf32>
    %120 = vector.extract_strided_slice %103 {offsets = [0, 0, 0], sizes = [1, 16, 4], strides = [1, 1, 1]} : vector<1x16x16xf32> to vector<1x16x4xf32>
    %121 = tpu.concatenate %119, %120 in 2 : vector<1x16x12xf32>, vector<1x16x4xf32> -> vector<1x16x16xf32>
    %122 = tpu.iota {dimensions = array<i32: 2>} : vector<1x1x16xi32>
    %c12_i32 = arith.constant 12 : i32
    %123 = vector.broadcast %c12_i32 : i32 to vector<1x1x16xi32>
    %124 = arith.cmpi slt, %122, %123 : vector<1x1x16xi32>
    %cst_18 = arith.constant 1.000000e+09 : f32
    %125 = vector.broadcast %cst_18 : f32 to vector<1x16x1xf32>
    %126 = vector.shape_cast %124 : vector<1x1x16xi1> to vector<1x1x16xi1>
    %127 = vector.broadcast %126 : vector<1x1x16xi1> to vector<1x16x16xi1>
    %128 = vector.shape_cast %125 : vector<1x16x1xf32> to vector<1x16x1xf32>
    %129 = vector.broadcast %128 : vector<1x16x1xf32> to vector<1x16x16xf32>
    %130 = arith.select %127, %121, %129 : vector<1x16x16xi1>, vector<1x16x16xf32>
    %cst_19 = arith.constant 4.000000e+00 : f32
    %131 = vector.broadcast %cst_19 : f32 to vector<1x16x16xf32>
    %132 = arith.addf %130, %131 : vector<1x16x16xf32>
    %133 = arith.minimumf %103, %132 : vector<1x16x16xf32>
    %134 = vector.extract_strided_slice %118 {offsets = [0, 0, 8], sizes = [1, 16, 8], strides = [1, 1, 1]} : vector<1x16x16xf32> to vector<1x16x8xf32>
    %135 = vector.extract_strided_slice %118 {offsets = [0, 0, 0], sizes = [1, 16, 8], strides = [1, 1, 1]} : vector<1x16x16xf32> to vector<1x16x8xf32>
    %136 = tpu.concatenate %134, %135 in 2 : vector<1x16x8xf32>, vector<1x16x8xf32> -> vector<1x16x16xf32>
    %137 = tpu.iota {dimensions = array<i32: 2>} : vector<1x1x16xi32>
    %c8_i32 = arith.constant 8 : i32
    %138 = vector.broadcast %c8_i32 : i32 to vector<1x1x16xi32>
    %139 = arith.cmpi sge, %137, %138 : vector<1x1x16xi32>
    %cst_20 = arith.constant 1.000000e+09 : f32
    %140 = vector.broadcast %cst_20 : f32 to vector<1x16x1xf32>
    %141 = vector.shape_cast %139 : vector<1x1x16xi1> to vector<1x1x16xi1>
    %142 = vector.broadcast %141 : vector<1x1x16xi1> to vector<1x16x16xi1>
    %143 = vector.shape_cast %140 : vector<1x16x1xf32> to vector<1x16x1xf32>
    %144 = vector.broadcast %143 : vector<1x16x1xf32> to vector<1x16x16xf32>
    %145 = arith.select %142, %136, %144 : vector<1x16x16xi1>, vector<1x16x16xf32>
    %cst_21 = arith.constant 8.000000e+00 : f32
    %146 = vector.broadcast %cst_21 : f32 to vector<1x16x16xf32>
    %147 = arith.addf %145, %146 : vector<1x16x16xf32>
    %148 = arith.minimumf %118, %147 : vector<1x16x16xf32>
    %149 = vector.extract_strided_slice %133 {offsets = [0, 0, 8], sizes = [1, 16, 8], strides = [1, 1, 1]} : vector<1x16x16xf32> to vector<1x16x8xf32>
    %150 = vector.extract_strided_slice %133 {offsets = [0, 0, 0], sizes = [1, 16, 8], strides = [1, 1, 1]} : vector<1x16x16xf32> to vector<1x16x8xf32>
    %151 = tpu.concatenate %149, %150 in 2 : vector<1x16x8xf32>, vector<1x16x8xf32> -> vector<1x16x16xf32>
    %152 = tpu.iota {dimensions = array<i32: 2>} : vector<1x1x16xi32>
    %c8_i32_22 = arith.constant 8 : i32
    %153 = vector.broadcast %c8_i32_22 : i32 to vector<1x1x16xi32>
    %154 = arith.cmpi slt, %152, %153 : vector<1x1x16xi32>
    %cst_23 = arith.constant 1.000000e+09 : f32
    %155 = vector.broadcast %cst_23 : f32 to vector<1x16x1xf32>
    %156 = vector.shape_cast %154 : vector<1x1x16xi1> to vector<1x1x16xi1>
    %157 = vector.broadcast %156 : vector<1x1x16xi1> to vector<1x16x16xi1>
    %158 = vector.shape_cast %155 : vector<1x16x1xf32> to vector<1x16x1xf32>
    %159 = vector.broadcast %158 : vector<1x16x1xf32> to vector<1x16x16xf32>
    %160 = arith.select %157, %151, %159 : vector<1x16x16xi1>, vector<1x16x16xf32>
    %cst_24 = arith.constant 8.000000e+00 : f32
    %161 = vector.broadcast %cst_24 : f32 to vector<1x16x16xf32>
    %162 = arith.addf %160, %161 : vector<1x16x16xf32>
    %163 = arith.minimumf %133, %162 : vector<1x16x16xf32>
    %164 = arith.minimumf %148, %163 : vector<1x16x16xf32>
    %cst_25 = arith.constant 1.000000e+04 : f32
    %165 = vector.broadcast %cst_25 : f32 to vector<1x16x16xf32>
    %166 = arith.minimumf %164, %165 : vector<1x16x16xf32>
    %167 = arith.mulf %166, %166 : vector<1x16x16xf32>
    %c0_26 = arith.constant 0 : index
    %c0_27 = arith.constant 0 : index
    %c0_28 = arith.constant 0 : index
    %168 = vector.load %arg3[%c0_26, %c0_27, %c0_28] : memref<1x16x16xf32, #tpu.memory_space<vmem>>, vector<1x16x16xf32>
    tpu.vector_store %arg3[%c0_26, %c0_27, %c0_28], %167 {strides = array<i32>} : memref<1x16x16xf32, #tpu.memory_space<vmem>>, vector<1x16x16xf32>,
    %169 = arith.sitofp %1 : vector<1x16x1xi32> to vector<1x16x1xf32>
    %cst_29 = arith.constant 1.000000e+09 : f32
    %170 = vector.broadcast %cst_29 : f32 to vector<1x16x16xf32>
    %c0_i32_30 = arith.constant 0 : i32
    %c2_i32_31 = arith.constant 2 : i32
    %171 = arith.addi %c0_i32_30, %c2_i32_31 : i32
    %c1_i32_32 = arith.constant 1 : i32
    %172 = scf.for %arg4 = %c0_i32_30 to %171 step %c1_i32_32 iter_args(%arg5 = %170) -> (vector<1x16x16xf32>)  : i32 {
      %c8_i32_41 = arith.constant 8 : i32
      %183 = arith.muli %arg4, %c8_i32_41 : i32
      %184 = tpu.assume_multiple %183, 8 : i32
      %c0_42 = arith.constant 0 : index
      %185 = arith.index_cast %184 : i32 to index
      %c0_43 = arith.constant 0 : index
      %186 = vector.load %arg3[%c0_42, %185, %c0_43] : memref<1x16x16xf32, #tpu.memory_space<vmem>>, vector<1x8x16xf32>
      %187 = vector.extract_strided_slice %186 {offsets = [0, 0, 0], sizes = [1, 1, 16], strides = [1, 1, 1]} : vector<1x8x16xf32> to vector<1x1x16xf32>
      %c8_i32_44 = arith.constant 8 : i32
      %188 = arith.muli %arg4, %c8_i32_44 : i32
      %c0_i32_45 = arith.constant 0 : i32
      %189 = arith.addi %188, %c0_i32_45 : i32
      %190 = arith.sitofp %189 : i32 to f32
      %191 = vector.broadcast %190 : f32 to vector<1x16x1xf32>
      %192 = arith.subf %169, %191 : vector<1x16x1xf32>
      %193 = arith.mulf %192, %192 : vector<1x16x1xf32>
      %194 = vector.broadcast %187 : vector<1x1x16xf32> to vector<1x16x16xf32>
      %195 = vector.broadcast %193 : vector<1x16x1xf32> to vector<1x16x16xf32>
      %196 = arith.addf %194, %195 : vector<1x16x16xf32>
      %197 = arith.minimumf %arg5, %196 : vector<1x16x16xf32>
      %198 = vector.extract_strided_slice %186 {offsets = [0, 1, 0], sizes = [1, 1, 16], strides = [1, 1, 1]} : vector<1x8x16xf32> to vector<1x1x16xf32>
      %c8_i32_46 = arith.constant 8 : i32
      %199 = arith.muli %arg4, %c8_i32_46 : i32
      %c1_i32_47 = arith.constant 1 : i32
      %200 = arith.addi %199, %c1_i32_47 : i32
      %201 = arith.sitofp %200 : i32 to f32
      %202 = vector.broadcast %201 : f32 to vector<1x16x1xf32>
      %203 = arith.subf %169, %202 : vector<1x16x1xf32>
      %204 = arith.mulf %203, %203 : vector<1x16x1xf32>
      %205 = vector.broadcast %198 : vector<1x1x16xf32> to vector<1x16x16xf32>
      %206 = vector.broadcast %204 : vector<1x16x1xf32> to vector<1x16x16xf32>
      %207 = arith.addf %205, %206 : vector<1x16x16xf32>
      %208 = arith.minimumf %197, %207 : vector<1x16x16xf32>
      %209 = vector.extract_strided_slice %186 {offsets = [0, 2, 0], sizes = [1, 1, 16], strides = [1, 1, 1]} : vector<1x8x16xf32> to vector<1x1x16xf32>
      %c8_i32_48 = arith.constant 8 : i32
      %210 = arith.muli %arg4, %c8_i32_48 : i32
      %c2_i32_49 = arith.constant 2 : i32
      %211 = arith.addi %210, %c2_i32_49 : i32
      %212 = arith.sitofp %211 : i32 to f32
      %213 = vector.broadcast %212 : f32 to vector<1x16x1xf32>
      %214 = arith.subf %169, %213 : vector<1x16x1xf32>
      %215 = arith.mulf %214, %214 : vector<1x16x1xf32>
      %216 = vector.broadcast %209 : vector<1x1x16xf32> to vector<1x16x16xf32>
      %217 = vector.broadcast %215 : vector<1x16x1xf32> to vector<1x16x16xf32>
      %218 = arith.addf %216, %217 : vector<1x16x16xf32>
      %219 = arith.minimumf %208, %218 : vector<1x16x16xf32>
      %220 = vector.extract_strided_slice %186 {offsets = [0, 3, 0], sizes = [1, 1, 16], strides = [1, 1, 1]} : vector<1x8x16xf32> to vector<1x1x16xf32>
      %c8_i32_50 = arith.constant 8 : i32
      %221 = arith.muli %arg4, %c8_i32_50 : i32
      %c3_i32 = arith.constant 3 : i32
      %222 = arith.addi %221, %c3_i32 : i32
      %223 = arith.sitofp %222 : i32 to f32
      %224 = vector.broadcast %223 : f32 to vector<1x16x1xf32>
      %225 = arith.subf %169, %224 : vector<1x16x1xf32>
      %226 = arith.mulf %225, %225 : vector<1x16x1xf32>
      %227 = vector.broadcast %220 : vector<1x1x16xf32> to vector<1x16x16xf32>
      %228 = vector.broadcast %226 : vector<1x16x1xf32> to vector<1x16x16xf32>
      %229 = arith.addf %227, %228 : vector<1x16x16xf32>
      %230 = arith.minimumf %219, %229 : vector<1x16x16xf32>
      %231 = vector.extract_strided_slice %186 {offsets = [0, 4, 0], sizes = [1, 1, 16], strides = [1, 1, 1]} : vector<1x8x16xf32> to vector<1x1x16xf32>
      %c8_i32_51 = arith.constant 8 : i32
      %232 = arith.muli %arg4, %c8_i32_51 : i32
      %c4_i32_52 = arith.constant 4 : i32
      %233 = arith.addi %232, %c4_i32_52 : i32
      %234 = arith.sitofp %233 : i32 to f32
      %235 = vector.broadcast %234 : f32 to vector<1x16x1xf32>
      %236 = arith.subf %169, %235 : vector<1x16x1xf32>
      %237 = arith.mulf %236, %236 : vector<1x16x1xf32>
      %238 = vector.broadcast %231 : vector<1x1x16xf32> to vector<1x16x16xf32>
      %239 = vector.broadcast %237 : vector<1x16x1xf32> to vector<1x16x16xf32>
      %240 = arith.addf %238, %239 : vector<1x16x16xf32>
      %241 = arith.minimumf %230, %240 : vector<1x16x16xf32>
      %242 = vector.extract_strided_slice %186 {offsets = [0, 5, 0], sizes = [1, 1, 16], strides = [1, 1, 1]} : vector<1x8x16xf32> to vector<1x1x16xf32>
      %c8_i32_53 = arith.constant 8 : i32
      %243 = arith.muli %arg4, %c8_i32_53 : i32
      %c5_i32 = arith.constant 5 : i32
      %244 = arith.addi %243, %c5_i32 : i32
      %245 = arith.sitofp %244 : i32 to f32
      %246 = vector.broadcast %245 : f32 to vector<1x16x1xf32>
      %247 = arith.subf %169, %246 : vector<1x16x1xf32>
      %248 = arith.mulf %247, %247 : vector<1x16x1xf32>
      %249 = vector.broadcast %242 : vector<1x1x16xf32> to vector<1x16x16xf32>
      %250 = vector.broadcast %248 : vector<1x16x1xf32> to vector<1x16x16xf32>
      %251 = arith.addf %249, %250 : vector<1x16x16xf32>
      %252 = arith.minimumf %241, %251 : vector<1x16x16xf32>
      %253 = vector.extract_strided_slice %186 {offsets = [0, 6, 0], sizes = [1, 1, 16], strides = [1, 1, 1]} : vector<1x8x16xf32> to vector<1x1x16xf32>
      %c8_i32_54 = arith.constant 8 : i32
      %254 = arith.muli %arg4, %c8_i32_54 : i32
      %c6_i32 = arith.constant 6 : i32
      %255 = arith.addi %254, %c6_i32 : i32
      %256 = arith.sitofp %255 : i32 to f32
      %257 = vector.broadcast %256 : f32 to vector<1x16x1xf32>
      %258 = arith.subf %169, %257 : vector<1x16x1xf32>
      %259 = arith.mulf %258, %258 : vector<1x16x1xf32>
      %260 = vector.broadcast %253 : vector<1x1x16xf32> to vector<1x16x16xf32>
      %261 = vector.broadcast %259 : vector<1x16x1xf32> to vector<1x16x16xf32>
      %262 = arith.addf %260, %261 : vector<1x16x16xf32>
      %263 = arith.minimumf %252, %262 : vector<1x16x16xf32>
      %264 = vector.extract_strided_slice %186 {offsets = [0, 7, 0], sizes = [1, 1, 16], strides = [1, 1, 1]} : vector<1x8x16xf32> to vector<1x1x16xf32>
      %c8_i32_55 = arith.constant 8 : i32
      %265 = arith.muli %arg4, %c8_i32_55 : i32
      %c7_i32 = arith.constant 7 : i32
      %266 = arith.addi %265, %c7_i32 : i32
      %267 = arith.sitofp %266 : i32 to f32
      %268 = vector.broadcast %267 : f32 to vector<1x16x1xf32>
      %269 = arith.subf %169, %268 : vector<1x16x1xf32>
      %270 = arith.mulf %269, %269 : vector<1x16x1xf32>
      %271 = vector.broadcast %264 : vector<1x1x16xf32> to vector<1x16x16xf32>
      %272 = vector.broadcast %270 : vector<1x16x1xf32> to vector<1x16x16xf32>
      %273 = arith.addf %271, %272 : vector<1x16x16xf32>
      %274 = arith.minimumf %263, %273 : vector<1x16x16xf32>
      scf.yield %274 : vector<1x16x16xf32>
    }
    %c2_i32_33 = arith.constant 2 : i32
    %173 = math.sqrt %172 : vector<1x16x16xf32>
    %cst_34 = arith.constant 1.000000e+04 : f32
    %174 = vector.broadcast %cst_34 : f32 to vector<1x16x16xf32>
    %175 = arith.minimumf %173, %174 : vector<1x16x16xf32>
    %cst_35 = arith.constant 1.000000e+00 : f32
    %176 = vector.broadcast %cst_35 : f32 to vector<1x16x16xf32>
    %177 = arith.subf %175, %176 : vector<1x16x16xf32>
    %cst_36 = arith.constant 0.000000e+00 : f32
    %178 = vector.broadcast %cst_36 : f32 to vector<1x16x16xf32>
    %179 = arith.maximumf %177, %178 : vector<1x16x16xf32>
    %cst_37 = arith.constant 0.000000e+00 : f32
    %180 = vector.broadcast %cst_37 : f32 to vector<1x16x16xf32>
    %181 = arith.select %40, %180, %179 : vector<1x16x16xi1>, vector<1x16x16xf32>
    %c0_38 = arith.constant 0 : index
    %c0_39 = arith.constant 0 : index
    %c0_40 = arith.constant 0 : index
    %182 = vector.load %arg2[%c0_38, %c0_39, %c0_40] : memref<1x16x16xf32, #tpu.memory_space<vmem>>, vector<1x16x16xf32>
    tpu.vector_store %arg2[%c0_38, %c0_39, %c0_40], %181 {strides = array<i32>} : memref<1x16x16xf32, #tpu.memory_space<vmem>>, vector<1x16x16xf32>,
    return
  }
  func.func @transform_0(%arg0: i32) -> (i32, i32, i32) {
    %c0_i32 = arith.constant 0 : i32
    %c0_i32_0 = arith.constant 0 : i32
    %c0_i32_1 = arith.constant 0 : i32
    return %arg0, %c0_i32, %c0_i32_0 : i32, i32, i32
  }
  func.func @transform_1(%arg0: i32) -> (i32, i32, i32) {
    %c0_i32 = arith.constant 0 : i32
    %c0_i32_0 = arith.constant 0 : i32
    %c0_i32_1 = arith.constant 0 : i32
    return %arg0, %c0_i32, %c0_i32_0 : i32, i32, i32
  }
}

module attributes {stable_mosaic.version = 11 : i64} {
  func.func @kernel(%arg0: i32, %arg1: i32, %arg2: memref<1x4x8x16xf32, #tpu.memory_space<vmem>>, %arg3: memref<1x4x8x16xf32, #tpu.memory_space<vmem>>, %arg4: memref<1x4x8x16xf32, #tpu.memory_space<vmem>>, %arg5: memref<1x8x16xf32, #tpu.memory_space<vmem>>, %arg6: memref<1x8x16xf32, #tpu.memory_space<vmem>>, %arg7: memref<1x8x16xf32, #tpu.memory_space<vmem>>, %arg8: memref<1x8x16xf32, #tpu.memory_space<vmem>>, %arg9: memref<1x8x16xf32, #tpu.memory_space<vmem>>, %arg10: memref<1x8x16xf32, #tpu.memory_space<vmem>>, %arg11: memref<1x1x8x128xf32, #tpu.memory_space<vmem>>, %arg12: memref<1x1x8x128xf32, #tpu.memory_space<vmem>>) attributes {dimension_semantics = [#tpu.dimension_semantics<parallel>, #tpu.dimension_semantics<parallel>], iteration_bounds = array<i64: 2, 2>, scalar_prefetch = 0 : i64, scratch_operands = 0 : i64, tpu.core_type = #tpu.core_type<tc>, window_params = [{transform_indices = @transform_0, window_bounds = array<i64: 1, 4, 8, 16>}, {transform_indices = @transform_1, window_bounds = array<i64: 1, 4, 8, 16>}, {transform_indices = @transform_2, window_bounds = array<i64: 1, 4, 8, 16>}, {transform_indices = @transform_3, window_bounds = array<i64: 1, 8, 16>}, {transform_indices = @transform_4, window_bounds = array<i64: 1, 8, 16>}, {transform_indices = @transform_5, window_bounds = array<i64: 1, 8, 16>}, {transform_indices = @transform_6, window_bounds = array<i64: 1, 8, 16>}, {transform_indices = @transform_7, window_bounds = array<i64: 1, 8, 16>}, {transform_indices = @transform_8, window_bounds = array<i64: 1, 8, 16>}, {transform_indices = @transform_9, window_bounds = array<i64: 1, 1, 8, 128>}, {transform_indices = @transform_10, window_bounds = array<i64: 1, 1, 8, 128>}]} {
    %c0_i32 = arith.constant 0 : i32
    %0 = arith.cmpi eq, %arg1, %c0_i32 : i32
    %c1_i32 = arith.constant 1 : i32
    %1 = arith.cmpi eq, %arg1, %c1_i32 : i32
    %c0 = arith.constant 0 : index
    %c0_0 = arith.constant 0 : index
    %c0_1 = arith.constant 0 : index
    %c0_2 = arith.constant 0 : index
    %2 = vector.load %arg2[%c0, %c0_0, %c0_1, %c0_2] : memref<1x4x8x16xf32, #tpu.memory_space<vmem>>, vector<1x4x8x16xf32>
    %cst = arith.constant dense<0xFF800000> : vector<1x8x16xf32>
    %3 = vector.multi_reduction <maximumf>, %2, %cst [1] : vector<1x4x8x16xf32> to vector<1x8x16xf32>
    %4 = vector.shape_cast %3 : vector<1x8x16xf32> to vector<1x1x8x16xf32>
    %5 = vector.broadcast %4 : vector<1x1x8x16xf32> to vector<1x4x8x16xf32>
    %6 = arith.subf %2, %5 : vector<1x4x8x16xf32>
    %7 = math.exp %6 : vector<1x4x8x16xf32>
    %cst_3 = arith.constant dense<0.000000e+00> : vector<1x8x16xf32>
    %8 = vector.multi_reduction <add>, %7, %cst_3 [1] : vector<1x4x8x16xf32> to vector<1x8x16xf32>
    %9 = vector.shape_cast %8 : vector<1x8x16xf32> to vector<1x1x8x16xf32>
    %10 = math.log %9 : vector<1x1x8x16xf32>
    %11 = vector.broadcast %10 : vector<1x1x8x16xf32> to vector<1x4x8x16xf32>
    %12 = arith.subf %6, %11 : vector<1x4x8x16xf32>
    %cst_4 = arith.constant 1.000000e+00 : f32
    %13 = vector.broadcast %cst_4 : f32 to vector<1x1x8x16xf32>
    %14 = arith.divf %13, %9 : vector<1x1x8x16xf32>
    %15 = vector.broadcast %14 : vector<1x1x8x16xf32> to vector<1x4x8x16xf32>
    %16 = arith.mulf %7, %15 : vector<1x4x8x16xf32>
    %17 = arith.mulf %16, %12 : vector<1x4x8x16xf32>
    %cst_5 = arith.constant dense<0.000000e+00> : vector<1x8x16xf32>
    %18 = vector.multi_reduction <add>, %17, %cst_5 [1] : vector<1x4x8x16xf32> to vector<1x8x16xf32>
    %19 = vector.extract_strided_slice %16 {offsets = [0, 0, 0, 0], sizes = [1, 4, 1, 16], strides = [1, 1, 1, 1]} : vector<1x4x8x16xf32> to vector<1x4x1x16xf32>
    %20 = vector.extract_strided_slice %18 {offsets = [0, 0, 0], sizes = [1, 1, 16], strides = [1, 1, 1]} : vector<1x8x16xf32> to vector<1x1x16xf32>
    %21 = vector.extract_strided_slice %16 {offsets = [0, 0, 7, 0], sizes = [1, 4, 1, 16], strides = [1, 1, 1, 1]} : vector<1x4x8x16xf32> to vector<1x4x1x16xf32>
    %22 = vector.extract_strided_slice %18 {offsets = [0, 7, 0], sizes = [1, 1, 16], strides = [1, 1, 1]} : vector<1x8x16xf32> to vector<1x1x16xf32>
    %c0_6 = arith.constant 0 : index
    %c0_7 = arith.constant 0 : index
    %c7 = arith.constant 7 : index
    %c0_8 = arith.constant 0 : index
    %23 = vector.load %arg3[%c0_6, %c0_7, %c7, %c0_8] : memref<1x4x8x16xf32, #tpu.memory_space<vmem>>, vector<1x4x1x16xf32>
    %cst_9 = arith.constant dense<0xFF800000> : vector<1x1x16xf32>
    %24 = vector.multi_reduction <maximumf>, %23, %cst_9 [1] : vector<1x4x1x16xf32> to vector<1x1x16xf32>
    %25 = vector.shape_cast %24 : vector<1x1x16xf32> to vector<1x1x1x16xf32>
    %26 = vector.broadcast %25 : vector<1x1x1x16xf32> to vector<1x4x1x16xf32>
    %27 = arith.subf %23, %26 : vector<1x4x1x16xf32>
    %28 = math.exp %27 : vector<1x4x1x16xf32>
    %cst_10 = arith.constant dense<0.000000e+00> : vector<1x1x16xf32>
    %29 = vector.multi_reduction <add>, %28, %cst_10 [1] : vector<1x4x1x16xf32> to vector<1x1x16xf32>
    %30 = vector.shape_cast %29 : vector<1x1x16xf32> to vector<1x1x1x16xf32>
    %cst_11 = arith.constant 1.000000e+00 : f32
    %31 = vector.broadcast %cst_11 : f32 to vector<1x1x1x16xf32>
    %32 = arith.divf %31, %30 : vector<1x1x1x16xf32>
    %33 = vector.broadcast %32 : vector<1x1x1x16xf32> to vector<1x4x1x16xf32>
    %34 = arith.mulf %28, %33 : vector<1x4x1x16xf32>
    %35 = math.log %30 : vector<1x1x1x16xf32>
    %36 = vector.broadcast %35 : vector<1x1x1x16xf32> to vector<1x4x1x16xf32>
    %37 = arith.subf %27, %36 : vector<1x4x1x16xf32>
    %38 = arith.mulf %34, %37 : vector<1x4x1x16xf32>
    %cst_12 = arith.constant dense<0.000000e+00> : vector<1x1x16xf32>
    %39 = vector.multi_reduction <add>, %38, %cst_12 [1] : vector<1x4x1x16xf32> to vector<1x1x16xf32>
    %c0_13 = arith.constant 0 : index
    %c0_14 = arith.constant 0 : index
    %c0_15 = arith.constant 0 : index
    %c0_16 = arith.constant 0 : index
    %40 = vector.load %arg4[%c0_13, %c0_14, %c0_15, %c0_16] : memref<1x4x8x16xf32, #tpu.memory_space<vmem>>, vector<1x4x1x16xf32>
    %cst_17 = arith.constant dense<0xFF800000> : vector<1x1x16xf32>
    %41 = vector.multi_reduction <maximumf>, %40, %cst_17 [1] : vector<1x4x1x16xf32> to vector<1x1x16xf32>
    %42 = vector.shape_cast %41 : vector<1x1x16xf32> to vector<1x1x1x16xf32>
    %43 = vector.broadcast %42 : vector<1x1x1x16xf32> to vector<1x4x1x16xf32>
    %44 = arith.subf %40, %43 : vector<1x4x1x16xf32>
    %45 = math.exp %44 : vector<1x4x1x16xf32>
    %cst_18 = arith.constant dense<0.000000e+00> : vector<1x1x16xf32>
    %46 = vector.multi_reduction <add>, %45, %cst_18 [1] : vector<1x4x1x16xf32> to vector<1x1x16xf32>
    %47 = vector.shape_cast %46 : vector<1x1x16xf32> to vector<1x1x1x16xf32>
    %cst_19 = arith.constant 1.000000e+00 : f32
    %48 = vector.broadcast %cst_19 : f32 to vector<1x1x1x16xf32>
    %49 = arith.divf %48, %47 : vector<1x1x1x16xf32>
    %50 = vector.broadcast %49 : vector<1x1x1x16xf32> to vector<1x4x1x16xf32>
    %51 = arith.mulf %45, %50 : vector<1x4x1x16xf32>
    %52 = math.log %47 : vector<1x1x1x16xf32>
    %53 = vector.broadcast %52 : vector<1x1x1x16xf32> to vector<1x4x1x16xf32>
    %54 = arith.subf %44, %53 : vector<1x4x1x16xf32>
    %55 = arith.mulf %51, %54 : vector<1x4x1x16xf32>
    %cst_20 = arith.constant dense<0.000000e+00> : vector<1x1x16xf32>
    %56 = vector.multi_reduction <add>, %55, %cst_20 [1] : vector<1x4x1x16xf32> to vector<1x1x16xf32>
    %57 = arith.select %0, %19, %34 : vector<1x4x1x16xf32>
    %58 = arith.select %0, %20, %39 : vector<1x1x16xf32>
    %59 = arith.select %1, %21, %51 : vector<1x4x1x16xf32>
    %60 = arith.select %1, %22, %56 : vector<1x1x16xf32>
    %c0_21 = arith.constant 0 : index
    %c7_22 = arith.constant 7 : index
    %c0_23 = arith.constant 0 : index
    %61 = vector.load %arg6[%c0_21, %c7_22, %c0_23] : memref<1x8x16xf32, #tpu.memory_space<vmem>>, vector<1x1x16xf32>
    %cst_24 = arith.constant 1.000000e+05 : f32
    %62 = vector.broadcast %cst_24 : f32 to vector<1x1x16xf32>
    %63 = arith.select %0, %62, %61 : vector<1x1x16xf32>
    %c0_25 = arith.constant 0 : index
    %c0_26 = arith.constant 0 : index
    %c0_27 = arith.constant 0 : index
    %64 = vector.load %arg7[%c0_25, %c0_26, %c0_27] : memref<1x8x16xf32, #tpu.memory_space<vmem>>, vector<1x1x16xf32>
    %cst_28 = arith.constant 1.000000e+05 : f32
    %65 = vector.broadcast %cst_28 : f32 to vector<1x1x16xf32>
    %66 = arith.select %1, %65, %64 : vector<1x1x16xf32>
    %c0_29 = arith.constant 0 : index
    %c7_30 = arith.constant 7 : index
    %c0_31 = arith.constant 0 : index
    %67 = vector.load %arg9[%c0_29, %c7_30, %c0_31] : memref<1x8x16xf32, #tpu.memory_space<vmem>>, vector<1x1x16xf32>
    %cst_32 = arith.constant 0.000000e+00 : f32
    %68 = vector.broadcast %cst_32 : f32 to vector<1x1x16xf32>
    %69 = arith.select %0, %68, %67 : vector<1x1x16xf32>
    %c0_33 = arith.constant 0 : index
    %c0_34 = arith.constant 0 : index
    %c0_35 = arith.constant 0 : index
    %70 = vector.load %arg10[%c0_33, %c0_34, %c0_35] : memref<1x8x16xf32, #tpu.memory_space<vmem>>, vector<1x1x16xf32>
    %cst_36 = arith.constant 0.000000e+00 : f32
    %71 = vector.broadcast %cst_36 : f32 to vector<1x1x16xf32>
    %72 = arith.select %1, %71, %70 : vector<1x1x16xf32>
    %c0_37 = arith.constant 0 : index
    %c0_38 = arith.constant 0 : index
    %c0_39 = arith.constant 0 : index
    %73 = vector.load %arg8[%c0_37, %c0_38, %c0_39] : memref<1x8x16xf32, #tpu.memory_space<vmem>>, vector<1x8x16xf32>
    %74 = vector.extract_strided_slice %73 {offsets = [0, 7, 0], sizes = [1, 1, 16], strides = [1, 1, 1]} : vector<1x8x16xf32> to vector<1x1x16xf32>
    %75 = vector.extract_strided_slice %73 {offsets = [0, 0, 0], sizes = [1, 7, 16], strides = [1, 1, 1]} : vector<1x8x16xf32> to vector<1x7x16xf32>
    %76 = tpu.concatenate %74, %75 in 1 : vector<1x1x16xf32>, vector<1x7x16xf32> -> vector<1x8x16xf32>
    %77 = tpu.iota {dimensions = array<i32: 1>} : vector<1x8x1xi32>
    %c1_i32_40 = arith.constant 1 : i32
    %78 = vector.broadcast %c1_i32_40 : i32 to vector<1x8x1xi32>
    %79 = arith.cmpi sge, %77, %78 : vector<1x8x1xi32>
    %80 = vector.shape_cast %79 : vector<1x8x1xi1> to vector<1x8x1xi1>
    %81 = vector.broadcast %80 : vector<1x8x1xi1> to vector<1x8x16xi1>
    %82 = vector.shape_cast %69 : vector<1x1x16xf32> to vector<1x1x16xf32>
    %83 = vector.broadcast %82 : vector<1x1x16xf32> to vector<1x8x16xf32>
    %84 = arith.select %81, %76, %83 : vector<1x8x16xi1>, vector<1x8x16xf32>
    %85 = vector.extract_strided_slice %73 {offsets = [0, 1, 0], sizes = [1, 7, 16], strides = [1, 1, 1]} : vector<1x8x16xf32> to vector<1x7x16xf32>
    %86 = vector.extract_strided_slice %73 {offsets = [0, 0, 0], sizes = [1, 1, 16], strides = [1, 1, 1]} : vector<1x8x16xf32> to vector<1x1x16xf32>
    %87 = tpu.concatenate %85, %86 in 1 : vector<1x7x16xf32>, vector<1x1x16xf32> -> vector<1x8x16xf32>
    %88 = tpu.iota {dimensions = array<i32: 1>} : vector<1x8x1xi32>
    %c7_i32 = arith.constant 7 : i32
    %89 = vector.broadcast %c7_i32 : i32 to vector<1x8x1xi32>
    %90 = arith.cmpi slt, %88, %89 : vector<1x8x1xi32>
    %91 = vector.shape_cast %90 : vector<1x8x1xi1> to vector<1x8x1xi1>
    %92 = vector.broadcast %91 : vector<1x8x1xi1> to vector<1x8x16xi1>
    %93 = vector.shape_cast %72 : vector<1x1x16xf32> to vector<1x1x16xf32>
    %94 = vector.broadcast %93 : vector<1x1x16xf32> to vector<1x8x16xf32>
    %95 = arith.select %92, %87, %94 : vector<1x8x16xi1>, vector<1x8x16xf32>
    %96 = arith.maximumf %84, %95 : vector<1x8x16xf32>
    %97 = arith.maximumf %73, %96 : vector<1x8x16xf32>
    %98 = vector.extract_strided_slice %97 {offsets = [0, 0, 15], sizes = [1, 8, 1], strides = [1, 1, 1]} : vector<1x8x16xf32> to vector<1x8x1xf32>
    %99 = vector.extract_strided_slice %97 {offsets = [0, 0, 0], sizes = [1, 8, 15], strides = [1, 1, 1]} : vector<1x8x16xf32> to vector<1x8x15xf32>
    %100 = tpu.concatenate %98, %99 in 2 : vector<1x8x1xf32>, vector<1x8x15xf32> -> vector<1x8x16xf32>
    %101 = tpu.iota {dimensions = array<i32: 2>} : vector<1x1x16xi32>
    %c1_i32_41 = arith.constant 1 : i32
    %102 = vector.broadcast %c1_i32_41 : i32 to vector<1x1x16xi32>
    %103 = arith.cmpi sge, %101, %102 : vector<1x1x16xi32>
    %cst_42 = arith.constant 0.000000e+00 : f32
    %104 = vector.broadcast %cst_42 : f32 to vector<1x8x1xf32>
    %105 = vector.shape_cast %103 : vector<1x1x16xi1> to vector<1x1x16xi1>
    %106 = vector.broadcast %105 : vector<1x1x16xi1> to vector<1x8x16xi1>
    %107 = vector.shape_cast %104 : vector<1x8x1xf32> to vector<1x8x1xf32>
    %108 = vector.broadcast %107 : vector<1x8x1xf32> to vector<1x8x16xf32>
    %109 = arith.select %106, %100, %108 : vector<1x8x16xi1>, vector<1x8x16xf32>
    %110 = vector.extract_strided_slice %97 {offsets = [0, 0, 1], sizes = [1, 8, 15], strides = [1, 1, 1]} : vector<1x8x16xf32> to vector<1x8x15xf32>
    %111 = vector.extract_strided_slice %97 {offsets = [0, 0, 0], sizes = [1, 8, 1], strides = [1, 1, 1]} : vector<1x8x16xf32> to vector<1x8x1xf32>
    %112 = tpu.concatenate %110, %111 in 2 : vector<1x8x15xf32>, vector<1x8x1xf32> -> vector<1x8x16xf32>
    %113 = tpu.iota {dimensions = array<i32: 2>} : vector<1x1x16xi32>
    %c15_i32 = arith.constant 15 : i32
    %114 = vector.broadcast %c15_i32 : i32 to vector<1x1x16xi32>
    %115 = arith.cmpi slt, %113, %114 : vector<1x1x16xi32>
    %cst_43 = arith.constant 0.000000e+00 : f32
    %116 = vector.broadcast %cst_43 : f32 to vector<1x8x1xf32>
    %117 = vector.shape_cast %115 : vector<1x1x16xi1> to vector<1x1x16xi1>
    %118 = vector.broadcast %117 : vector<1x1x16xi1> to vector<1x8x16xi1>
    %119 = vector.shape_cast %116 : vector<1x8x1xf32> to vector<1x8x1xf32>
    %120 = vector.broadcast %119 : vector<1x8x1xf32> to vector<1x8x16xf32>
    %121 = arith.select %118, %112, %120 : vector<1x8x16xi1>, vector<1x8x16xf32>
    %122 = arith.maximumf %109, %121 : vector<1x8x16xf32>
    %123 = arith.maximumf %97, %122 : vector<1x8x16xf32>
    %cst_44 = arith.constant 0.000000e+00 : f32
    %124 = vector.broadcast %cst_44 : f32 to vector<1x8x16xf32>
    %125 = arith.cmpf ogt, %123, %124 : vector<1x8x16xf32>
    %c0_45 = arith.constant 0 : index
    %c0_46 = arith.constant 0 : index
    %c0_47 = arith.constant 0 : index
    %126 = vector.load %arg5[%c0_45, %c0_46, %c0_47] : memref<1x8x16xf32, #tpu.memory_space<vmem>>, vector<1x8x16xf32>
    %127 = vector.extract_strided_slice %126 {offsets = [0, 7, 0], sizes = [1, 1, 16], strides = [1, 1, 1]} : vector<1x8x16xf32> to vector<1x1x16xf32>
    %128 = vector.extract_strided_slice %126 {offsets = [0, 0, 0], sizes = [1, 7, 16], strides = [1, 1, 1]} : vector<1x8x16xf32> to vector<1x7x16xf32>
    %129 = tpu.concatenate %127, %128 in 1 : vector<1x1x16xf32>, vector<1x7x16xf32> -> vector<1x8x16xf32>
    %130 = tpu.iota {dimensions = array<i32: 1>} : vector<1x8x1xi32>
    %c1_i32_48 = arith.constant 1 : i32
    %131 = vector.broadcast %c1_i32_48 : i32 to vector<1x8x1xi32>
    %132 = arith.cmpi sge, %130, %131 : vector<1x8x1xi32>
    %133 = vector.shape_cast %132 : vector<1x8x1xi1> to vector<1x8x1xi1>
    %134 = vector.broadcast %133 : vector<1x8x1xi1> to vector<1x8x16xi1>
    %135 = vector.shape_cast %63 : vector<1x1x16xf32> to vector<1x1x16xf32>
    %136 = vector.broadcast %135 : vector<1x1x16xf32> to vector<1x8x16xf32>
    %137 = arith.select %134, %129, %136 : vector<1x8x16xi1>, vector<1x8x16xf32>
    %138 = vector.extract_strided_slice %126 {offsets = [0, 1, 0], sizes = [1, 7, 16], strides = [1, 1, 1]} : vector<1x8x16xf32> to vector<1x7x16xf32>
    %139 = vector.extract_strided_slice %126 {offsets = [0, 0, 0], sizes = [1, 1, 16], strides = [1, 1, 1]} : vector<1x8x16xf32> to vector<1x1x16xf32>
    %140 = tpu.concatenate %138, %139 in 1 : vector<1x7x16xf32>, vector<1x1x16xf32> -> vector<1x8x16xf32>
    %141 = tpu.iota {dimensions = array<i32: 1>} : vector<1x8x1xi32>
    %c7_i32_49 = arith.constant 7 : i32
    %142 = vector.broadcast %c7_i32_49 : i32 to vector<1x8x1xi32>
    %143 = arith.cmpi slt, %141, %142 : vector<1x8x1xi32>
    %144 = vector.shape_cast %143 : vector<1x8x1xi1> to vector<1x8x1xi1>
    %145 = vector.broadcast %144 : vector<1x8x1xi1> to vector<1x8x16xi1>
    %146 = vector.shape_cast %66 : vector<1x1x16xf32> to vector<1x1x16xf32>
    %147 = vector.broadcast %146 : vector<1x1x16xf32> to vector<1x8x16xf32>
    %148 = arith.select %145, %140, %147 : vector<1x8x16xi1>, vector<1x8x16xf32>
    %149 = vector.extract_strided_slice %16 {offsets = [0, 0, 7, 0], sizes = [1, 4, 1, 16], strides = [1, 1, 1, 1]} : vector<1x4x8x16xf32> to vector<1x4x1x16xf32>
    %150 = vector.extract_strided_slice %16 {offsets = [0, 0, 0, 0], sizes = [1, 4, 7, 16], strides = [1, 1, 1, 1]} : vector<1x4x8x16xf32> to vector<1x4x7x16xf32>
    %151 = tpu.concatenate %149, %150 in 2 : vector<1x4x1x16xf32>, vector<1x4x7x16xf32> -> vector<1x4x8x16xf32>
    %152 = tpu.iota {dimensions = array<i32: 2>} : vector<1x1x8x1xi32>
    %c1_i32_50 = arith.constant 1 : i32
    %153 = vector.broadcast %c1_i32_50 : i32 to vector<1x1x8x1xi32>
    %154 = arith.cmpi sge, %152, %153 : vector<1x1x8x1xi32>
    %155 = vector.shape_cast %154 : vector<1x1x8x1xi1> to vector<1x1x8x1xi1>
    %156 = vector.broadcast %155 : vector<1x1x8x1xi1> to vector<1x4x8x16xi1>
    %157 = vector.shape_cast %57 : vector<1x4x1x16xf32> to vector<1x4x1x16xf32>
    %158 = vector.broadcast %157 : vector<1x4x1x16xf32> to vector<1x4x8x16xf32>
    %159 = arith.select %156, %151, %158 : vector<1x4x8x16xi1>, vector<1x4x8x16xf32>
    %160 = vector.extract_strided_slice %16 {offsets = [0, 0, 1, 0], sizes = [1, 4, 7, 16], strides = [1, 1, 1, 1]} : vector<1x4x8x16xf32> to vector<1x4x7x16xf32>
    %161 = vector.extract_strided_slice %16 {offsets = [0, 0, 0, 0], sizes = [1, 4, 1, 16], strides = [1, 1, 1, 1]} : vector<1x4x8x16xf32> to vector<1x4x1x16xf32>
    %162 = tpu.concatenate %160, %161 in 2 : vector<1x4x7x16xf32>, vector<1x4x1x16xf32> -> vector<1x4x8x16xf32>
    %163 = tpu.iota {dimensions = array<i32: 2>} : vector<1x1x8x1xi32>
    %c7_i32_51 = arith.constant 7 : i32
    %164 = vector.broadcast %c7_i32_51 : i32 to vector<1x1x8x1xi32>
    %165 = arith.cmpi slt, %163, %164 : vector<1x1x8x1xi32>
    %166 = vector.shape_cast %165 : vector<1x1x8x1xi1> to vector<1x1x8x1xi1>
    %167 = vector.broadcast %166 : vector<1x1x8x1xi1> to vector<1x4x8x16xi1>
    %168 = vector.shape_cast %59 : vector<1x4x1x16xf32> to vector<1x4x1x16xf32>
    %169 = vector.broadcast %168 : vector<1x4x1x16xf32> to vector<1x4x8x16xf32>
    %170 = arith.select %167, %162, %169 : vector<1x4x8x16xi1>, vector<1x4x8x16xf32>
    %171 = vector.extract_strided_slice %18 {offsets = [0, 7, 0], sizes = [1, 1, 16], strides = [1, 1, 1]} : vector<1x8x16xf32> to vector<1x1x16xf32>
    %172 = vector.extract_strided_slice %18 {offsets = [0, 0, 0], sizes = [1, 7, 16], strides = [1, 1, 1]} : vector<1x8x16xf32> to vector<1x7x16xf32>
    %173 = tpu.concatenate %171, %172 in 1 : vector<1x1x16xf32>, vector<1x7x16xf32> -> vector<1x8x16xf32>
    %174 = tpu.iota {dimensions = array<i32: 1>} : vector<1x8x1xi32>
    %c1_i32_52 = arith.constant 1 : i32
    %175 = vector.broadcast %c1_i32_52 : i32 to vector<1x8x1xi32>
    %176 = arith.cmpi sge, %174, %175 : vector<1x8x1xi32>
    %177 = vector.shape_cast %176 : vector<1x8x1xi1> to vector<1x8x1xi1>
    %178 = vector.broadcast %177 : vector<1x8x1xi1> to vector<1x8x16xi1>
    %179 = vector.shape_cast %58 : vector<1x1x16xf32> to vector<1x1x16xf32>
    %180 = vector.broadcast %179 : vector<1x1x16xf32> to vector<1x8x16xf32>
    %181 = arith.select %178, %173, %180 : vector<1x8x16xi1>, vector<1x8x16xf32>
    %182 = vector.extract_strided_slice %18 {offsets = [0, 1, 0], sizes = [1, 7, 16], strides = [1, 1, 1]} : vector<1x8x16xf32> to vector<1x7x16xf32>
    %183 = vector.extract_strided_slice %18 {offsets = [0, 0, 0], sizes = [1, 1, 16], strides = [1, 1, 1]} : vector<1x8x16xf32> to vector<1x1x16xf32>
    %184 = tpu.concatenate %182, %183 in 1 : vector<1x7x16xf32>, vector<1x1x16xf32> -> vector<1x8x16xf32>
    %185 = tpu.iota {dimensions = array<i32: 1>} : vector<1x8x1xi32>
    %c7_i32_53 = arith.constant 7 : i32
    %186 = vector.broadcast %c7_i32_53 : i32 to vector<1x8x1xi32>
    %187 = arith.cmpi slt, %185, %186 : vector<1x8x1xi32>
    %188 = vector.shape_cast %187 : vector<1x8x1xi1> to vector<1x8x1xi1>
    %189 = vector.broadcast %188 : vector<1x8x1xi1> to vector<1x8x16xi1>
    %190 = vector.shape_cast %60 : vector<1x1x16xf32> to vector<1x1x16xf32>
    %191 = vector.broadcast %190 : vector<1x1x16xf32> to vector<1x8x16xf32>
    %192 = arith.select %189, %184, %191 : vector<1x8x16xi1>, vector<1x8x16xf32>
    %cst_54 = arith.constant 0x7F800000 : f32
    %193 = vector.broadcast %cst_54 : f32 to vector<1x8x16xf32>
    %c0_i32_55 = arith.constant 0 : i32
    %194 = vector.broadcast %c0_i32_55 : i32 to vector<1x8x16xi32>
    %cst_56 = arith.constant -1.000000e+30 : f32
    %195 = vector.broadcast %cst_56 : f32 to vector<1x8x16xf32>
    %cst_57 = arith.constant 0.000000e+00 : f32
    %196 = vector.broadcast %cst_57 : f32 to vector<1x8x16xf32>
    %cst_58 = arith.constant 0.000000e+00 : f32
    %197 = vector.broadcast %cst_58 : f32 to vector<1x8x16xf32>
    %cst_59 = arith.constant 0.000000e+00 : f32
    %198 = vector.broadcast %cst_59 : f32 to vector<1x8x16xf32>
    %199 = arith.cmpf olt, %148, %193 : vector<1x8x16xf32>
    %200 = arith.mulf %170, %12 : vector<1x4x8x16xf32>
    %cst_60 = arith.constant dense<0.000000e+00> : vector<1x8x16xf32>
    %201 = vector.multi_reduction <add>, %200, %cst_60 [1] : vector<1x4x8x16xf32> to vector<1x8x16xf32>
    %202 = arith.subf %192, %201 : vector<1x8x16xf32>
    %203 = arith.maximumf %195, %202 : vector<1x8x16xf32>
    %204 = arith.subf %195, %203 : vector<1x8x16xf32>
    %205 = math.exp %204 : vector<1x8x16xf32>
    %206 = arith.mulf %196, %205 : vector<1x8x16xf32>
    %207 = arith.subf %202, %203 : vector<1x8x16xf32>
    %208 = math.exp %207 : vector<1x8x16xf32>
    %209 = arith.addf %206, %208 : vector<1x8x16xf32>
    %210 = arith.addf %197, %202 : vector<1x8x16xf32>
    %211 = arith.select %199, %202, %198 : vector<1x8x16xi1>, vector<1x8x16xf32>
    %c0_i32_61 = arith.constant 0 : i32
    %212 = vector.broadcast %c0_i32_61 : i32 to vector<1x8x16xi32>
    %213 = arith.select %199, %212, %194 : vector<1x8x16xi1>, vector<1x8x16xi32>
    %214 = arith.select %199, %148, %193 : vector<1x8x16xi1>, vector<1x8x16xf32>
    %215 = arith.cmpf olt, %137, %214 : vector<1x8x16xf32>
    %216 = arith.mulf %159, %12 : vector<1x4x8x16xf32>
    %cst_62 = arith.constant dense<0.000000e+00> : vector<1x8x16xf32>
    %217 = vector.multi_reduction <add>, %216, %cst_62 [1] : vector<1x4x8x16xf32> to vector<1x8x16xf32>
    %218 = arith.subf %181, %217 : vector<1x8x16xf32>
    %219 = arith.maximumf %203, %218 : vector<1x8x16xf32>
    %220 = arith.subf %203, %219 : vector<1x8x16xf32>
    %221 = math.exp %220 : vector<1x8x16xf32>
    %222 = arith.mulf %209, %221 : vector<1x8x16xf32>
    %223 = arith.subf %218, %219 : vector<1x8x16xf32>
    %224 = math.exp %223 : vector<1x8x16xf32>
    %225 = arith.addf %222, %224 : vector<1x8x16xf32>
    %226 = arith.addf %210, %218 : vector<1x8x16xf32>
    %227 = arith.select %215, %218, %211 : vector<1x8x16xi1>, vector<1x8x16xf32>
    %c1_i32_63 = arith.constant 1 : i32
    %228 = vector.broadcast %c1_i32_63 : i32 to vector<1x8x16xi32>
    %229 = arith.select %215, %228, %213 : vector<1x8x16xi1>, vector<1x8x16xi32>
    %230 = arith.select %215, %137, %214 : vector<1x8x16xi1>, vector<1x8x16xf32>
    %231 = vector.extract_strided_slice %126 {offsets = [0, 0, 15], sizes = [1, 8, 1], strides = [1, 1, 1]} : vector<1x8x16xf32> to vector<1x8x1xf32>
    %232 = vector.extract_strided_slice %126 {offsets = [0, 0, 0], sizes = [1, 8, 15], strides = [1, 1, 1]} : vector<1x8x16xf32> to vector<1x8x15xf32>
    %233 = tpu.concatenate %231, %232 in 2 : vector<1x8x1xf32>, vector<1x8x15xf32> -> vector<1x8x16xf32>
    %234 = tpu.iota {dimensions = array<i32: 2>} : vector<1x1x16xi32>
    %c1_i32_64 = arith.constant 1 : i32
    %235 = vector.broadcast %c1_i32_64 : i32 to vector<1x1x16xi32>
    %236 = arith.cmpi sge, %234, %235 : vector<1x1x16xi32>
    %cst_65 = arith.constant 1.000000e+05 : f32
    %237 = vector.broadcast %cst_65 : f32 to vector<1x8x1xf32>
    %238 = vector.shape_cast %236 : vector<1x1x16xi1> to vector<1x1x16xi1>
    %239 = vector.broadcast %238 : vector<1x1x16xi1> to vector<1x8x16xi1>
    %240 = vector.shape_cast %237 : vector<1x8x1xf32> to vector<1x8x1xf32>
    %241 = vector.broadcast %240 : vector<1x8x1xf32> to vector<1x8x16xf32>
    %242 = arith.select %239, %233, %241 : vector<1x8x16xi1>, vector<1x8x16xf32>
    %243 = arith.cmpf olt, %242, %230 : vector<1x8x16xf32>
    %244 = vector.extract_strided_slice %16 {offsets = [0, 0, 0, 15], sizes = [1, 4, 8, 1], strides = [1, 1, 1, 1]} : vector<1x4x8x16xf32> to vector<1x4x8x1xf32>
    %245 = vector.extract_strided_slice %16 {offsets = [0, 0, 0, 0], sizes = [1, 4, 8, 15], strides = [1, 1, 1, 1]} : vector<1x4x8x16xf32> to vector<1x4x8x15xf32>
    %246 = tpu.concatenate %244, %245 in 3 : vector<1x4x8x1xf32>, vector<1x4x8x15xf32> -> vector<1x4x8x16xf32>
    %247 = tpu.iota {dimensions = array<i32: 3>} : vector<1x1x1x16xi32>
    %c1_i32_66 = arith.constant 1 : i32
    %248 = vector.broadcast %c1_i32_66 : i32 to vector<1x1x1x16xi32>
    %249 = arith.cmpi sge, %247, %248 : vector<1x1x1x16xi32>
    %250 = vector.extract_strided_slice %16 {offsets = [0, 0, 0, 0], sizes = [1, 4, 8, 1], strides = [1, 1, 1, 1]} : vector<1x4x8x16xf32> to vector<1x4x8x1xf32>
    %251 = vector.shape_cast %249 : vector<1x1x1x16xi1> to vector<1x1x1x16xi1>
    %252 = vector.broadcast %251 : vector<1x1x1x16xi1> to vector<1x4x8x16xi1>
    %253 = vector.shape_cast %250 : vector<1x4x8x1xf32> to vector<1x4x8x1xf32>
    %254 = vector.broadcast %253 : vector<1x4x8x1xf32> to vector<1x4x8x16xf32>
    %255 = arith.select %252, %246, %254 : vector<1x4x8x16xi1>, vector<1x4x8x16xf32>
    %256 = vector.extract_strided_slice %18 {offsets = [0, 0, 15], sizes = [1, 8, 1], strides = [1, 1, 1]} : vector<1x8x16xf32> to vector<1x8x1xf32>
    %257 = vector.extract_strided_slice %18 {offsets = [0, 0, 0], sizes = [1, 8, 15], strides = [1, 1, 1]} : vector<1x8x16xf32> to vector<1x8x15xf32>
    %258 = tpu.concatenate %256, %257 in 2 : vector<1x8x1xf32>, vector<1x8x15xf32> -> vector<1x8x16xf32>
    %259 = tpu.iota {dimensions = array<i32: 2>} : vector<1x1x16xi32>
    %c1_i32_67 = arith.constant 1 : i32
    %260 = vector.broadcast %c1_i32_67 : i32 to vector<1x1x16xi32>
    %261 = arith.cmpi sge, %259, %260 : vector<1x1x16xi32>
    %262 = vector.extract_strided_slice %18 {offsets = [0, 0, 0], sizes = [1, 8, 1], strides = [1, 1, 1]} : vector<1x8x16xf32> to vector<1x8x1xf32>
    %263 = vector.shape_cast %261 : vector<1x1x16xi1> to vector<1x1x16xi1>
    %264 = vector.broadcast %263 : vector<1x1x16xi1> to vector<1x8x16xi1>
    %265 = vector.shape_cast %262 : vector<1x8x1xf32> to vector<1x8x1xf32>
    %266 = vector.broadcast %265 : vector<1x8x1xf32> to vector<1x8x16xf32>
    %267 = arith.select %264, %258, %266 : vector<1x8x16xi1>, vector<1x8x16xf32>
    %268 = arith.mulf %255, %12 : vector<1x4x8x16xf32>
    %cst_68 = arith.constant dense<0.000000e+00> : vector<1x8x16xf32>
    %269 = vector.multi_reduction <add>, %268, %cst_68 [1] : vector<1x4x8x16xf32> to vector<1x8x16xf32>
    %270 = arith.subf %267, %269 : vector<1x8x16xf32>
    %271 = arith.maximumf %219, %270 : vector<1x8x16xf32>
    %272 = arith.subf %219, %271 : vector<1x8x16xf32>
    %273 = math.exp %272 : vector<1x8x16xf32>
    %274 = arith.mulf %225, %273 : vector<1x8x16xf32>
    %275 = arith.subf %270, %271 : vector<1x8x16xf32>
    %276 = math.exp %275 : vector<1x8x16xf32>
    %277 = arith.addf %274, %276 : vector<1x8x16xf32>
    %278 = arith.addf %226, %270 : vector<1x8x16xf32>
    %279 = arith.select %243, %270, %227 : vector<1x8x16xi1>, vector<1x8x16xf32>
    %c2_i32 = arith.constant 2 : i32
    %280 = vector.broadcast %c2_i32 : i32 to vector<1x8x16xi32>
    %281 = arith.select %243, %280, %229 : vector<1x8x16xi1>, vector<1x8x16xi32>
    %282 = arith.select %243, %242, %230 : vector<1x8x16xi1>, vector<1x8x16xf32>
    %283 = vector.extract_strided_slice %126 {offsets = [0, 0, 1], sizes = [1, 8, 15], strides = [1, 1, 1]} : vector<1x8x16xf32> to vector<1x8x15xf32>
    %284 = vector.extract_strided_slice %126 {offsets = [0, 0, 0], sizes = [1, 8, 1], strides = [1, 1, 1]} : vector<1x8x16xf32> to vector<1x8x1xf32>
    %285 = tpu.concatenate %283, %284 in 2 : vector<1x8x15xf32>, vector<1x8x1xf32> -> vector<1x8x16xf32>
    %286 = tpu.iota {dimensions = array<i32: 2>} : vector<1x1x16xi32>
    %c15_i32_69 = arith.constant 15 : i32
    %287 = vector.broadcast %c15_i32_69 : i32 to vector<1x1x16xi32>
    %288 = arith.cmpi slt, %286, %287 : vector<1x1x16xi32>
    %cst_70 = arith.constant 1.000000e+05 : f32
    %289 = vector.broadcast %cst_70 : f32 to vector<1x8x1xf32>
    %290 = vector.shape_cast %288 : vector<1x1x16xi1> to vector<1x1x16xi1>
    %291 = vector.broadcast %290 : vector<1x1x16xi1> to vector<1x8x16xi1>
    %292 = vector.shape_cast %289 : vector<1x8x1xf32> to vector<1x8x1xf32>
    %293 = vector.broadcast %292 : vector<1x8x1xf32> to vector<1x8x16xf32>
    %294 = arith.select %291, %285, %293 : vector<1x8x16xi1>, vector<1x8x16xf32>
    %295 = arith.cmpf olt, %294, %282 : vector<1x8x16xf32>
    %296 = vector.extract_strided_slice %16 {offsets = [0, 0, 0, 1], sizes = [1, 4, 8, 15], strides = [1, 1, 1, 1]} : vector<1x4x8x16xf32> to vector<1x4x8x15xf32>
    %297 = vector.extract_strided_slice %16 {offsets = [0, 0, 0, 0], sizes = [1, 4, 8, 1], strides = [1, 1, 1, 1]} : vector<1x4x8x16xf32> to vector<1x4x8x1xf32>
    %298 = tpu.concatenate %296, %297 in 3 : vector<1x4x8x15xf32>, vector<1x4x8x1xf32> -> vector<1x4x8x16xf32>
    %299 = tpu.iota {dimensions = array<i32: 3>} : vector<1x1x1x16xi32>
    %c15_i32_71 = arith.constant 15 : i32
    %300 = vector.broadcast %c15_i32_71 : i32 to vector<1x1x1x16xi32>
    %301 = arith.cmpi slt, %299, %300 : vector<1x1x1x16xi32>
    %302 = vector.extract_strided_slice %16 {offsets = [0, 0, 0, 15], sizes = [1, 4, 8, 1], strides = [1, 1, 1, 1]} : vector<1x4x8x16xf32> to vector<1x4x8x1xf32>
    %303 = vector.shape_cast %301 : vector<1x1x1x16xi1> to vector<1x1x1x16xi1>
    %304 = vector.broadcast %303 : vector<1x1x1x16xi1> to vector<1x4x8x16xi1>
    %305 = vector.shape_cast %302 : vector<1x4x8x1xf32> to vector<1x4x8x1xf32>
    %306 = vector.broadcast %305 : vector<1x4x8x1xf32> to vector<1x4x8x16xf32>
    %307 = arith.select %304, %298, %306 : vector<1x4x8x16xi1>, vector<1x4x8x16xf32>
    %308 = vector.extract_strided_slice %18 {offsets = [0, 0, 1], sizes = [1, 8, 15], strides = [1, 1, 1]} : vector<1x8x16xf32> to vector<1x8x15xf32>
    %309 = vector.extract_strided_slice %18 {offsets = [0, 0, 0], sizes = [1, 8, 1], strides = [1, 1, 1]} : vector<1x8x16xf32> to vector<1x8x1xf32>
    %310 = tpu.concatenate %308, %309 in 2 : vector<1x8x15xf32>, vector<1x8x1xf32> -> vector<1x8x16xf32>
    %311 = tpu.iota {dimensions = array<i32: 2>} : vector<1x1x16xi32>
    %c15_i32_72 = arith.constant 15 : i32
    %312 = vector.broadcast %c15_i32_72 : i32 to vector<1x1x16xi32>
    %313 = arith.cmpi slt, %311, %312 : vector<1x1x16xi32>
    %314 = vector.extract_strided_slice %18 {offsets = [0, 0, 15], sizes = [1, 8, 1], strides = [1, 1, 1]} : vector<1x8x16xf32> to vector<1x8x1xf32>
    %315 = vector.shape_cast %313 : vector<1x1x16xi1> to vector<1x1x16xi1>
    %316 = vector.broadcast %315 : vector<1x1x16xi1> to vector<1x8x16xi1>
    %317 = vector.shape_cast %314 : vector<1x8x1xf32> to vector<1x8x1xf32>
    %318 = vector.broadcast %317 : vector<1x8x1xf32> to vector<1x8x16xf32>
    %319 = arith.select %316, %310, %318 : vector<1x8x16xi1>, vector<1x8x16xf32>
    %320 = arith.mulf %307, %12 : vector<1x4x8x16xf32>
    %cst_73 = arith.constant dense<0.000000e+00> : vector<1x8x16xf32>
    %321 = vector.multi_reduction <add>, %320, %cst_73 [1] : vector<1x4x8x16xf32> to vector<1x8x16xf32>
    %322 = arith.subf %319, %321 : vector<1x8x16xf32>
    %323 = arith.maximumf %271, %322 : vector<1x8x16xf32>
    %324 = arith.subf %271, %323 : vector<1x8x16xf32>
    %325 = math.exp %324 : vector<1x8x16xf32>
    %326 = arith.mulf %277, %325 : vector<1x8x16xf32>
    %327 = arith.subf %322, %323 : vector<1x8x16xf32>
    %328 = math.exp %327 : vector<1x8x16xf32>
    %329 = arith.addf %326, %328 : vector<1x8x16xf32>
    %330 = arith.addf %278, %322 : vector<1x8x16xf32>
    %331 = arith.select %295, %322, %279 : vector<1x8x16xi1>, vector<1x8x16xf32>
    %c3_i32 = arith.constant 3 : i32
    %332 = vector.broadcast %c3_i32 : i32 to vector<1x8x16xi32>
    %333 = arith.select %295, %332, %281 : vector<1x8x16xi1>, vector<1x8x16xi32>
    %334 = arith.select %295, %294, %282 : vector<1x8x16xi1>, vector<1x8x16xf32>
    %335 = vector.extract_strided_slice %137 {offsets = [0, 0, 1], sizes = [1, 8, 15], strides = [1, 1, 1]} : vector<1x8x16xf32> to vector<1x8x15xf32>
    %336 = vector.extract_strided_slice %137 {offsets = [0, 0, 0], sizes = [1, 8, 1], strides = [1, 1, 1]} : vector<1x8x16xf32> to vector<1x8x1xf32>
    %337 = tpu.concatenate %335, %336 in 2 : vector<1x8x15xf32>, vector<1x8x1xf32> -> vector<1x8x16xf32>
    %338 = tpu.iota {dimensions = array<i32: 2>} : vector<1x1x16xi32>
    %c15_i32_74 = arith.constant 15 : i32
    %339 = vector.broadcast %c15_i32_74 : i32 to vector<1x1x16xi32>
    %340 = arith.cmpi slt, %338, %339 : vector<1x1x16xi32>
    %cst_75 = arith.constant 1.000000e+05 : f32
    %341 = vector.broadcast %cst_75 : f32 to vector<1x8x1xf32>
    %342 = vector.shape_cast %340 : vector<1x1x16xi1> to vector<1x1x16xi1>
    %343 = vector.broadcast %342 : vector<1x1x16xi1> to vector<1x8x16xi1>
    %344 = vector.shape_cast %341 : vector<1x8x1xf32> to vector<1x8x1xf32>
    %345 = vector.broadcast %344 : vector<1x8x1xf32> to vector<1x8x16xf32>
    %346 = arith.select %343, %337, %345 : vector<1x8x16xi1>, vector<1x8x16xf32>
    %347 = arith.cmpf olt, %346, %334 : vector<1x8x16xf32>
    %348 = vector.extract_strided_slice %159 {offsets = [0, 0, 0, 1], sizes = [1, 4, 8, 15], strides = [1, 1, 1, 1]} : vector<1x4x8x16xf32> to vector<1x4x8x15xf32>
    %349 = vector.extract_strided_slice %159 {offsets = [0, 0, 0, 0], sizes = [1, 4, 8, 1], strides = [1, 1, 1, 1]} : vector<1x4x8x16xf32> to vector<1x4x8x1xf32>
    %350 = tpu.concatenate %348, %349 in 3 : vector<1x4x8x15xf32>, vector<1x4x8x1xf32> -> vector<1x4x8x16xf32>
    %351 = tpu.iota {dimensions = array<i32: 3>} : vector<1x1x1x16xi32>
    %c15_i32_76 = arith.constant 15 : i32
    %352 = vector.broadcast %c15_i32_76 : i32 to vector<1x1x1x16xi32>
    %353 = arith.cmpi slt, %351, %352 : vector<1x1x1x16xi32>
    %354 = vector.extract_strided_slice %159 {offsets = [0, 0, 0, 15], sizes = [1, 4, 8, 1], strides = [1, 1, 1, 1]} : vector<1x4x8x16xf32> to vector<1x4x8x1xf32>
    %355 = vector.shape_cast %353 : vector<1x1x1x16xi1> to vector<1x1x1x16xi1>
    %356 = vector.broadcast %355 : vector<1x1x1x16xi1> to vector<1x4x8x16xi1>
    %357 = vector.shape_cast %354 : vector<1x4x8x1xf32> to vector<1x4x8x1xf32>
    %358 = vector.broadcast %357 : vector<1x4x8x1xf32> to vector<1x4x8x16xf32>
    %359 = arith.select %356, %350, %358 : vector<1x4x8x16xi1>, vector<1x4x8x16xf32>
    %360 = vector.extract_strided_slice %181 {offsets = [0, 0, 1], sizes = [1, 8, 15], strides = [1, 1, 1]} : vector<1x8x16xf32> to vector<1x8x15xf32>
    %361 = vector.extract_strided_slice %181 {offsets = [0, 0, 0], sizes = [1, 8, 1], strides = [1, 1, 1]} : vector<1x8x16xf32> to vector<1x8x1xf32>
    %362 = tpu.concatenate %360, %361 in 2 : vector<1x8x15xf32>, vector<1x8x1xf32> -> vector<1x8x16xf32>
    %363 = tpu.iota {dimensions = array<i32: 2>} : vector<1x1x16xi32>
    %c15_i32_77 = arith.constant 15 : i32
    %364 = vector.broadcast %c15_i32_77 : i32 to vector<1x1x16xi32>
    %365 = arith.cmpi slt, %363, %364 : vector<1x1x16xi32>
    %366 = vector.extract_strided_slice %181 {offsets = [0, 0, 15], sizes = [1, 8, 1], strides = [1, 1, 1]} : vector<1x8x16xf32> to vector<1x8x1xf32>
    %367 = vector.shape_cast %365 : vector<1x1x16xi1> to vector<1x1x16xi1>
    %368 = vector.broadcast %367 : vector<1x1x16xi1> to vector<1x8x16xi1>
    %369 = vector.shape_cast %366 : vector<1x8x1xf32> to vector<1x8x1xf32>
    %370 = vector.broadcast %369 : vector<1x8x1xf32> to vector<1x8x16xf32>
    %371 = arith.select %368, %362, %370 : vector<1x8x16xi1>, vector<1x8x16xf32>
    %372 = arith.mulf %359, %12 : vector<1x4x8x16xf32>
    %cst_78 = arith.constant dense<0.000000e+00> : vector<1x8x16xf32>
    %373 = vector.multi_reduction <add>, %372, %cst_78 [1] : vector<1x4x8x16xf32> to vector<1x8x16xf32>
    %374 = arith.subf %371, %373 : vector<1x8x16xf32>
    %375 = arith.maximumf %323, %374 : vector<1x8x16xf32>
    %376 = arith.subf %323, %375 : vector<1x8x16xf32>
    %377 = math.exp %376 : vector<1x8x16xf32>
    %378 = arith.mulf %329, %377 : vector<1x8x16xf32>
    %379 = arith.subf %374, %375 : vector<1x8x16xf32>
    %380 = math.exp %379 : vector<1x8x16xf32>
    %381 = arith.addf %378, %380 : vector<1x8x16xf32>
    %382 = arith.addf %330, %374 : vector<1x8x16xf32>
    %383 = arith.select %347, %374, %331 : vector<1x8x16xi1>, vector<1x8x16xf32>
    %c4_i32 = arith.constant 4 : i32
    %384 = vector.broadcast %c4_i32 : i32 to vector<1x8x16xi32>
    %385 = arith.select %347, %384, %333 : vector<1x8x16xi1>, vector<1x8x16xi32>
    %386 = arith.select %347, %346, %334 : vector<1x8x16xi1>, vector<1x8x16xf32>
    %387 = vector.extract_strided_slice %148 {offsets = [0, 0, 1], sizes = [1, 8, 15], strides = [1, 1, 1]} : vector<1x8x16xf32> to vector<1x8x15xf32>
    %388 = vector.extract_strided_slice %148 {offsets = [0, 0, 0], sizes = [1, 8, 1], strides = [1, 1, 1]} : vector<1x8x16xf32> to vector<1x8x1xf32>
    %389 = tpu.concatenate %387, %388 in 2 : vector<1x8x15xf32>, vector<1x8x1xf32> -> vector<1x8x16xf32>
    %390 = tpu.iota {dimensions = array<i32: 2>} : vector<1x1x16xi32>
    %c15_i32_79 = arith.constant 15 : i32
    %391 = vector.broadcast %c15_i32_79 : i32 to vector<1x1x16xi32>
    %392 = arith.cmpi slt, %390, %391 : vector<1x1x16xi32>
    %cst_80 = arith.constant 1.000000e+05 : f32
    %393 = vector.broadcast %cst_80 : f32 to vector<1x8x1xf32>
    %394 = vector.shape_cast %392 : vector<1x1x16xi1> to vector<1x1x16xi1>
    %395 = vector.broadcast %394 : vector<1x1x16xi1> to vector<1x8x16xi1>
    %396 = vector.shape_cast %393 : vector<1x8x1xf32> to vector<1x8x1xf32>
    %397 = vector.broadcast %396 : vector<1x8x1xf32> to vector<1x8x16xf32>
    %398 = arith.select %395, %389, %397 : vector<1x8x16xi1>, vector<1x8x16xf32>
    %399 = arith.cmpf olt, %398, %386 : vector<1x8x16xf32>
    %400 = vector.extract_strided_slice %170 {offsets = [0, 0, 0, 1], sizes = [1, 4, 8, 15], strides = [1, 1, 1, 1]} : vector<1x4x8x16xf32> to vector<1x4x8x15xf32>
    %401 = vector.extract_strided_slice %170 {offsets = [0, 0, 0, 0], sizes = [1, 4, 8, 1], strides = [1, 1, 1, 1]} : vector<1x4x8x16xf32> to vector<1x4x8x1xf32>
    %402 = tpu.concatenate %400, %401 in 3 : vector<1x4x8x15xf32>, vector<1x4x8x1xf32> -> vector<1x4x8x16xf32>
    %403 = tpu.iota {dimensions = array<i32: 3>} : vector<1x1x1x16xi32>
    %c15_i32_81 = arith.constant 15 : i32
    %404 = vector.broadcast %c15_i32_81 : i32 to vector<1x1x1x16xi32>
    %405 = arith.cmpi slt, %403, %404 : vector<1x1x1x16xi32>
    %406 = vector.extract_strided_slice %170 {offsets = [0, 0, 0, 15], sizes = [1, 4, 8, 1], strides = [1, 1, 1, 1]} : vector<1x4x8x16xf32> to vector<1x4x8x1xf32>
    %407 = vector.shape_cast %405 : vector<1x1x1x16xi1> to vector<1x1x1x16xi1>
    %408 = vector.broadcast %407 : vector<1x1x1x16xi1> to vector<1x4x8x16xi1>
    %409 = vector.shape_cast %406 : vector<1x4x8x1xf32> to vector<1x4x8x1xf32>
    %410 = vector.broadcast %409 : vector<1x4x8x1xf32> to vector<1x4x8x16xf32>
    %411 = arith.select %408, %402, %410 : vector<1x4x8x16xi1>, vector<1x4x8x16xf32>
    %412 = vector.extract_strided_slice %192 {offsets = [0, 0, 1], sizes = [1, 8, 15], strides = [1, 1, 1]} : vector<1x8x16xf32> to vector<1x8x15xf32>
    %413 = vector.extract_strided_slice %192 {offsets = [0, 0, 0], sizes = [1, 8, 1], strides = [1, 1, 1]} : vector<1x8x16xf32> to vector<1x8x1xf32>
    %414 = tpu.concatenate %412, %413 in 2 : vector<1x8x15xf32>, vector<1x8x1xf32> -> vector<1x8x16xf32>
    %415 = tpu.iota {dimensions = array<i32: 2>} : vector<1x1x16xi32>
    %c15_i32_82 = arith.constant 15 : i32
    %416 = vector.broadcast %c15_i32_82 : i32 to vector<1x1x16xi32>
    %417 = arith.cmpi slt, %415, %416 : vector<1x1x16xi32>
    %418 = vector.extract_strided_slice %192 {offsets = [0, 0, 15], sizes = [1, 8, 1], strides = [1, 1, 1]} : vector<1x8x16xf32> to vector<1x8x1xf32>
    %419 = vector.shape_cast %417 : vector<1x1x16xi1> to vector<1x1x16xi1>
    %420 = vector.broadcast %419 : vector<1x1x16xi1> to vector<1x8x16xi1>
    %421 = vector.shape_cast %418 : vector<1x8x1xf32> to vector<1x8x1xf32>
    %422 = vector.broadcast %421 : vector<1x8x1xf32> to vector<1x8x16xf32>
    %423 = arith.select %420, %414, %422 : vector<1x8x16xi1>, vector<1x8x16xf32>
    %424 = arith.mulf %411, %12 : vector<1x4x8x16xf32>
    %cst_83 = arith.constant dense<0.000000e+00> : vector<1x8x16xf32>
    %425 = vector.multi_reduction <add>, %424, %cst_83 [1] : vector<1x4x8x16xf32> to vector<1x8x16xf32>
    %426 = arith.subf %423, %425 : vector<1x8x16xf32>
    %427 = arith.maximumf %375, %426 : vector<1x8x16xf32>
    %428 = arith.subf %375, %427 : vector<1x8x16xf32>
    %429 = math.exp %428 : vector<1x8x16xf32>
    %430 = arith.mulf %381, %429 : vector<1x8x16xf32>
    %431 = arith.subf %426, %427 : vector<1x8x16xf32>
    %432 = math.exp %431 : vector<1x8x16xf32>
    %433 = arith.addf %430, %432 : vector<1x8x16xf32>
    %434 = arith.addf %382, %426 : vector<1x8x16xf32>
    %435 = arith.select %399, %426, %383 : vector<1x8x16xi1>, vector<1x8x16xf32>
    %c5_i32 = arith.constant 5 : i32
    %436 = vector.broadcast %c5_i32 : i32 to vector<1x8x16xi32>
    %437 = arith.select %399, %436, %385 : vector<1x8x16xi1>, vector<1x8x16xi32>
    %438 = arith.select %399, %398, %386 : vector<1x8x16xi1>, vector<1x8x16xf32>
    %439 = vector.extract_strided_slice %137 {offsets = [0, 0, 15], sizes = [1, 8, 1], strides = [1, 1, 1]} : vector<1x8x16xf32> to vector<1x8x1xf32>
    %440 = vector.extract_strided_slice %137 {offsets = [0, 0, 0], sizes = [1, 8, 15], strides = [1, 1, 1]} : vector<1x8x16xf32> to vector<1x8x15xf32>
    %441 = tpu.concatenate %439, %440 in 2 : vector<1x8x1xf32>, vector<1x8x15xf32> -> vector<1x8x16xf32>
    %442 = tpu.iota {dimensions = array<i32: 2>} : vector<1x1x16xi32>
    %c1_i32_84 = arith.constant 1 : i32
    %443 = vector.broadcast %c1_i32_84 : i32 to vector<1x1x16xi32>
    %444 = arith.cmpi sge, %442, %443 : vector<1x1x16xi32>
    %cst_85 = arith.constant 1.000000e+05 : f32
    %445 = vector.broadcast %cst_85 : f32 to vector<1x8x1xf32>
    %446 = vector.shape_cast %444 : vector<1x1x16xi1> to vector<1x1x16xi1>
    %447 = vector.broadcast %446 : vector<1x1x16xi1> to vector<1x8x16xi1>
    %448 = vector.shape_cast %445 : vector<1x8x1xf32> to vector<1x8x1xf32>
    %449 = vector.broadcast %448 : vector<1x8x1xf32> to vector<1x8x16xf32>
    %450 = arith.select %447, %441, %449 : vector<1x8x16xi1>, vector<1x8x16xf32>
    %451 = arith.cmpf olt, %450, %438 : vector<1x8x16xf32>
    %452 = vector.extract_strided_slice %159 {offsets = [0, 0, 0, 15], sizes = [1, 4, 8, 1], strides = [1, 1, 1, 1]} : vector<1x4x8x16xf32> to vector<1x4x8x1xf32>
    %453 = vector.extract_strided_slice %159 {offsets = [0, 0, 0, 0], sizes = [1, 4, 8, 15], strides = [1, 1, 1, 1]} : vector<1x4x8x16xf32> to vector<1x4x8x15xf32>
    %454 = tpu.concatenate %452, %453 in 3 : vector<1x4x8x1xf32>, vector<1x4x8x15xf32> -> vector<1x4x8x16xf32>
    %455 = tpu.iota {dimensions = array<i32: 3>} : vector<1x1x1x16xi32>
    %c1_i32_86 = arith.constant 1 : i32
    %456 = vector.broadcast %c1_i32_86 : i32 to vector<1x1x1x16xi32>
    %457 = arith.cmpi sge, %455, %456 : vector<1x1x1x16xi32>
    %458 = vector.extract_strided_slice %159 {offsets = [0, 0, 0, 0], sizes = [1, 4, 8, 1], strides = [1, 1, 1, 1]} : vector<1x4x8x16xf32> to vector<1x4x8x1xf32>
    %459 = vector.shape_cast %457 : vector<1x1x1x16xi1> to vector<1x1x1x16xi1>
    %460 = vector.broadcast %459 : vector<1x1x1x16xi1> to vector<1x4x8x16xi1>
    %461 = vector.shape_cast %458 : vector<1x4x8x1xf32> to vector<1x4x8x1xf32>
    %462 = vector.broadcast %461 : vector<1x4x8x1xf32> to vector<1x4x8x16xf32>
    %463 = arith.select %460, %454, %462 : vector<1x4x8x16xi1>, vector<1x4x8x16xf32>
    %464 = vector.extract_strided_slice %181 {offsets = [0, 0, 15], sizes = [1, 8, 1], strides = [1, 1, 1]} : vector<1x8x16xf32> to vector<1x8x1xf32>
    %465 = vector.extract_strided_slice %181 {offsets = [0, 0, 0], sizes = [1, 8, 15], strides = [1, 1, 1]} : vector<1x8x16xf32> to vector<1x8x15xf32>
    %466 = tpu.concatenate %464, %465 in 2 : vector<1x8x1xf32>, vector<1x8x15xf32> -> vector<1x8x16xf32>
    %467 = tpu.iota {dimensions = array<i32: 2>} : vector<1x1x16xi32>
    %c1_i32_87 = arith.constant 1 : i32
    %468 = vector.broadcast %c1_i32_87 : i32 to vector<1x1x16xi32>
    %469 = arith.cmpi sge, %467, %468 : vector<1x1x16xi32>
    %470 = vector.extract_strided_slice %181 {offsets = [0, 0, 0], sizes = [1, 8, 1], strides = [1, 1, 1]} : vector<1x8x16xf32> to vector<1x8x1xf32>
    %471 = vector.shape_cast %469 : vector<1x1x16xi1> to vector<1x1x16xi1>
    %472 = vector.broadcast %471 : vector<1x1x16xi1> to vector<1x8x16xi1>
    %473 = vector.shape_cast %470 : vector<1x8x1xf32> to vector<1x8x1xf32>
    %474 = vector.broadcast %473 : vector<1x8x1xf32> to vector<1x8x16xf32>
    %475 = arith.select %472, %466, %474 : vector<1x8x16xi1>, vector<1x8x16xf32>
    %476 = arith.mulf %463, %12 : vector<1x4x8x16xf32>
    %cst_88 = arith.constant dense<0.000000e+00> : vector<1x8x16xf32>
    %477 = vector.multi_reduction <add>, %476, %cst_88 [1] : vector<1x4x8x16xf32> to vector<1x8x16xf32>
    %478 = arith.subf %475, %477 : vector<1x8x16xf32>
    %479 = arith.maximumf %427, %478 : vector<1x8x16xf32>
    %480 = arith.subf %427, %479 : vector<1x8x16xf32>
    %481 = math.exp %480 : vector<1x8x16xf32>
    %482 = arith.mulf %433, %481 : vector<1x8x16xf32>
    %483 = arith.subf %478, %479 : vector<1x8x16xf32>
    %484 = math.exp %483 : vector<1x8x16xf32>
    %485 = arith.addf %482, %484 : vector<1x8x16xf32>
    %486 = arith.addf %434, %478 : vector<1x8x16xf32>
    %487 = arith.select %451, %478, %435 : vector<1x8x16xi1>, vector<1x8x16xf32>
    %c6_i32 = arith.constant 6 : i32
    %488 = vector.broadcast %c6_i32 : i32 to vector<1x8x16xi32>
    %489 = arith.select %451, %488, %437 : vector<1x8x16xi1>, vector<1x8x16xi32>
    %490 = arith.select %451, %450, %438 : vector<1x8x16xi1>, vector<1x8x16xf32>
    %491 = vector.extract_strided_slice %148 {offsets = [0, 0, 15], sizes = [1, 8, 1], strides = [1, 1, 1]} : vector<1x8x16xf32> to vector<1x8x1xf32>
    %492 = vector.extract_strided_slice %148 {offsets = [0, 0, 0], sizes = [1, 8, 15], strides = [1, 1, 1]} : vector<1x8x16xf32> to vector<1x8x15xf32>
    %493 = tpu.concatenate %491, %492 in 2 : vector<1x8x1xf32>, vector<1x8x15xf32> -> vector<1x8x16xf32>
    %494 = tpu.iota {dimensions = array<i32: 2>} : vector<1x1x16xi32>
    %c1_i32_89 = arith.constant 1 : i32
    %495 = vector.broadcast %c1_i32_89 : i32 to vector<1x1x16xi32>
    %496 = arith.cmpi sge, %494, %495 : vector<1x1x16xi32>
    %cst_90 = arith.constant 1.000000e+05 : f32
    %497 = vector.broadcast %cst_90 : f32 to vector<1x8x1xf32>
    %498 = vector.shape_cast %496 : vector<1x1x16xi1> to vector<1x1x16xi1>
    %499 = vector.broadcast %498 : vector<1x1x16xi1> to vector<1x8x16xi1>
    %500 = vector.shape_cast %497 : vector<1x8x1xf32> to vector<1x8x1xf32>
    %501 = vector.broadcast %500 : vector<1x8x1xf32> to vector<1x8x16xf32>
    %502 = arith.select %499, %493, %501 : vector<1x8x16xi1>, vector<1x8x16xf32>
    %503 = arith.cmpf olt, %502, %490 : vector<1x8x16xf32>
    %504 = vector.extract_strided_slice %170 {offsets = [0, 0, 0, 15], sizes = [1, 4, 8, 1], strides = [1, 1, 1, 1]} : vector<1x4x8x16xf32> to vector<1x4x8x1xf32>
    %505 = vector.extract_strided_slice %170 {offsets = [0, 0, 0, 0], sizes = [1, 4, 8, 15], strides = [1, 1, 1, 1]} : vector<1x4x8x16xf32> to vector<1x4x8x15xf32>
    %506 = tpu.concatenate %504, %505 in 3 : vector<1x4x8x1xf32>, vector<1x4x8x15xf32> -> vector<1x4x8x16xf32>
    %507 = tpu.iota {dimensions = array<i32: 3>} : vector<1x1x1x16xi32>
    %c1_i32_91 = arith.constant 1 : i32
    %508 = vector.broadcast %c1_i32_91 : i32 to vector<1x1x1x16xi32>
    %509 = arith.cmpi sge, %507, %508 : vector<1x1x1x16xi32>
    %510 = vector.extract_strided_slice %170 {offsets = [0, 0, 0, 0], sizes = [1, 4, 8, 1], strides = [1, 1, 1, 1]} : vector<1x4x8x16xf32> to vector<1x4x8x1xf32>
    %511 = vector.shape_cast %509 : vector<1x1x1x16xi1> to vector<1x1x1x16xi1>
    %512 = vector.broadcast %511 : vector<1x1x1x16xi1> to vector<1x4x8x16xi1>
    %513 = vector.shape_cast %510 : vector<1x4x8x1xf32> to vector<1x4x8x1xf32>
    %514 = vector.broadcast %513 : vector<1x4x8x1xf32> to vector<1x4x8x16xf32>
    %515 = arith.select %512, %506, %514 : vector<1x4x8x16xi1>, vector<1x4x8x16xf32>
    %516 = vector.extract_strided_slice %192 {offsets = [0, 0, 15], sizes = [1, 8, 1], strides = [1, 1, 1]} : vector<1x8x16xf32> to vector<1x8x1xf32>
    %517 = vector.extract_strided_slice %192 {offsets = [0, 0, 0], sizes = [1, 8, 15], strides = [1, 1, 1]} : vector<1x8x16xf32> to vector<1x8x15xf32>
    %518 = tpu.concatenate %516, %517 in 2 : vector<1x8x1xf32>, vector<1x8x15xf32> -> vector<1x8x16xf32>
    %519 = tpu.iota {dimensions = array<i32: 2>} : vector<1x1x16xi32>
    %c1_i32_92 = arith.constant 1 : i32
    %520 = vector.broadcast %c1_i32_92 : i32 to vector<1x1x16xi32>
    %521 = arith.cmpi sge, %519, %520 : vector<1x1x16xi32>
    %522 = vector.extract_strided_slice %192 {offsets = [0, 0, 0], sizes = [1, 8, 1], strides = [1, 1, 1]} : vector<1x8x16xf32> to vector<1x8x1xf32>
    %523 = vector.shape_cast %521 : vector<1x1x16xi1> to vector<1x1x16xi1>
    %524 = vector.broadcast %523 : vector<1x1x16xi1> to vector<1x8x16xi1>
    %525 = vector.shape_cast %522 : vector<1x8x1xf32> to vector<1x8x1xf32>
    %526 = vector.broadcast %525 : vector<1x8x1xf32> to vector<1x8x16xf32>
    %527 = arith.select %524, %518, %526 : vector<1x8x16xi1>, vector<1x8x16xf32>
    %528 = arith.mulf %515, %12 : vector<1x4x8x16xf32>
    %cst_93 = arith.constant dense<0.000000e+00> : vector<1x8x16xf32>
    %529 = vector.multi_reduction <add>, %528, %cst_93 [1] : vector<1x4x8x16xf32> to vector<1x8x16xf32>
    %530 = arith.subf %527, %529 : vector<1x8x16xf32>
    %531 = arith.maximumf %479, %530 : vector<1x8x16xf32>
    %532 = arith.subf %479, %531 : vector<1x8x16xf32>
    %533 = math.exp %532 : vector<1x8x16xf32>
    %534 = arith.mulf %485, %533 : vector<1x8x16xf32>
    %535 = arith.subf %530, %531 : vector<1x8x16xf32>
    %536 = math.exp %535 : vector<1x8x16xf32>
    %537 = arith.addf %534, %536 : vector<1x8x16xf32>
    %538 = arith.addf %486, %530 : vector<1x8x16xf32>
    %539 = arith.select %503, %530, %487 : vector<1x8x16xi1>, vector<1x8x16xf32>
    %c7_i32_94 = arith.constant 7 : i32
    %540 = vector.broadcast %c7_i32_94 : i32 to vector<1x8x16xi32>
    %541 = arith.select %503, %540, %489 : vector<1x8x16xi1>, vector<1x8x16xi32>
    %542 = arith.select %503, %502, %490 : vector<1x8x16xi1>, vector<1x8x16xf32>
    %543 = arith.cmpf olt, %126, %542 : vector<1x8x16xf32>
    %c8_i32 = arith.constant 8 : i32
    %544 = vector.broadcast %c8_i32 : i32 to vector<1x8x16xi32>
    %545 = arith.select %543, %544, %541 : vector<1x8x16xi1>, vector<1x8x16xi32>
    %546 = math.log %537 : vector<1x8x16xf32>
    %547 = arith.addf %531, %546 : vector<1x8x16xf32>
    %548 = arith.subf %539, %547 : vector<1x8x16xf32>
    %cst_95 = arith.constant 8.000000e+00 : f32
    %549 = vector.broadcast %cst_95 : f32 to vector<1x8x16xf32>
    %550 = arith.mulf %549, %547 : vector<1x8x16xf32>
    %551 = arith.subf %538, %550 : vector<1x8x16xf32>
    %cst_96 = arith.constant 0.774999976 : f32
    %552 = vector.broadcast %cst_96 : f32 to vector<1x8x16xf32>
    %553 = arith.mulf %552, %548 : vector<1x8x16xf32>
    %cst_97 = arith.constant 2.500000e-02 : f32
    %554 = vector.broadcast %cst_97 : f32 to vector<1x8x16xf32>
    %555 = arith.mulf %554, %551 : vector<1x8x16xf32>
    %556 = arith.addf %553, %555 : vector<1x8x16xf32>
    %cst_98 = arith.constant 0.000000e+00 : f32
    %557 = vector.broadcast %cst_98 : f32 to vector<1x8x16xf32>
    %558 = arith.subf %557, %556 : vector<1x8x16xf32>
    %cst_99 = arith.constant 2.000000e+01 : f32
    %559 = vector.broadcast %cst_99 : f32 to vector<1x8x16xf32>
    %560 = arith.minimumf %126, %559 : vector<1x8x16xf32>
    %cst_100 = arith.constant 5.000000e-02 : f32
    %561 = vector.broadcast %cst_100 : f32 to vector<1x8x16xf32>
    %562 = arith.mulf %560, %561 : vector<1x8x16xf32>
    %c8_i32_101 = arith.constant 8 : i32
    %563 = vector.broadcast %c8_i32_101 : i32 to vector<1x8x16xi32>
    %564 = arith.cmpi ne, %545, %563 : vector<1x8x16xi32>
    %565 = arith.andi %125, %564 : vector<1x8x16xi1>
    %566 = arith.extui %565 : vector<1x8x16xi1> to vector<1x8x16xi32>
    %567 = arith.sitofp %566 : vector<1x8x16xi32> to vector<1x8x16xf32>
    %568 = arith.mulf %558, %562 : vector<1x8x16xf32>
    %569 = arith.mulf %568, %567 : vector<1x8x16xf32>
    %570 = vector.shape_cast %569 : vector<1x8x16xf32> to vector<1x1x8x16xf32>
    %cst_102 = arith.constant dense<0.000000e+00> : vector<1xf32>
    %571 = vector.multi_reduction <add>, %570, %cst_102 [1, 2, 3] : vector<1x1x8x16xf32> to vector<1xf32>
    %572 = vector.shape_cast %571 : vector<1xf32> to vector<1x1x1x1xf32>
    %573 = vector.extract %572[0, 0, 0, 0] : f32 from vector<1x1x1x1xf32>
    %574 = vector.broadcast %573 : f32 to vector<1x1x8x128xf32>
    %c0_103 = arith.constant 0 : index
    %c0_104 = arith.constant 0 : index
    %c0_105 = arith.constant 0 : index
    %c0_106 = arith.constant 0 : index
    %575 = vector.load %arg11[%c0_103, %c0_104, %c0_105, %c0_106] : memref<1x1x8x128xf32, #tpu.memory_space<vmem>>, vector<1x1x8x128xf32>
    tpu.vector_store %arg11[%c0_103, %c0_104, %c0_105, %c0_106], %574 {strides = array<i32>} : memref<1x1x8x128xf32, #tpu.memory_space<vmem>>, vector<1x1x8x128xf32>,
    %576 = vector.shape_cast %567 : vector<1x8x16xf32> to vector<1x1x8x16xf32>
    %cst_107 = arith.constant dense<0.000000e+00> : vector<1xf32>
    %577 = vector.multi_reduction <add>, %576, %cst_107 [1, 2, 3] : vector<1x1x8x16xf32> to vector<1xf32>
    %578 = vector.shape_cast %577 : vector<1xf32> to vector<1x1x1x1xf32>
    %579 = vector.extract %578[0, 0, 0, 0] : f32 from vector<1x1x1x1xf32>
    %580 = vector.broadcast %579 : f32 to vector<1x1x8x128xf32>
    %c0_108 = arith.constant 0 : index
    %c0_109 = arith.constant 0 : index
    %c0_110 = arith.constant 0 : index
    %c0_111 = arith.constant 0 : index
    %581 = vector.load %arg12[%c0_108, %c0_109, %c0_110, %c0_111] : memref<1x1x8x128xf32, #tpu.memory_space<vmem>>, vector<1x1x8x128xf32>
    tpu.vector_store %arg12[%c0_108, %c0_109, %c0_110, %c0_111], %580 {strides = array<i32>} : memref<1x1x8x128xf32, #tpu.memory_space<vmem>>, vector<1x1x8x128xf32>,
    return
  }
  func.func @transform_0(%arg0: i32, %arg1: i32) -> (i32, i32, i32, i32) {
    %c0_i32 = arith.constant 0 : i32
    %c0_i32_0 = arith.constant 0 : i32
    %c0_i32_1 = arith.constant 0 : i32
    return %arg0, %c0_i32, %arg1, %c0_i32_0 : i32, i32, i32, i32
  }
  func.func @transform_1(%arg0: i32, %arg1: i32) -> (i32, i32, i32, i32) {
    %c1_i32 = arith.constant 1 : i32
    %0 = arith.muli %arg1, %c1_i32 : i32
    %c1_i32_0 = arith.constant 1 : i32
    %1 = arith.subi %0, %c1_i32_0 : i32
    %c0_i32 = arith.constant 0 : i32
    %2 = arith.maxsi %1, %c0_i32 : i32
    %c0_i32_1 = arith.constant 0 : i32
    %c0_i32_2 = arith.constant 0 : i32
    %c0_i32_3 = arith.constant 0 : i32
    return %arg0, %c0_i32_1, %2, %c0_i32_2 : i32, i32, i32, i32
  }
  func.func @transform_2(%arg0: i32, %arg1: i32) -> (i32, i32, i32, i32) {
    %c1_i32 = arith.constant 1 : i32
    %0 = arith.addi %arg1, %c1_i32 : i32
    %c1_i32_0 = arith.constant 1 : i32
    %1 = arith.muli %0, %c1_i32_0 : i32
    %c1_i32_1 = arith.constant 1 : i32
    %2 = arith.minsi %1, %c1_i32_1 : i32
    %c0_i32 = arith.constant 0 : i32
    %c0_i32_2 = arith.constant 0 : i32
    %c0_i32_3 = arith.constant 0 : i32
    return %arg0, %c0_i32, %2, %c0_i32_2 : i32, i32, i32, i32
  }
  func.func @transform_3(%arg0: i32, %arg1: i32) -> (i32, i32, i32) {
    %c0_i32 = arith.constant 0 : i32
    %c0_i32_0 = arith.constant 0 : i32
    return %arg0, %arg1, %c0_i32 : i32, i32, i32
  }
  func.func @transform_4(%arg0: i32, %arg1: i32) -> (i32, i32, i32) {
    %c1_i32 = arith.constant 1 : i32
    %0 = arith.muli %arg1, %c1_i32 : i32
    %c1_i32_0 = arith.constant 1 : i32
    %1 = arith.subi %0, %c1_i32_0 : i32
    %c0_i32 = arith.constant 0 : i32
    %2 = arith.maxsi %1, %c0_i32 : i32
    %c0_i32_1 = arith.constant 0 : i32
    %c0_i32_2 = arith.constant 0 : i32
    return %arg0, %2, %c0_i32_1 : i32, i32, i32
  }
  func.func @transform_5(%arg0: i32, %arg1: i32) -> (i32, i32, i32) {
    %c1_i32 = arith.constant 1 : i32
    %0 = arith.addi %arg1, %c1_i32 : i32
    %c1_i32_0 = arith.constant 1 : i32
    %1 = arith.muli %0, %c1_i32_0 : i32
    %c1_i32_1 = arith.constant 1 : i32
    %2 = arith.minsi %1, %c1_i32_1 : i32
    %c0_i32 = arith.constant 0 : i32
    %c0_i32_2 = arith.constant 0 : i32
    return %arg0, %2, %c0_i32 : i32, i32, i32
  }
  func.func @transform_6(%arg0: i32, %arg1: i32) -> (i32, i32, i32) {
    %c0_i32 = arith.constant 0 : i32
    %c0_i32_0 = arith.constant 0 : i32
    return %arg0, %arg1, %c0_i32 : i32, i32, i32
  }
  func.func @transform_7(%arg0: i32, %arg1: i32) -> (i32, i32, i32) {
    %c1_i32 = arith.constant 1 : i32
    %0 = arith.muli %arg1, %c1_i32 : i32
    %c1_i32_0 = arith.constant 1 : i32
    %1 = arith.subi %0, %c1_i32_0 : i32
    %c0_i32 = arith.constant 0 : i32
    %2 = arith.maxsi %1, %c0_i32 : i32
    %c0_i32_1 = arith.constant 0 : i32
    %c0_i32_2 = arith.constant 0 : i32
    return %arg0, %2, %c0_i32_1 : i32, i32, i32
  }
  func.func @transform_8(%arg0: i32, %arg1: i32) -> (i32, i32, i32) {
    %c1_i32 = arith.constant 1 : i32
    %0 = arith.addi %arg1, %c1_i32 : i32
    %c1_i32_0 = arith.constant 1 : i32
    %1 = arith.muli %0, %c1_i32_0 : i32
    %c1_i32_1 = arith.constant 1 : i32
    %2 = arith.minsi %1, %c1_i32_1 : i32
    %c0_i32 = arith.constant 0 : i32
    %c0_i32_2 = arith.constant 0 : i32
    return %arg0, %2, %c0_i32 : i32, i32, i32
  }
  func.func @transform_9(%arg0: i32, %arg1: i32) -> (i32, i32, i32, i32) {
    %c0_i32 = arith.constant 0 : i32
    %c0_i32_0 = arith.constant 0 : i32
    %c0_i32_1 = arith.constant 0 : i32
    return %arg0, %arg1, %c0_i32, %c0_i32_0 : i32, i32, i32, i32
  }
  func.func @transform_10(%arg0: i32, %arg1: i32) -> (i32, i32, i32, i32) {
    %c0_i32 = arith.constant 0 : i32
    %c0_i32_0 = arith.constant 0 : i32
    %c0_i32_1 = arith.constant 0 : i32
    return %arg0, %arg1, %c0_i32, %c0_i32_0 : i32, i32, i32, i32
  }
}

</mosaic_0001>

<bundles_post_ra>
// kernel: eq.12
= control target key start
LH: loop header
LB: loop body
LE: loop exit
PB: predicated region body
PF: predicated region fallthrough
CT: control target
= control target key end

     0   :  { %2 = vsyncpa [#allocation1], 0  ;;  %s96_s6 = smov [#allocation0]   ;;  %s129_s0 = inlined_call_operand.hbm [shape: s32[2,16,16], index: 0, kind: input, shape index: {}]   ;;  %s130_s1 = inlined_call_operand.vmem [shape: s32[512], index: 1, kind: output, shape index: {}]  }
   0x1   :  { %s7_s7 = sshll.u32 %s96_s6, 4  ;;  %s72_s10 = scalar_lea.hbm %s129_s0, 512  ;;  %s8_s7 = int_to_ptr.vmem [resolvable:$true] %s7_s7 }
   0x2   :  { %p73_p0 = scmp.ne.s32.totalorder %s129_s0, %s72_s10  ;;  %p76_p1 = scmp.lt.u32.totalorder %s72_s10, %s129_s0 }
   0x4   :  { %p78_p2 = pnand %p76_p1, %p73_p0 }
   0x6   :  { %81 = shalt.err (!%p78_p2)
}
   0x7   :  { %s82_s15 = scalar_lea.vmem %s8_s7, 512  ;;  %p87_p4 = scmp.lt.s32.totalorder %s8_s7, %s8_s7 }
   0x8   :  { %p83_p3 = scmp.ne.s32.totalorder %s8_s7, %s82_s15  ;;  %p88_p5 = scmp.lt.s32.totalorder %s82_s15, %s82_s15 }
   0xa   :  { %p89_p6 = por %p88_p5, %p87_p4 }
   0xc   :  { %p90_p7 = pnand %p89_p6, %p83_p3 }
   0xe   :  { %93 = shalt.err (!%p90_p7)
}
   0xf   :  { %10 = dma.hbm_to_vmem [thread:$0]  %s129_s0, 512, %s8_s7, [#allocation1]  }
  0x10   :  { %94 = dma.done.wait [#allocation1], 512  }
  0x11   :  { %95 = vsyncadd [#allocation1], 4294966784  ;;  %v16_v0 = vld [vmem:[#allocation0 + $0x7] ss:$8 sm:$0xf]   ;;  %s97_s0 = smov 112  }
  0x12   :  { %v28_v1 = vld [vmem:[#allocation0 + $0x5] ss:$8 sm:$0xf]   ;;  %17 = vrot.lane.b32.xlu0 %v16_v0, %s97_s0  ;;  %s98_s18 = smov 80   ;;  %vm13_vm0 = vcmask 130048   ;;  %s99_s19 = smov 96  }
  0x13   :  { %29 = vrot.lane.b32.xlu1 %v28_v1, %s98_s18  ;;  %v22_v2 = vld [vmem:[#allocation0 + $0x6] ss:$8 sm:$0xf]   ;;  %v34_v3 = vld [vmem:[#allocation0 + $0x4] ss:$8 sm:$0xf]  }
  0x14   :  { %v12_v4 = vld [vmem:[#allocation0] ss:$8 sm:$0xf]   ;;  %s100_s20 = smov 64   ;;  %s101_s21 = smov 48   ;;  %vm19_vm1 = vcmask 1048448  }
  0x15   :  { %14 = vst.msk [vmem:[#allocation2] sm:$0xf] %vm13_vm0, %v12_v4   ;;  %v40_v5 = vld [vmem:[#allocation0 + $0x3] ss:$8 sm:$0xf]   ;;  %s102_s22 = smov 32  }
  0x16   :  { %23 = vrot.lane.b32.xlu0 %v22_v2, %s99_s19  ;;  %v46_v6 = vld [vmem:[#allocation0 + $0x2] ss:$8 sm:$0xf]   ;;  %v52_v7 = vld [vmem:[#allocation0 + $0x1] ss:$8 sm:$0xf]  }
  0x17   :  { %35 = vrot.lane.b32.xlu1 %v34_v3, %s100_s20  ;;  %s103_s23 = smov 16   ;;  %vm25_vm2 = vcmask 917248   ;;  %vm31_vm3 = vcmask 786048   ;;  %vm37_vm4 = vcmask 654848   ;;  %vm43_vm5 = vcmask 523648  }
  0x18   :  { %vm49_vm6 = vcmask 392448   ;;  %vm55_vm7 = vcmask 261248  }
  0x1a   :  { %41 = vrot.lane.b32.xlu0 %v40_v5, %s101_s21 }
  0x1b   :  { %47 = vrot.lane.b32.xlu1 %v46_v6, %s102_s22 }
  0x1e   :  { %53 = vrot.lane.b32.xlu0 %v52_v7, %s103_s23 }
  0x84   :  { %v18_v8 = vpop.permute.xlu0 %17  }
  0x85   :  { %v30_v9 = vpop.permute.xlu1 %29   ;;  %20 = vst.msk [vmem:[#allocation2] sm:$0xf] %vm19_vm1, %v18_v8  }
  0x88   :  { %v24_v10 = vpop.permute.xlu0 %23  }
  0x89   :  { %v36_v11 = vpop.permute.xlu1 %35   ;;  %26 = vst.msk [vmem:[#allocation2] sm:$0xf] %vm25_vm2, %v24_v10  }
  0x8a   :  { %32 = vst.msk [vmem:[#allocation2] sm:$0xf] %vm31_vm3, %v30_v9  }
  0x8b   :  { %38 = vst.msk [vmem:[#allocation2] sm:$0xf] %vm37_vm4, %v36_v11  }
  0x8c   :  { %v42_v12 = vpop.permute.xlu0 %41  }
  0x8d   :  { %v48_v13 = vpop.permute.xlu1 %47   ;;  %44 = vst.msk [vmem:[#allocation2] sm:$0xf] %vm43_vm5, %v42_v12  }
  0x8e   :  { %50 = vst.msk [vmem:[#allocation2] sm:$0xf] %vm49_vm6, %v48_v13  }
  0x90   :  { %v54_v14 = vpop.permute.xlu0 %53  }
  0x91   :  { %56 = vst.msk [vmem:[#allocation2] sm:$0xf] %vm55_vm7, %v54_v14  }
  0x98   :  { %v60_v15 = vld [vmem:[#allocation2] sm:$0xf] }
  0x99   :  { %62 = vst [vmem:[%s130_s1] sm:$0xf] %v60_v15 }
  0x9a   :  { %63 = vsyncpa [#allocation1], 1 }

// kernel: abl_ce_iou_loss.3
= control target key start
LH: loop header
LB: loop body
LE: loop exit
PB: predicated region body
PF: predicated region fallthrough
CT: control target
= control target key end

     0   :  { %s1835_s0 = inlined_call_operand.hbm [shape: f32[2,4,16,16], index: 0, kind: input, shape index: {}, may-alias: {0,1}]   ;;  %s1836_s1 = inlined_call_operand.hbm [shape: f32[2,4,16,16], index: 1, kind: input, shape index: {}, may-alias: {0,1}]   ;;  %s1837_s2 = inlined_call_operand.vmem [shape: s32[2,16,16], index: 2, kind: input, shape index: {}]   ;;  %s1838_s3 = inlined_call_operand.vmem [shape: f32[2,4,16,16], index: 3, kind: output, shape index: {0}]   ;;  %s1839_s4 = inlined_call_operand.hbm [shape: f32[2,16,16], index: 4, kind: output, shape index: {1}]   ;;  %s1840_s5 = inlined_call_operand.hbm [shape: f32[2,2,8,128], index: 5, kind: output, shape index: {2}]  }
   0x1   :  { %1855 = sst [smem:[#allocation19_spill]] %s1835_s0 }
   0x2   :  { %1856 = sst [smem:[#allocation20_spill]] %s1836_s1 }
   0x3   :  { %1857 = sst [smem:[#allocation21_spill]] %s1838_s3 }
   0x4   :  { %1858 = sst [smem:[#allocation22_spill]] %s1839_s4 }
   0x5   :  { %1859 = sst [smem:[#allocation23_spill]] %s1840_s5 }
   0x6   :  { %11 = vsyncpa [#allocation3], 0 }
   0x7   :  { %13 = vsyncpa [#allocation3 + $0x1], 0 }
   0x8   :  { %14 = vsyncpa [#allocation6], 0 }
   0x9   :  { %16 = vsyncpa [#allocation6 + $0x1], 0 }
   0xa   :  { %17 = vsyncpa [#allocation4], 0 }
   0xb   :  { %19 = vsyncpa [#allocation4 + $0x1], 0 }
   0xc   :  { %20 = vsyncpa [#allocation10], 0 }
   0xd   :  { %22 = vsyncpa [#allocation10 + $0x1], 0  ;;  %s1317_s18 = smov 0   ;;  %s1319_s19 = smov 0  }
   0xe   :  { %s1321_s20 = smov 0   ;;  %s1323_s21 = smov 0  }
   0xf   :  { %s1325_s22 = smov 0   ;;  %s1327_s23 = smov 0  }
  0x10   :  { %s1329_s24 = smov 0   ;;  %s1331_s25 = smov 0  }
  0x11   :  { %s1333_s26 = smov 0   ;;  %s1335_s27 = smov 0  }
  0x12   :  { %s1337_s28 = smov 0  }
  0x13 LB: > { %1860 = sst [smem:[#allocation15_spill]] %s1248_s21  ;;  %s885_s29 = sadd.s32 4294967295, %s1276_s28   ;;  %s1276_s28 = sphi %s1337_s28, %s28_s28   ;;  %s1272_s27 = sphi %s1335_s27, %s1903_s27   ;;  %s1268_s26 = sphi %s1333_s26, %s1902_s26   ;;  %s1264_s25 = sphi %s1331_s25, %s1901_s25   ;;  %s1260_s24 = sphi %s1329_s24, %s1900_s24   ;;  %s1256_s23 = sphi %s1327_s23, %s1899_s23   ;;  %s1252_s22 = sphi %s1325_s22, %s1898_s22   ;;  %s1248_s21 = sphi %s1323_s21, %s1897_s21   ;;  %s1244_s20 = sphi %s1321_s20, %s1896_s20   ;;  %s1240_s19 = sphi %s1319_s19, %s1895_s19   ;;  %s1236_s18 = sphi %s1317_s18, %s1894_s18  }
  0x14   : > { %s886_s30 = sadd.s32 4294967294, %s1276_s28   ;;  %s37_s6 = sadd.s32 1, %s1268_s26 }
  0x15   : > { %s40_s7 = sadd.s32 1, %s1272_s27  ;;  %p38_p0 = scmp.ge.s32.totalorder %s37_s6, 2 }
  0x16   : > { %s49_s8 = sadd.s32 1, %s1256_s23  ;;  %p56_p1 = scmp.ne.s32.totalorder %s1256_s23, %s1252_s22 }
  0x17   : > { %p1849_p2 = scmp.eq.s32.totalorder %s1276_s28, 0  ;;  %s1905_s6 = smov (%p38_p0, %s37_s6), 0 }
  0x18   : > { %1861 = sst [smem:[#allocation16_spill]] %s1905_s6  ;;  %s1907_s7 = smov (!%p38_p0, %s40_s7), %s1272_s27 }
  0x19   : > { %s45_s9 = ssub.s32 %s1268_s26, %s1905_s6  ;;  %p1387_p3 = por %p1849_p2, %p56_p1 }
  0x1a   : > { %p42_p4 = scmp.ge.s32.totalorder %s1907_s7, 2  ;;  %p62_p5 = scmp.ne.s32.totalorder %s1252_s22, %s1248_s21 }
  0x1b   : > { %p1393_p6 = scmp.eq.s32.totalorder %s885_s29, 0  ;;  %p150_p7 = scmp.eq.s32.totalorder %s885_s29, 3 }
  0x1c   : > { %s1909_s7 = smov (%p42_p4, %s1907_s7), 0  ;;  %p184_p10 = scmp.eq.s32.totalorder %s886_s30, 3 }
  0x1d   : > { %1864 = sst [smem:[#allocation17_spill]] %s1909_s7  ;;  %p1401_p8 = por %p1393_p6, %p62_p5 }
  0x1e   : > { %p1405_p9 = por %p150_p7, %p56_p1  ;;  %s1411_s14 = ssub.s32 %s1272_s27, %s1909_s7 }
  0x1f   : > { %s1865_s12 = scalar_select %p1401_p8, 1, 0 }
  0x20   : > { %s1866_s13 = scalar_select %p1405_p9, 1, 0 }
  0x21   : > { %s46_s15 = sor.u32 %s45_s9, %s1411_s14  ;;  %p1414_p12 = por %p184_p10, %p62_p5 }
  0x22   : > { %1867 = sst [smem:[#allocation18_spill]] %s1866_s13  ;;  %p47_p11 = scmp.eq.s32.totalorder %s46_s15, 0 }
  0x23   : > { %s1868_s16 = scalar_select %p1414_p12, 1, 0 }
  0x24   : > { %p1848_p13 = scmp.lt.s32.totalorder %s1276_s28, 4  ;;  %s232_s17 = sand.u32 1, %s1256_s23  }
  0x25   : > { %s1421_s29 = scalar_select %p47_p11, %s1256_s23, %s49_s8  }
  0x26   : > { %s889_s6 = sshll.u32 %s232_s17, 5  ;;  %s890_s21 = sshll.u32 %s1272_s27, 3 }
  0x27   : > { %s241_s5 = sadd.s32 %s1268_s26, %s890_s21  ;;  %s236_s4 = scalar_lea.vmem [#allocation2], %s889_s6 }
  0x28   : > { %s244_s7 = sshll.u32 %s236_s4, 4  ;;  %s891_s3 = sshll.u32 %s241_s5, 7  ;;  %s1425_s7 = int_to_ptr.vmem [resolvable:$true] %s244_s7 }
  0x29   : > { %s1869_s0 = sld [smem:[#allocation19_spill]]  ;;  %p1436_p0 = pnand %p1848_p13, %p1387_p3 }
  0x2a   : > { %s1440_s4 = scalar_lea.sflag [#allocation3], %s232_s17 }
  0x2b   : > { %p1057_p4 = pneg %p1436_p0 }
  0x2f   : > { %s1430_s9 = scalar_lea.hbm %s1869_s0, %s891_s3  ;;  %s1060_s6 = scalar_lea.hbm %s1869_s0, 2048 }
  0x30   : > { %s1055_s5 = scalar_lea.hbm %s1430_s9, 512  ;;  %p1061_p3 = scmp.lt.u32.totalorder %s1430_s9, %s1869_s0 }
  0x31   : > { %p1056_p1 = scmp.ne.s32.totalorder %s1430_s9, %s1055_s5  ;;  %p1062_p10 = scmp.lt.u32.totalorder %s1060_s6, %s1055_s5 }
  0x32   : > { %p1064_p13 = scmp.lt.u32.totalorder %s1055_s5, %s1430_s9 }
  0x33   : > { %p1058_p5 = pnand %p1057_p4, %p1056_p1  ;;  %p1063_p11 = por %p1062_p10, %p1061_p3 }
  0x35   : > { %p1059_p7 = pneg %p1058_p5  ;;  %p1065_p2 = por %p1064_p13, %p1063_p11 }
  0x37   : > { %p1066_p12 = pnand %p1065_p2, %p1059_p7 }
  0x39   : > { %1069 = shalt.err (!%p1066_p12)
}
  0x3a   : > { %s1070_s15 = scalar_lea.vmem %s1425_s7, 512  ;;  %s1278_s17 = smov [#allocation2]  }
  0x3b   : > { %p1071_p1 = scmp.ne.s32.totalorder %s1425_s7, %s1070_s15  ;;  %s1075_s30 = sshll.u32 %s1278_s17, 4  ;;  %s1076_s30 = int_to_ptr.vmem [resolvable:$false] %s1075_s30 }
  0x3c   : > { %s1077_s3 = scalar_lea.vmem %s1076_s30, 1024  ;;  %p1078_p8 = scmp.lt.s32.totalorder %s1425_s7, %s1076_s30 }
  0x3d   : > { %p1073_p5 = pnand %p1071_p1, %p1057_p4  ;;  %p1079_p3 = scmp.lt.s32.totalorder %s1077_s3, %s1070_s15 }
  0x3f   : > { %p1074_p9 = pneg %p1073_p5  ;;  %p1080_p10 = por %p1079_p3, %p1078_p8 }
  0x41   : > { %p1081_p13 = pnand %p1080_p10, %p1074_p9 }
  0x43   : > { %1084 = shalt.err (!%p1081_p13)
}
  0x44   : > { %s1852_s5 = smov 256   ;;  %s1853_s21 = smov 128  }
  0x45   : > { %s1281_s6 = smov 8   ;;  %p895_p2 = scmp.ge.s32.totalorder %s1276_s28, 1 }
  0x46   : > { %927 = dma.hbm_to_vmem [thread:$0]  (!%p1436_p0), %s1430_s9, 512, %s1425_s7, %s1440_s4, %s1852_s5, %s1853_s21, %s1281_s6  }
  0x47   : > { %p288_p8 = scmp.lt.s32.totalorder %s1276_s28, 5  ;;  %s83_s13 = sadd.s32 1, %s1244_s20 }
  0x48   : > { %p90_p12 = scmp.ne.s32.totalorder %s1244_s20, %s1240_s19  ;;  %p96_p4 = scmp.ne.s32.totalorder %s1240_s19, %s1236_s18 }
  0x49   : > { %p1473_p9 = pnand %p895_p2, %p288_p8  ;;  %s254_s15 = sand.u32 1, %s1244_s20  }
  0x4a   : > { %p1872_p7 = scmp.eq.s32.totalorder %s1276_s28, 0  ;;  %p1487_p1 = por %p96_p4, %p1393_p6 }
  0x4b   : > { %s892_s17 = sshll.u32 %s254_s15, 5  ;;  %p81_p0 = scmp.eq.s32.totalorder %s1411_s14, 0 }
  0x4c   : > { %p92_p11 = por %p90_p12, %p1872_p7  ;;  %s258_s7 = scalar_lea.vmem [#allocation5], %s892_s17 }
  0x4d   : > { %s1873_s8 = scalar_select %p1487_p1, 1, 0 }
  0x4e   : > { %s269_s9 = sshll.u32 %s258_s7, 4  ;;  %s1233_s30 = sshll.u32 %s1272_s27, 10  ;;  %s1496_s9 = int_to_ptr.vmem [resolvable:$true] %s269_s9 }
  0x4f   : > { %s1493_s4 = scalar_select %p81_p0, %s1244_s20, %s83_s13  }
  0x50   : > { %s1232_s3 = sadd.s32 128, %s1233_s30  ;;  %s1874_s1 = sld [smem:[#allocation20_spill]] }
  0x51   : > { %p1875_p5 = scmp.lt.s32.totalorder %s1276_s28, 4  ;;  %s1509_s14 = scalar_lea.sflag [#allocation6], %s254_s15 }
  0x53   : > { %p1505_p6 = pnand %p1875_p5, %p92_p11 }
  0x55   : > { %p1087_p10 = pneg %p1505_p6 }
  0x56   : > { %s1501_s21 = scalar_lea.hbm %s1874_s1, %s1232_s3  ;;  %s1090_s7 = scalar_lea.hbm %s1874_s1, 2048 }
  0x57   : > { %s1085_s13 = scalar_lea.hbm %s1501_s21, 512  ;;  %p1091_p8 = scmp.lt.u32.totalorder %s1501_s21, %s1874_s1 }
  0x58   : > { %p1086_p3 = scmp.ne.s32.totalorder %s1501_s21, %s1085_s13  ;;  %p1092_p12 = scmp.lt.u32.totalorder %s1090_s7, %s1085_s13 }
  0x59   : > { %p1094_p7 = scmp.lt.u32.totalorder %s1085_s13, %s1501_s21 }
  0x5a   : > { %p1088_p13 = pnand %p1087_p10, %p1086_p3  ;;  %p1093_p4 = por %p1092_p12, %p1091_p8 }
  0x5c   : > { %p1089_p2 = pneg %p1088_p13  ;;  %p1095_p11 = por %p1094_p7, %p1093_p4 }
  0x5e   : > { %p1096_p0 = pnand %p1095_p11, %p1089_p2 }
  0x60   : > { %1099 = shalt.err (!%p1096_p0)
}
  0x61   : > { %s1100_s15 = scalar_lea.vmem %s1496_s9, 512  ;;  %s1282_s18 = smov [#allocation5]  }
  0x62   : > { %p1101_p5 = scmp.ne.s32.totalorder %s1496_s9, %s1100_s15  ;;  %s1105_s5 = sshll.u32 %s1282_s18, 4  ;;  %s1106_s5 = int_to_ptr.vmem [resolvable:$false] %s1105_s5 }
  0x63   : > { %s1107_s17 = scalar_lea.vmem %s1106_s5, 1024  ;;  %p1108_p1 = scmp.lt.s32.totalorder %s1496_s9, %s1106_s5 }
  0x64   : > { %p1103_p3 = pnand %p1101_p5, %p1087_p10  ;;  %p1109_p8 = scmp.lt.s32.totalorder %s1107_s17, %s1100_s15 }
  0x66   : > { %p1104_p13 = pneg %p1103_p3  ;;  %p1110_p12 = por %p1109_p8, %p1108_p1 }
  0x68   : > { %p1111_p4 = pnand %p1110_p12, %p1104_p13 }
  0x6a   : > { %1114 = shalt.err (!%p1111_p4)
}
  0x6b   : > { %s1877_s13 = smov 128   ;;  %s1878_s7 = smov 256  }
  0x6c   : > { %930 = dma.hbm_to_vmem [thread:$0]  (!%p1505_p6), %s1501_s21, 512, %s1496_s9, %s1509_s14, %s1878_s7, %s1877_s13, %s1281_s6  }
  0x6d   : > { %292 = sbr.rel (%p1473_p9) target bundleno = 431 (0x1af), region = 32  ;;  %s1543_s30 = sand.u32 (!%p1473_p9), 1, %s1252_s22  }
  0x6e   : > { %s896_s3 = sshll.u32 (!%p1473_p9), %s1543_s30, 5  ;;  %s295_s15 = scalar_lea.sflag (!%p1473_p9), [#allocation3], %s1543_s30 }
  0x6f   : > { %s298_s11 = scalar_lea.vmem (!%p1473_p9), [#allocation2], %s896_s3  ;;  %p1879_p1 = scmp.ne.s32.totalorder (!%p1473_p9), %s1865_s12, 0 }
  0x74   : > { %1216 = dma.done.wait (%p1879_p1), %s295_s15, 512  }
  0x75   : > { %1218 = vsyncadd (%p1879_p1), %s295_s15, 4294966784  ;;  %s303_s21 = sand.u32 1, %s1240_s19   ;;  %p1880_p9 = scmp.ne.s32.totalorder %s1873_s8, 0 }
  0x76   : > { %s897_s6 = sshll.u32 %s303_s21, 5  ;;  %s304_s10 = scalar_lea.sflag [#allocation6], %s303_s21 }
  0x77   : > { %s1554_s9 = scalar_lea.vmem [#allocation5], %s897_s6 }
  0x78   : > { %1220 = dma.done.wait (%p1880_p9), %s304_s10, 512  }
  0x79   : > { %1222 = vsyncadd (%p1880_p9), %s304_s10, 4294966784  ;;  %vm371_vm0 = vcmask 130048   ;;  %v367_v0 = vld [vmem:[%s298_s11] sm:$0xff]  ;;  %v368_v1 = vld [vmem:[%s298_s11 + $0x8] sm:$0xff]  ;;  %p359_p6 = scmp.lt.s32.totalorder %s1264_s25, 1  ;;  %p361_p10 = scmp.lt.s32.totalorder %s1260_s24, 1 }
  0x7a   : > { %v369_v2 = vld [vmem:[%s298_s11 + $0x10] sm:$0xff]  ;;  %v370_v3 = vld [vmem:[%s298_s11 + $0x18] sm:$0xff]  ;;  %v372_v4 = vsel %vm371_vm0, %v367_v0, -inf  ;;  %v373_v5 = vsel %vm371_vm0, %v368_v1, -inf  ;;  %s1283_s15 = smov 127   ;;  %s1284_s11 = smov 15  }
  0x7b   : > { %v374_v6 = vsel %vm371_vm0, %v369_v2, -inf  ;;  %v375_v7 = vsel %vm371_vm0, %v370_v3, -inf  ;;  %v376_v8 = vmax.f32 %v372_v4, %v373_v5  ;;  %s360_s12 = scalar_select %p359_p6, %s1264_s25, 1  ;;  %v450_v45 = vld [vmem:[%s1554_s9] sm:$0x1]  ;;  %vm454_vm5 = vcmask 122880  }
  0x7c   : > { %v377_v9 = vmax.f32 %v374_v6, %v375_v7  ;;  %s362_s8 = scalar_select %p361_p10, %s1260_s24, 1  ;;  %v451_v46 = vld [vmem:[%s1554_s9 + $0x8] sm:$0x1]  ;;  %v452_v47 = vld [vmem:[%s1554_s9 + $0x10] sm:$0x1]  ;;  %v455_v49 = vsel %vm454_vm5, %v450_v45, -inf }
  0x7d   : > { %s901_s14 = sshll.u32 %s360_s12, 1  ;;  %v453_v48 = vld [vmem:[%s1554_s9 + $0x18] sm:$0x1]  ;;  %v456_v50 = vsel %vm454_vm5, %v451_v46, -inf  ;;  %v457_v51 = vsel %vm454_vm5, %v452_v47, -inf  ;;  %s1648_s21 = scalar_lea.vmem [#allocation7], %s896_s3 }
  0x7e   : > { %v378_v10 = vmax.f32 %v376_v8, %v377_v9  ;;  %s364_s18 = sadd.s32 %s901_s14, %s362_s8  ;;  %v458_v52 = vsel %vm454_vm5, %v453_v48, -inf  ;;  %v459_v53 = vmax.f32 %v455_v49, %v456_v50  ;;  %vm553_vm7 = vcmask 121856   ;;  %p591_p2 = scmp.ne.s32.totalorder %s1260_s24, 1 }
  0x7f   : > { %s902_s5 = sshll.u32 %s364_s18, 3  ;;  %v460_v54 = vmax.f32 %v457_v51, %v458_v52  ;;  %s899_s6 = sshll.u32 %s1543_s30, 3 }
  0x80   : > { %v379_v11 = vsub.f32 %v367_v0, %v378_v10  ;;  %v380_v12 = vsub.f32 %v368_v1, %v378_v10  ;;  %v381_v13 = vsub.f32 %v369_v2, %v378_v10  ;;  %v382_v14 = vsub.f32 %v370_v3, %v378_v10  ;;  %s366_s7 = scalar_lea.vmem %s1837_s2, %s902_s5  ;;  %s348_s10 = scalar_lea.vmem [#allocation8], %s899_s6 }
  0x81   : > { %v414_v30 = vld [vmem:[%s366_s7] sm:$0xff]  ;;  %v461_v55 = vmax.f32 %v459_v53, %v460_v54  ;;  %s592_s3 = scalar_select %p591_p2, 1, 0 }
  0x82   : > { %v383_v15 = vmul.f32 1.442695, %v379_v11  ;;  %v385_v16 = vmul.f32 1.442695, %v380_v12  ;;  %v387_v17 = vmul.f32 1.442695, %v381_v13 }
  0x83   : > { %v389_v18 = vmul.f32 1.442695, %v382_v14  ;;  %vm415_vm1 = vcmp.eq.s32.totalorder %v414_v30, 0  ;;  %vm417_vm2 = vcmp.eq.s32.totalorder %v414_v30, 1  ;;  %vm419_vm3 = vcmp.eq.s32.totalorder %v414_v30, 2  ;;  %s1730_s8 = scalar_lea.vmem [#allocation9], %s899_s6 }
  0x84   : > { %1033 = vpow2.f32 %v383_v15  ;;  %vm421_vm4 = vcmp.eq.s32.totalorder %v414_v30, 3  ;;  %v1616_v56 = vsub.f32 %v450_v45, %v461_v55  ;;  %v1618_v57 = vsub.f32 %v451_v46, %v461_v55  ;;  %s1881_s5 = sld [smem:[#allocation18_spill]] }
  0x85   : > { %1035 = vpow2.f32 %v385_v16  ;;  %v1620_v58 = vsub.f32 %v452_v47, %v461_v55  ;;  %v465_v61 = vsub.f32 %v453_v48, %v461_v55 }
  0x86   : > { %1037 = vpow2.f32 %v387_v17  ;;  %v466_v59 = vmul.f32 1.442695, %v1616_v56  ;;  %v468_v60 = vmul.f32 1.442695, %v1618_v57 }
  0x87   : > { %1039 = vpow2.f32 %v389_v18  ;;  %v470_v62 = vmul.f32 1.442695, %v1620_v58  ;;  %v472_v63 = vmul.f32 1.442695, %v465_v61 }
  0x8a   : > { %p1882_p7 = scmp.ne.s32.totalorder %s1881_s5, 0 }
  0x8b   : > { %s906_s17 = sshll.u32 (%p1882_p7), %s1264_s25, 3 }
  0x8c   : > { %s620_s13 = sadd.s32 (%p1882_p7), %s1260_s24, %s906_s17 }
  0x8d   : > { %s907_s7 = sshll.u32 (%p1882_p7), %s620_s13, 3 }
  0x8e   : > { %v1565_v19 = vpop.eup %1033 }
  0x8f   : > { %v1567_v20 = vpop.eup %1035  ;;  %v391_v21 = vsel %vm371_vm0, %v1565_v19, 0.0 }
  0x90   : > { %v1572_v22 = vpop.eup %1037  ;;  %v392_v23 = vsel %vm371_vm0, %v1567_v20, 0.0 }
  0x91   : > { %v1577_v24 = vpop.eup %1039  ;;  %v393_v25 = vadd.f32 %v392_v23, %v391_v21  ;;  %v394_v26 = vsel %vm371_vm0, %v1572_v22, 0.0  ;;  %v504_v21 = vlaneseq }
  0x92   : > { %v396_v27 = vsel %vm371_vm0, %v1577_v24, 0.0 }
  0x93   : > { %v395_v28 = vadd.f32 %v394_v26, %v393_v25 }
  0x95   : > { %v397_v29 = vadd.f32 %v396_v27, %v395_v28  ;;  %v1677_v27 = vshrl.u32 %v504_v21, 7 }
  0x97   : > { %1041 = vlog2.f32 %v397_v29  ;;  %vm506_vm6 = vcmp.lt.s32.totalorder %v1677_v27, 7 }
  0x98   : > { %1043 = vrcp.f32 %v397_v29 }
  0x99   : > { %1045 = vpow2.f32 %v466_v59 }
  0x9a   : > { %1047 = vpow2.f32 %v468_v60 }
  0x9b   : > { %1049 = vpow2.f32 %v470_v62 }
  0x9c   : > { %1051 = vpow2.f32 %v472_v63 }
  0xa1   : > { %v1042_v31 = vpop.eup %1041 }
  0xa2   : > { %v405_v32 = vmul.f32 0.6931472, %v1042_v31  ;;  %v1044_v0 = vpop.eup %1043  ;;  %v511_v31 = vsub.s32 0, %v1677_v27 }
  0xa3   : > { %v1046_v1 = vpop.eup %1045  ;;  %v1660_v15 = vmul.f32 %v1044_v0, %v1577_v24 }
  0xa4   : > { %v1587_v33 = vsub.f32 %v379_v11, %v405_v32  ;;  %v1589_v34 = vsub.f32 %v380_v12, %v405_v32  ;;  %v1591_v35 = vsub.f32 %v381_v13, %v405_v32  ;;  %v1593_v36 = vsub.f32 %v382_v14, %v405_v32  ;;  %v1048_v2 = vpop.eup %1047 }
  0xa5   : > { %v474_v3 = vsel %vm454_vm5, %v1046_v1, 0.0  ;;  %v1050_v4 = vpop.eup %1049  ;;  %v475_v5 = vsel %vm454_vm5, %v1048_v2, 0.0  ;;  %v1638_v11 = vmul.f32 %v1044_v0, %v1567_v20  ;;  %v1641_v13 = vmul.f32 %v1044_v0, %v1572_v22  ;;  %413 = vst.msk [vmem:[%s1648_s21 + $0x18] sm:$0xff] %vm371_vm0, %v1660_v15 }
  0xa6   : > { %v416_v37 = vsel %vm415_vm1, %v1587_v33, 0.0  ;;  %v418_v38 = vsel %vm417_vm2, %v1589_v34, 0.0  ;;  %v420_v39 = vsel %vm419_vm3, %v1591_v35, 0.0  ;;  %v422_v40 = vsel %vm421_vm4, %v1593_v36, 0.0  ;;  %531 = vrot.lane.b32.xlu1 %v1589_v34, %s1283_s15  ;;  %v1052_v6 = vpop.eup %1051 }
  0xa7   : > { %v423_v41 = vadd.f32 %v418_v38, %v416_v37  ;;  %v424_v42 = vadd.f32 %v422_v40, %v420_v39  ;;  %v476_v7 = vadd.f32 %v475_v5, %v474_v3  ;;  %v477_v8 = vsel %vm454_vm5, %v1050_v4, 0.0  ;;  %411 = vst.msk [vmem:[%s1648_s21 + $0x8] sm:$0xff] %vm371_vm0, %v1638_v11  ;;  %412 = vst.msk [vmem:[%s1648_s21 + $0x10] sm:$0xff] %vm371_vm0, %v1641_v13 }
  0xa8   : > { %v479_v9 = vsel %vm454_vm5, %v1052_v6, 0.0  ;;  %v1644_v14 = vmul.f32 %v1044_v0, %v1565_v19  ;;  %v440_v17 = vmul.f32 %v1589_v34, %v1638_v11  ;;  %v441_v18 = vmul.f32 %v1591_v35, %v1641_v13 }
  0xa9   : > { %v425_v43 = vadd.f32 %v424_v42, %v423_v41  ;;  %v478_v10 = vadd.f32 %v477_v8, %v476_v7  ;;  %v442_v19 = vmul.f32 %v1593_v36, %v1660_v15  ;;  %v492_v32 = vrot.slane %v1589_v34, 1 }
  0xaa   : > { %541 = vrot.lane.b32.xlu1 %v1587_v33, %s1284_s11  ;;  %410 = vst.msk [vmem:[%s1648_s21] sm:$0xff] %vm371_vm0, %v1644_v14  ;;  %v439_v16 = vmul.f32 %v1587_v33, %v1644_v14  ;;  %v444_v22 = vsel %vm371_vm0, %v440_v17, 0.0  ;;  %v446_v24 = vsel %vm371_vm0, %v441_v18, 0.0  ;;  %v491_v37 = vrot.slane %v1587_v33, 1 }
  0xab   : > { %v426_v44 = vsel %vm371_vm0, %v425_v43, 0.0  ;;  %v480_v12 = vadd.f32 %v479_v9, %v478_v10  ;;  %v448_v25 = vsel %vm371_vm0, %v442_v19, 0.0  ;;  %v493_v38 = vrot.slane %v1591_v35, 1 }
  0xac   : > { %427 = vadd.xlane.f32.xlu0 %v426_v44  ;;  %v443_v20 = vsel %vm371_vm0, %v439_v16, 0.0  ;;  %v494_v39 = vrot.slane %v1593_v36, 1  ;;  %v559_v2 = vand.u32 127, %v504_v21 }
  0xad   : > { %1053 = vlog2.f32 %v480_v12  ;;  %v445_v23 = vadd.f32 %v444_v22, %v443_v20 }
  0xae   : > { %543 = vrot.lane.b32.xlu1 %v1589_v34, %s1284_s11  ;;  %vm560_vm8 = vcmp.lt.s32.totalorder %v559_v2, 15 }
  0xaf   : > { %v447_v26 = vadd.f32 %v446_v24, %v445_v23  ;;  %v593_v23 = vstv %s592_s3  ;;  %s1883_s3 = sld [smem:[#allocation21_spill]] (%p1882_p7) }
  0xb0   : > { %vm594_vm9 = vcmp.eq.s32.totalorder %v593_v23, 1 }
  0xb1   : > { %v1679_v28 = vadd.f32 %v448_v25, %v447_v26  ;;  %vm595_vm10 = vmor %vm506_vm6, %vm594_vm9  ;;  %v656_v27 = vld [vmem:[%s1648_s21] sm:$0xff] (%p1882_p7) }
  0xb2   : > { %533 = vrot.lane.b32.xlu1 %v1591_v35, %s1283_s15 }
  0xb5   : > { %s622_s6 = scalar_lea.vmem (%p1882_p7), %s1883_s3, %s907_s7 }
  0xb6   : > { %545 = vrot.lane.b32.xlu1 %v1591_v35, %s1284_s11  ;;  %657 = vst [vmem:[%s622_s6] sm:$0xff] (%p1882_p7), %v656_v27 }
  0xb7   : > { %v1054_v29 = vpop.eup %1053 }
  0xb8   : > { %v482_v30 = vmul.f32 0.6931472, %v1054_v29 }
  0xba   : > { %535 = vrot.lane.b32.xlu1 %v1593_v36, %s1283_s15  ;;  %v483_v40 = vsub.f32 %v1616_v56, %v482_v30  ;;  %v484_v41 = vsub.f32 %v1618_v57, %v482_v30  ;;  %v485_v42 = vsub.f32 %v1620_v58, %v482_v30  ;;  %v486_v43 = vsub.f32 %v465_v61, %v482_v30 }
  0xbc   : > { %v512_v44 = vrot.slane %v483_v40, %v511_v31  ;;  %v516_v45 = vrot.slane %v484_v41, %v511_v31  ;;  %v520_v46 = vrot.slane %v485_v42, %v511_v31  ;;  %v524_v47 = vrot.slane %v486_v43, %v511_v31  ;;  %v660_v43 = vld [vmem:[%s1648_s21 + $0x10] sm:$0xff] (%p1882_p7) }
  0xbd   : > { %661 = vst [vmem:[%s622_s6 + $0x20] sm:$0xff] (%p1882_p7), %v660_v43 }
  0xbe   : > { %547 = vrot.lane.b32.xlu1 %v1593_v36, %s1284_s11  ;;  %v525_v34 = vsel %vm506_vm6, %v491_v37, %v512_v44  ;;  %v527_v35 = vsel %vm506_vm6, %v493_v38, %v520_v46  ;;  %v528_v36 = vsel %vm506_vm6, %v494_v39, %v524_v47  ;;  %v662_v44 = vld [vmem:[%s1648_s21 + $0x18] sm:$0xff] (%p1882_p7) }
  0xbf   : > { %v567_v49 = vmul.f32 %v525_v34, %v1644_v14  ;;  %v569_v50 = vmul.f32 %v527_v35, %v1641_v13  ;;  %v570_v51 = vmul.f32 %v528_v36, %v1660_v15  ;;  %663 = vst [vmem:[%s622_s6 + $0x30] sm:$0xff] (%p1882_p7), %v662_v44 }
  0xc1   : > { %v571_v52 = vsel %vm371_vm0, %v567_v49, 0.0  ;;  %v574_v54 = vsel %vm371_vm0, %v569_v50, 0.0  ;;  %v576_v56 = vsel %vm371_vm0, %v570_v51, 0.0 }
  0xc2   : > { %529 = vrot.lane.b32.xlu0 %v1587_v33, %s1283_s15  ;;  %v526_v33 = vsel %vm506_vm6, %v492_v32, %v516_v45 }
  0xc3   : > { %v568_v48 = vmul.f32 %v526_v33, %v1638_v11 }
  0xc5   : > { %v572_v53 = vsel %vm371_vm0, %v568_v48, 0.0 }
  0xc6   : > { %v573_v55 = vadd.f32 %v572_v53, %v571_v52 }
  0xc8   : > { %v575_v57 = vadd.f32 %v574_v54, %v573_v55 }
  0xca   : > { %v577_v58 = vadd.f32 %v576_v56, %v575_v57 }
  0xcc   : > { %v578_v59 = vsub.f32 %v1679_v28, %v577_v58 }
  0xce   : > { %v598_v39 = vsel %vm595_vm10, %v578_v59, 0.0 }
 0x118   : > { %v532_v60 = vpop.permute.xlu1 %531 }
 0x11c   : > { %v542_v61 = vpop.permute.xlu1 %541 }
 0x120   : > { %v544_v62 = vpop.permute.xlu1 %543 }
 0x121   : > { %v555_v3 = vsel %vm553_vm7, %v532_v60, %v544_v62 }
 0x122   : > { %v564_v7 = vsel %vm560_vm8, %v555_v3, 0.0 }
 0x123   : > { %v580_v16 = vmul.f32 %v564_v7, %v1638_v11 }
 0x124   : > { %v534_v63 = vpop.permute.xlu1 %533 }
 0x125   : > { %v584_v25 = vsel %vm371_vm0, %v580_v16, 0.0 }
 0x128   : > { %v546_v0 = vpop.permute.xlu1 %545 }
 0x129   : > { %v556_v5 = vsel %vm553_vm7, %v534_v63, %v546_v0 }
 0x12a   : > { %v565_v10 = vsel %vm560_vm8, %v556_v5, 0.0 }
 0x12b   : > { %v581_v20 = vmul.f32 %v565_v10, %v1641_v13 }
 0x12c   : > { %v536_v1 = vpop.permute.xlu1 %535 }
 0x12d   : > { %v586_v30 = vsel %vm371_vm0, %v581_v20, 0.0 }
 0x130   : > { %v548_v4 = vpop.permute.xlu1 %547 }
 0x131   : > { %v557_v9 = vsel %vm553_vm7, %v536_v1, %v548_v4 }
 0x132   : > { %v566_v18 = vsel %vm560_vm8, %v557_v9, 0.0 }
 0x133   : > { %v582_v29 = vmul.f32 %v566_v18, %v1660_v15 }
 0x135   : > { %v588_v37 = vsel %vm371_vm0, %v582_v29, 0.0 }
 0x139   : > { %v428_v6 = vpop.xlane.xlu0 %427 }
 0x13a   : > { %v429_v8 = vrot.slane %v428_v6, 4 }
 0x13c   : > { %v430_v12 = vadd.f32 %v429_v8, %v428_v6 }
 0x13d   : > { %v530_v17 = vpop.permute.xlu0 %529 }
 0x13e   : > { %v431_v19 = vrot.slane %v430_v12, 2  ;;  %v554_v21 = vsel %vm553_vm7, %v530_v17, %v542_v61 }
 0x13f   : > { %v563_v22 = vsel %vm560_vm8, %v554_v21, 0.0 }
 0x140   : > { %v432_v24 = vadd.f32 %v431_v19, %v430_v12  ;;  %v579_v26 = vmul.f32 %v563_v22, %v1644_v14 }
 0x142   : > { %v433_v11 = vrot.slane %v432_v24, 1  ;;  %v583_v31 = vsel %vm371_vm0, %v579_v26, 0.0 }
 0x143   : > { %v585_v32 = vadd.f32 %v584_v25, %v583_v31 }
 0x144   : > { %v434_v13 = vadd.f32 %v433_v11, %v432_v24 }
 0x145   : > { %v587_v38 = vadd.f32 %v586_v30, %v585_v32 }
 0x146   : > { %914 = vpush %v434_v13 }
 0x147   : > { %v589_v14 = vadd.f32 %v588_v37, %v587_v38 }
 0x149   : > { %v590_v15 = vsub.f32 %v1679_v28, %v589_v14  ;;  %v658_v28 = vld [vmem:[%s1648_s21 + $0x8] sm:$0xff] (%p1882_p7) }
 0x14a   : > { %659 = vst [vmem:[%s622_s6 + $0x10] sm:$0xff] (%p1882_p7), %v658_v28 }
 0x14b   : > { %v599_v40 = vsel %vm560_vm8, %v590_v15, 0.0 }
 0x14c   : > { %v600_v41 = vadd.f32 %v599_v40, %v598_v39 }
 0x14e   : > { %601 = vst.msk [vmem:[%s348_s10] sm:$0xff] %vm371_vm0, %v600_v41 }
 0x175   : > { %618 = sbr.rel (!%p1882_p7) target bundleno = 380 (0x17c), region = 44 }
 0x177   : > { %s915_s9 = spop %914 }
 0x178   : > { %s436_s12 = ssub.f32 0.0, %s915_s9 }
 0x17a   : > { %v437_v42 = vstv %s436_s12 }
 0x17b   : > { %438 = vst [vmem:[%s1730_s8] sm:$0xff] %v437_v42 }
 0x17c PF: > { %s1884_s9 = sld [smem:[#allocation18_spill]]  ;;  %s908_s12 = sshll.u32 %s1264_s25, 1 }
 0x17d   : > { %s678_s5 = sshll.u32 %s348_s10, 4  ;;  %s674_s17 = sadd.s32 %s1260_s24, %s908_s12  ;;  %s1748_s5 = int_to_ptr.vmem [resolvable:$true] %s678_s5 }
 0x17e   : > { %s909_s21 = sshll.u32 %s674_s17, 7  ;;  %s693_s13 = sshll.u32 %s1730_s8, 4  ;;  %s694_s13 = int_to_ptr.vmem [resolvable:$true] %s693_s13 }
 0x17f   : > { %s1885_s11 = sld [smem:[#allocation22_spill]]  ;;  %s1886_s14 = sld [smem:[#allocation23_spill]] }
 0x180   : > { %s1115_s1 = scalar_lea.vmem %s1748_s5, 128  ;;  %s1285_s24 = smov [#allocation8]  }
 0x181   : > { %p1116_p11 = scmp.ne.s32.totalorder %s1748_s5, %s1115_s1  ;;  %s1119_s25 = sshll.u32 %s1285_s24, 4  ;;  %s1120_s25 = int_to_ptr.vmem [resolvable:$false] %s1119_s25 }
 0x182   : > { %p1887_p0 = scmp.ne.s32.totalorder %s1884_s9, 0  ;;  %s1121_s10 = scalar_lea.vmem %s1120_s25, 256 }
 0x183   : > { %p1122_p13 = scmp.lt.s32.totalorder %s1748_s5, %s1120_s25  ;;  %p1123_p8 = scmp.lt.s32.totalorder %s1121_s10, %s1115_s1 }
 0x184   : > { %p1117_p5 = pnand %p1116_p11, %p1887_p0 }
 0x185   : > { %s676_s3 = scalar_lea.hbm %s1885_s11, %s909_s21  ;;  %s1757_s0 = scalar_lea.hbm %s1886_s14, %s909_s21 }
 0x186   : > { %p1118_p3 = pneg %p1117_p5  ;;  %p1124_p12 = por %p1123_p8, %p1122_p13 }
 0x188   : > { %p1125_p4 = pnand %p1124_p12, %p1118_p3 }
 0x18a   : > { %1128 = shalt.err (!%p1125_p4)
}
 0x18b   : > { %s1129_s12 = scalar_lea.hbm %s676_s3, 128  ;;  %s1133_s21 = scalar_lea.hbm %s1885_s11, 512 }
 0x18c   : > { %p1130_p1 = scmp.ne.s32.totalorder %s676_s3, %s1129_s12  ;;  %p1134_p10 = scmp.lt.u32.totalorder %s676_s3, %s1885_s11 }
 0x18d   : > { %p1135_p2 = scmp.lt.u32.totalorder %s1133_s21, %s1129_s12  ;;  %p1137_p11 = scmp.lt.u32.totalorder %s1129_s12, %s676_s3 }
 0x18e   : > { %p1131_p9 = pnand %p1130_p1, %p1887_p0 }
 0x18f   : > { %p1136_p7 = por %p1135_p2, %p1134_p10 }
 0x190   : > { %p1132_p6 = pneg %p1131_p9 }
 0x191   : > { %p1138_p5 = por %p1137_p11, %p1136_p7 }
 0x193   : > { %p1139_p3 = pnand %p1138_p5, %p1132_p6 }
 0x195   : > { %1142 = shalt.err (!%p1139_p3)
}
 0x196   : > { %s1888_s1 = scalar_lea.sflag [#allocation4], %s1543_s30  ;;  %s1143_s6 = scalar_lea.vmem %s694_s13, 128 }
 0x197   : > { %920 = dma.vmem_to_hbm [thread:$0]  (%p1887_p0), %s1748_s5, 128, %s676_s3, %s1888_s1  }
 0x198   : > { %p1144_p13 = scmp.ne.s32.totalorder %s694_s13, %s1143_s6  ;;  %s1286_s24 = smov [#allocation9]  }
 0x199   : > { %s1147_s25 = sshll.u32 %s1286_s24, 4  ;;  %s1148_s25 = int_to_ptr.vmem [resolvable:$false] %s1147_s25 }
 0x19a   : > { %p1145_p8 = pnand %p1144_p13, %p1887_p0  ;;  %s1149_s10 = scalar_lea.vmem %s1148_s25, 256 }
 0x19b   : > { %p1150_p4 = scmp.lt.s32.totalorder %s694_s13, %s1148_s25  ;;  %p1151_p1 = scmp.lt.s32.totalorder %s1149_s10, %s1143_s6 }
 0x19c   : > { %p1146_p12 = pneg %p1145_p8 }
 0x19d   : > { %p1152_p9 = por %p1151_p1, %p1150_p4 }
 0x19f   : > { %p1153_p6 = pnand %p1152_p9, %p1146_p12 }
 0x1a1   : > { %1156 = shalt.err (!%p1153_p6)
}
 0x1a2   : > { %s1157_s8 = scalar_lea.hbm %s1757_s0, 128  ;;  %s1161_s12 = scalar_lea.hbm %s1886_s14, 512 }
 0x1a3   : > { %p1158_p10 = scmp.ne.s32.totalorder %s1757_s0, %s1157_s8  ;;  %p1162_p11 = scmp.lt.u32.totalorder %s1757_s0, %s1886_s14 }
 0x1a4   : > { %p1163_p5 = scmp.lt.u32.totalorder %s1161_s12, %s1157_s8  ;;  %p1165_p13 = scmp.lt.u32.totalorder %s1157_s8, %s1757_s0 }
 0x1a5   : > { %p1159_p2 = pnand %p1158_p10, %p1887_p0 }
 0x1a6   : > { %p1164_p3 = por %p1163_p5, %p1162_p11 }
 0x1a7   : > { %p1160_p7 = pneg %p1159_p2 }
 0x1a8   : > { %p1166_p8 = por %p1165_p13, %p1164_p3 }
 0x1aa   : > { %p1167_p12 = pnand %p1166_p8, %p1160_p7 }
 0x1ac   : > { %1170 = shalt.err (!%p1167_p12)
}
 0x1ad   : > { %s1889_s21 = scalar_lea.sflag [#allocation10], %s1543_s30 }
 0x1ae   : > { %921 = dma.vmem_to_hbm [thread:$0]  (%p1887_p0), %s694_s13, 128, %s1757_s0, %s1889_s21  }
 0x1af PF: > { %s1890_s7 = sld [smem:[#allocation15_spill]]  ;;  %p939_p4 = scmp.ge.s32.totalorder %s1276_s28, 2 }
 0x1b0   : > { %p1891_p1 = scmp.ne.s32.totalorder %s1868_s16, 0 }
 0x1b2   : > { %p932_p9 = pnand %p939_p4, %p1891_p1 }
 0x1b5   : > { %s712_s15 = sand.u32 1, %s1890_s7  }
 0x1b6   : > { %s713_s1 = scalar_lea.sflag [#allocation4], %s712_s15 }
 0x1b7   : > { %1224 = dma.done.wait (!%p932_p9), %s713_s1, 128  }
 0x1b8   : > { %1226 = vsyncadd (!%p932_p9), %s713_s1, 4294967168  ;;  %s722_s6 = scalar_lea.sflag [#allocation10], %s712_s15 }
 0x1b9   : > { %1228 = dma.done.wait (!%p932_p9), %s722_s6, 128  }
 0x1ba   : > { %1230 = vsyncadd (!%p932_p9), %s722_s6, 4294967168  ;;  %s28_s28 = sadd.s32 1, %s1276_s28   ;;  %s1892_s0 = sld [smem:[#allocation16_spill]] }
 0x1bb   : > { %p25_p6 = scmp.ge.s32.totalorder %s28_s28, 6   ;;  %s1893_s16 = sld [smem:[#allocation17_spill]] }
 0x1bc   : > { %s1894_s18 = smov %s1240_s19  ;;  %s1895_s19 = smov %s1244_s20 }
 0x1bd   : > { %s1896_s20 = smov %s1493_s4  ;;  %s1897_s21 = smov %s1252_s22 }
 0x1be   : > { %s1898_s22 = smov %s1256_s23  ;;  %s1899_s23 = smov %s1421_s29 }
 0x1bf   : > { %s1900_s24 = smov %s1268_s26  ;;  %s1901_s25 = smov %s1272_s27 }
 0x1c0   : > { %s1902_s26 = smov %s1892_s0  ;;  %27 = sbr.rel (!%p25_p6) target bundleno = 19 (0x13), region = 160 }
 0x1c1   : > { %s1903_s27 = smov %s1893_s16 }
 0x1c7   :  { %727 = vsyncpa [#allocation3], 1 }
 0x1c8   :  { %729 = vsyncpa [#allocation3 + $0x1], 1 }
 0x1c9   :  { %730 = vsyncpa [#allocation6], 1 }
 0x1ca   :  { %732 = vsyncpa [#allocation6 + $0x1], 1 }
 0x1cb   :  { %733 = vsyncpa [#allocation4], 1 }
 0x1cc   :  { %735 = vsyncpa [#allocation4 + $0x1], 1 }
 0x1cd   :  { %736 = vsyncpa [#allocation10], 1 }
 0x1ce   :  { %738 = vsyncpa [#allocation10 + $0x1], 1 }

// kernel: abl_ce_iou_loss.4
= control target key start
LH: loop header
LB: loop body
LE: loop exit
PB: predicated region body
PF: predicated region fallthrough
CT: control target
= control target key end

     0   :  { %s727_s6 = smov 0   ;;  %s897_s0 = inlined_call_operand.vmem [shape: s32[2,16,16], index: 0, kind: input, shape index: {}]   ;;  %s898_s1 = inlined_call_operand.vmem [shape: f32[2,16,16], index: 1, kind: output, shape index: {}]  }
   0x1 LB: > { %s603_s7 = sadd.s32 4294967295, %s688_s6   ;;  %p607_p0 = scmp.ge.s32.totalorder %s688_s6, 1  ;;  %s688_s6 = sphi %s727_s6, %s11_s6  }
   0x2   : > { %p87_p1 = scmp.lt.s32.totalorder %s688_s6, 3 }
   0x4   : > { %p88_p2 = pnand %p607_p0, %p87_p1 }
   0x5   : > { %p107_p3 = scmp.lt.s32.totalorder (!%p88_p2), %s603_s7, 1  ;;  %v119_v0 = vlaneseq (!%p88_p2)  ;;  %s702_s15 = smov (!%p88_p2), 15   ;;  %vm124_vm0 = vcmask (!%p88_p2), 1046528   ;;  %vm145_vm2 = vcmask (!%p88_p2), 121856   ;;  %v704_v23 = vmov (!%p88_p2), 1e+09  }
   0x6   : > { %91 = sbr.rel (%p88_p2) target bundleno = 710 (0x2c6), region = 24  ;;  %s703_s16 = smov (!%p88_p2), 127  }
   0x7   : > { %v735_v1 = vshrl.u32 (!%p88_p2), %v119_v0, 7  ;;  %v755_v10 = vand.u32 (!%p88_p2), 127, %v119_v0  ;;  %s705_s17 = smov (!%p88_p2), 113   ;;  %s706_s18 = smov (!%p88_p2), 1  }
   0x8   : > { %s707_s19 = smov (!%p88_p2), 114   ;;  %s708_s20 = smov (!%p88_p2), 2  }
   0x9   : > { %v121_v2 = vadd.s32 (!%p88_p2), 8, %v735_v1  ;;  %v739_v3 = vcvt.s32.f32 (!%p88_p2), %v735_v1  ;;  %vm148_vm3 = vcmp.lt.s32.totalorder (!%p88_p2), %v755_v10, 15  ;;  %s709_s21 = smov (!%p88_p2), 126   ;;  %s710_s22 = smov (!%p88_p2), 14  }
   0xa   : > { %s711_s23 = smov (!%p88_p2), 116   ;;  %s712_s24 = smov (!%p88_p2), 4  }
   0xb   : > { %v749_v5 = vcvt.s32.f32 (!%p88_p2), %v121_v2  ;;  %vm130_vm1 = vcmp.lt.s32.totalorder (!%p88_p2), %v121_v2, 15  ;;  %s713_s25 = smov (!%p88_p2), 124   ;;  %s714_s26 = smov (!%p88_p2), 12  }
   0xc   : > { %s715_s27 = smov (!%p88_p2), 120   ;;  %s716_s28 = smov (!%p88_p2), 8  }
   0xd   : > { %s908_s7 = smov (!%p107_p3, %s603_s7), 1  ;;  %s815_s29 = smov 0  }
   0xe   : > { %s617_s8 = sshll.u32 %s908_s7, 4 }
   0xf   : > { %s111_s11 = scalar_lea.vmem %s897_s0, %s617_s8  ;;  %s747_s14 = scalar_lea.vmem %s898_s1, %s617_s8 }
  0x10   : > { %v117_v4 = vld [vmem:[%s111_s11] sm:$0xff]  ;;  %v118_v6 = vld [vmem:[%s111_s11 + $0x8] sm:$0xff] }
  0x11   : > { %141 = vrot.lane.b32.xlu1 %v117_v4, %s702_s15  ;;  %137 = vrot.lane.b32.xlu0 %v117_v4, %s703_s16  ;;  %v126_v7 = vrot.slane %v118_v6, 1  ;;  %v125_v8 = vrot.slane %v117_v4, 1  ;;  %vm163_vm7 = vcmp.eq.s32.totalorder %v117_v4, 255  ;;  %vm164_vm12 = vcmp.eq.s32.totalorder %v118_v6, 255 }
  0x13   : > { %v128_v9 = vsel %vm124_vm0, %v126_v7, %v125_v8  ;;  %v127_v12 = vsel %vm124_vm0, %v125_v8, %v126_v7 }
  0x14   : > { %v136_v11 = vsel %vm130_vm1, %v128_v9, 0  ;;  %vm153_vm5 = vcmp.ne.s32.totalorder %v127_v12, %v117_v4 }
  0x15   : > { %143 = vrot.lane.b32.xlu1 %v118_v6, %s702_s15  ;;  %139 = vrot.lane.b32.xlu0 %v118_v6, %s703_s16  ;;  %vm154_vm4 = vcmp.ne.s32.totalorder %v136_v11, %v118_v6 }
  0x16   : > { %vm763_vm8 = vmand %vm154_vm4, %vm130_vm1  ;;  %vm183_vm1 = vcmask 7168   ;;  %vm186_vm4 = vcmp.ge.s32.totalorder %v755_v10, 1 }
  0x83   : > { %v142_v13 = vpop.permute.xlu1 %141  ;;  %v138_v14 = vpop.permute.xlu0 %137 }
  0x84   : > { %v146_v15 = vsel %vm145_vm2, %v138_v14, %v142_v13 }
  0x85   : > { %v151_v16 = vsel %vm148_vm3, %v146_v15, 0 }
  0x86   : > { %vm157_vm6 = vcmp.ne.s32.totalorder %v151_v16, %v117_v4 }
  0x87   : > { %vm159_vm9 = vmand %vm157_vm6, %vm148_vm3  ;;  %v144_v18 = vpop.permute.xlu1 %143  ;;  %v140_v19 = vpop.permute.xlu0 %139  ;;  %vm232_vm6 = vcmp.ge.s32.totalorder %v755_v10, 2 }
  0x88   : > { %vm161_vm10 = vmor %vm153_vm5, %vm159_vm9  ;;  %v147_v20 = vsel %vm145_vm2, %v140_v19, %v144_v18  ;;  %vm229_vm5 = vcmask 15360   ;;  %vm307_vm9 = vcmask 97280  }
  0x89   : > { %vm770_vm11 = vmor %vm161_vm10, %vm163_vm7  ;;  %v152_v22 = vsel %vm148_vm3, %v147_v20, 0  ;;  %vm281_vm7 = vcmask 31744   ;;  %vm310_vm10 = vcmp.lt.s32.totalorder %v755_v10, 12 }
  0x8a   : > { %v167_v24 = vsel %vm770_vm11, 0.0, %v704_v23  ;;  %vm158_vm13 = vcmp.ne.s32.totalorder %v152_v22, %v118_v6 }
  0x8b   : > { %vm160_vm14 = vmand %vm158_vm13, %vm148_vm3  ;;  %171 = vrot.lane.b32.xlu0 %v167_v24, %s705_s17  ;;  %vm336_vm13 = vcmp.ge.s32.totalorder %v755_v10, 8 }
  0x8c   : > { %vm162_vm15 = vmor %vm763_vm8, %vm160_vm14  ;;  %vm284_vm8 = vcmp.ge.s32.totalorder %v755_v10, 4  ;;  %vm361_vm14 = vcmp.lt.s32.totalorder %v755_v10, 8 }
  0x8d   : > { %vm782_vm0 = vmor %vm162_vm15, %vm164_vm12  ;;  %vm333_vm12 = vcmask 64512   ;;  %vm376_vm15 = vcmask 130048  }
  0x8e   : > { %v168_v26 = vsel %vm782_vm0, 0.0, %v704_v23 }
  0x8f   : > { %173 = vrot.lane.b32.xlu1 %v168_v26, %s705_s17  ;;  %177 = vrot.lane.b32.xlu0 %v167_v24, %s706_s18 }
  0x93   : > { %179 = vrot.lane.b32.xlu1 %v168_v26, %s706_s18  ;;  %195 = vrot.lane.b32.xlu0 %v167_v24, %s703_s16 }
  0x97   : > { %197 = vrot.lane.b32.xlu1 %v168_v26, %s703_s16  ;;  %201 = vrot.lane.b32.xlu0 %v167_v24, %s702_s15 }
  0x9b   : > { %203 = vrot.lane.b32.xlu1 %v168_v26, %s702_s15 }
  0xfd   : > { %v172_v27 = vpop.permute.xlu0 %171 }
 0x101   : > { %v174_v28 = vpop.permute.xlu1 %173  ;;  %v178_v29 = vpop.permute.xlu0 %177 }
 0x102   : > { %v184_v30 = vsel %vm183_vm1, %v172_v27, %v178_v29 }
 0x103   : > { %v189_v31 = vsel %vm186_vm4, %v184_v30, 1e+09 }
 0x104   : > { %v191_v32 = vadd.f32 1.0, %v189_v31 }
 0x105   : > { %v180_v33 = vpop.permute.xlu1 %179  ;;  %v196_v34 = vpop.permute.xlu0 %195 }
 0x106   : > { %v185_v35 = vsel %vm183_vm1, %v174_v28, %v180_v33  ;;  %v193_v36 = vmin.f32 %v167_v24, %v191_v32 }
 0x107   : > { %v190_v37 = vsel %vm186_vm4, %v185_v35, 1e+09 }
 0x108   : > { %v192_v38 = vadd.f32 1.0, %v190_v37  ;;  %217 = vrot.lane.b32.xlu0 %v193_v36, %s707_s19 }
 0x109   : > { %v198_v39 = vpop.permute.xlu1 %197  ;;  %v202_v40 = vpop.permute.xlu0 %201 }
 0x10a   : > { %v207_v41 = vsel %vm145_vm2, %v196_v34, %v202_v40  ;;  %v194_v42 = vmin.f32 %v168_v26, %v192_v38 }
 0x10b   : > { %v209_v43 = vsel %vm148_vm3, %v207_v41, 1e+09 }
 0x10c   : > { %v211_v44 = vadd.f32 1.0, %v209_v43  ;;  %219 = vrot.lane.b32.xlu1 %v194_v42, %s707_s19  ;;  %223 = vrot.lane.b32.xlu0 %v193_v36, %s708_s20 }
 0x10d   : > { %v204_v45 = vpop.permute.xlu1 %203 }
 0x10e   : > { %v208_v46 = vsel %vm145_vm2, %v198_v39, %v204_v45  ;;  %v213_v47 = vmin.f32 %v167_v24, %v211_v44  ;;  %vm255_vm2 = vcmask 113664  }
 0x10f   : > { %v210_v48 = vsel %vm148_vm3, %v208_v46, 1e+09  ;;  %vm258_vm3 = vcmp.lt.s32.totalorder %v755_v10, 14 }
 0x110   : > { %v212_v49 = vadd.f32 1.0, %v210_v48  ;;  %225 = vrot.lane.b32.xlu1 %v194_v42, %s708_s20  ;;  %243 = vrot.lane.b32.xlu0 %v213_v47, %s709_s21 }
 0x112   : > { %v214_v50 = vmin.f32 %v168_v26, %v212_v49 }
 0x114   : > { %245 = vrot.lane.b32.xlu1 %v214_v50, %s709_s21  ;;  %249 = vrot.lane.b32.xlu0 %v213_v47, %s710_s22 }
 0x118   : > { %251 = vrot.lane.b32.xlu1 %v214_v50, %s710_s22 }
 0x17a   : > { %v218_v51 = vpop.permute.xlu0 %217 }
 0x17e   : > { %v220_v52 = vpop.permute.xlu1 %219  ;;  %v224_v53 = vpop.permute.xlu0 %223 }
 0x17f   : > { %v230_v54 = vsel %vm229_vm5, %v218_v51, %v224_v53 }
 0x180   : > { %v235_v55 = vsel %vm232_vm6, %v230_v54, 1e+09 }
 0x181   : > { %v237_v56 = vadd.f32 2.0, %v235_v55 }
 0x182   : > { %v226_v57 = vpop.permute.xlu1 %225  ;;  %v244_v58 = vpop.permute.xlu0 %243 }
 0x183   : > { %v231_v59 = vsel %vm229_vm5, %v220_v52, %v226_v57  ;;  %v239_v60 = vmin.f32 %v193_v36, %v237_v56 }
 0x184   : > { %v236_v61 = vsel %vm232_vm6, %v231_v59, 1e+09 }
 0x185   : > { %v238_v62 = vadd.f32 2.0, %v236_v61  ;;  %269 = vrot.lane.b32.xlu0 %v239_v60, %s711_s23 }
 0x186   : > { %v246_v63 = vpop.permute.xlu1 %245  ;;  %v250_v0 = vpop.permute.xlu0 %249 }
 0x187   : > { %v256_v2 = vsel %vm255_vm2, %v244_v58, %v250_v0  ;;  %v240_v4 = vmin.f32 %v194_v42, %v238_v62 }
 0x188   : > { %v261_v6 = vsel %vm258_vm3, %v256_v2, 1e+09 }
 0x189   : > { %v263_v7 = vadd.f32 2.0, %v261_v6  ;;  %271 = vrot.lane.b32.xlu1 %v240_v4, %s711_s23  ;;  %275 = vrot.lane.b32.xlu0 %v239_v60, %s712_s24 }
 0x18a   : > { %v252_v8 = vpop.permute.xlu1 %251 }
 0x18b   : > { %v257_v9 = vsel %vm255_vm2, %v246_v63, %v252_v8  ;;  %v265_v11 = vmin.f32 %v213_v47, %v263_v7 }
 0x18c   : > { %v262_v12 = vsel %vm258_vm3, %v257_v9, 1e+09  ;;  %v811_v9 = vmov 1e+09  }
 0x18d   : > { %v264_v13 = vadd.f32 2.0, %v262_v12  ;;  %277 = vrot.lane.b32.xlu1 %v240_v4, %s712_s24  ;;  %295 = vrot.lane.b32.xlu0 %v265_v11, %s713_s25 }
 0x18f   : > { %v266_v14 = vmin.f32 %v214_v50, %v264_v13 }
 0x191   : > { %297 = vrot.lane.b32.xlu1 %v266_v14, %s713_s25  ;;  %301 = vrot.lane.b32.xlu0 %v265_v11, %s714_s26 }
 0x195   : > { %303 = vrot.lane.b32.xlu1 %v266_v14, %s714_s26 }
 0x1f7   : > { %v270_v15 = vpop.permute.xlu0 %269 }
 0x1fb   : > { %v272_v16 = vpop.permute.xlu1 %271  ;;  %v276_v17 = vpop.permute.xlu0 %275 }
 0x1fc   : > { %v282_v18 = vsel %vm281_vm7, %v270_v15, %v276_v17 }
 0x1fd   : > { %v287_v19 = vsel %vm284_vm8, %v282_v18, 1e+09 }
 0x1fe   : > { %v289_v20 = vadd.f32 4.0, %v287_v19 }
 0x1ff   : > { %v278_v22 = vpop.permute.xlu1 %277  ;;  %v296_v23 = vpop.permute.xlu0 %295 }
 0x200   : > { %v283_v24 = vsel %vm281_vm7, %v272_v16, %v278_v22  ;;  %v291_v26 = vmin.f32 %v239_v60, %v289_v20 }
 0x201   : > { %v288_v27 = vsel %vm284_vm8, %v283_v24, 1e+09 }
 0x202   : > { %v290_v28 = vadd.f32 4.0, %v288_v27  ;;  %321 = vrot.lane.b32.xlu0 %v291_v26, %s715_s27 }
 0x203   : > { %v298_v29 = vpop.permute.xlu1 %297  ;;  %v302_v30 = vpop.permute.xlu0 %301 }
 0x204   : > { %v308_v31 = vsel %vm307_vm9, %v296_v23, %v302_v30  ;;  %v292_v32 = vmin.f32 %v240_v4, %v290_v28 }
 0x205   : > { %v313_v33 = vsel %vm310_vm10, %v308_v31, 1e+09 }
 0x206   : > { %v315_v34 = vadd.f32 4.0, %v313_v33  ;;  %323 = vrot.lane.b32.xlu1 %v292_v32, %s715_s27  ;;  %327 = vrot.lane.b32.xlu0 %v291_v26, %s716_s28 }
 0x207   : > { %v304_v35 = vpop.permute.xlu1 %303 }
 0x208   : > { %v309_v36 = vsel %vm307_vm9, %v298_v29, %v304_v35  ;;  %v317_v37 = vmin.f32 %v265_v11, %v315_v34  ;;  %v813_v11 = vmov 1e+09  }
 0x209   : > { %v314_v38 = vsel %vm310_vm10, %v309_v36, 1e+09 }
 0x20a   : > { %v316_v39 = vadd.f32 4.0, %v314_v38  ;;  %329 = vrot.lane.b32.xlu1 %v292_v32, %s716_s28  ;;  %347 = vrot.lane.b32.xlu0 %v317_v37, %s715_s27 }
 0x20c   : > { %v318_v40 = vmin.f32 %v266_v14, %v316_v39 }
 0x20e   : > { %349 = vrot.lane.b32.xlu1 %v318_v40, %s715_s27  ;;  %353 = vrot.lane.b32.xlu0 %v317_v37, %s716_s28 }
 0x212   : > { %355 = vrot.lane.b32.xlu1 %v318_v40, %s716_s28 }
 0x274   : > { %v322_v41 = vpop.permute.xlu0 %321 }
 0x278   : > { %v324_v42 = vpop.permute.xlu1 %323  ;;  %v328_v43 = vpop.permute.xlu0 %327 }
 0x279   : > { %v334_v44 = vsel %vm333_vm12, %v322_v41, %v328_v43 }
 0x27a   : > { %v339_v47 = vsel %vm336_vm13, %v334_v44, 1e+09 }
 0x27b   : > { %v341_v51 = vadd.f32 8.0, %v339_v47 }
 0x27c   : > { %v330_v45 = vpop.permute.xlu1 %329  ;;  %v348_v46 = vpop.permute.xlu0 %347 }
 0x27d   : > { %v335_v48 = vsel %vm333_vm12, %v324_v42, %v330_v45  ;;  %v343_v57 = vmin.f32 %v291_v26, %v341_v51 }
 0x27e   : > { %v340_v53 = vsel %vm336_vm13, %v335_v48, 1e+09 }
 0x27f   : > { %v342_v58 = vadd.f32 8.0, %v340_v53 }
 0x280   : > { %v350_v49 = vpop.permute.xlu1 %349  ;;  %v354_v50 = vpop.permute.xlu0 %353 }
 0x281   : > { %v359_v52 = vsel %vm333_vm12, %v348_v46, %v354_v50  ;;  %v344_v0 = vmin.f32 %v292_v32, %v342_v58 }
 0x282   : > { %v364_v54 = vsel %vm361_vm14, %v359_v52, 1e+09 }
 0x283   : > { %v366_v55 = vadd.f32 8.0, %v364_v54 }
 0x284   : > { %v356_v56 = vpop.permute.xlu1 %355 }
 0x285   : > { %v368_v59 = vmin.f32 %v317_v37, %v366_v55  ;;  %v360_v60 = vsel %vm333_vm12, %v350_v49, %v356_v56 }
 0x286   : > { %v365_v61 = vsel %vm361_vm14, %v360_v60, 1e+09 }
 0x287   : > { %v370_v62 = vmin.f32 %v343_v57, %v368_v59  ;;  %v367_v63 = vadd.f32 8.0, %v365_v61 }
 0x289   : > { %v372_v2 = vmin.f32 %v370_v62, 10000.0  ;;  %v369_v10 = vmin.f32 %v318_v40, %v367_v63 }
 0x28b   : > { %v374_v4 = vmul.f32 %v372_v2, %v372_v2  ;;  %v371_v6 = vmin.f32 %v344_v0, %v369_v10 }
 0x28d   : > { %377 = vst.msk [vmem:[#allocation2] sm:$0xff] %vm376_vm15, %v374_v4  ;;  %v373_v7 = vmin.f32 %v371_v6, 10000.0 }
 0x28f   : > { %v375_v8 = vmul.f32 %v373_v7, %v373_v7 }
 0x291   : > { %378 = vst.msk [vmem:[#allocation2 + $0x8] sm:$0xff] %vm376_vm15, %v375_v8 }
 0x292 LB: >> { %v400_v12 = vsub.s32 0, %v735_v1  ;;  %v415_v13 = vsub.s32 1, %v735_v1  ;;  %v430_v14 = vsub.s32 2, %v735_v1  ;;  %s830_s30 = sshll.u32 %s700_s29, 3  ;;  %v445_v15 = vsub.s32 3, %v735_v1  ;;  %s386_s29 = sadd.s32 1, %s700_s29   ;;  %s700_s29 = sphi %s815_s29, %s386_s29   ;;  %v696_v11 = vphi %v813_v11, %v906_v11   ;;  %v692_v9 = vphi %v811_v9, %v905_v9  }
 0x293   : >> { %v460_v16 = vsub.s32 4, %v735_v1  ;;  %s392_s2 = scvt.s32.f32 %s830_s30  ;;  %v475_v17 = vsub.s32 5, %v735_v1  ;;  %v490_v18 = vsub.s32 6, %v735_v1  ;;  %s390_s3 = scalar_lea.vmem [#allocation2], %s830_s30  ;;  %v505_v20 = vsub.s32 7, %v735_v1 }
 0x294   : >> { %s406_s4 = sadd.s32 1, %s830_s30  ;;  %s421_s5 = sadd.s32 2, %s830_s30 }
 0x295   : >> { %v393_v22 = vstv %s392_s2  ;;  %s407_s7 = scvt.s32.f32 %s406_s4  ;;  %s422_s8 = scvt.s32.f32 %s421_s5 }
 0x296   : >> { %v394_v27 = vsub.f32 %v739_v3, %v393_v22  ;;  %v395_v28 = vsub.f32 %v749_v5, %v393_v22  ;;  %s436_s9 = sadd.s32 3, %s830_s30  ;;  %s451_s10 = sadd.s32 4, %s830_s30 }
 0x297   : >> { %v408_v31 = vstv %s407_s7  ;;  %v423_v32 = vstv %s422_s8  ;;  %s437_s11 = scvt.s32.f32 %s436_s9  ;;  %s852_s12 = scvt.s32.f32 %s451_s10 }
 0x298   : >> { %v838_v19 = vld [vmem:[%s390_s3] sm:$0xff]  ;;  %v396_v35 = vmul.f32 %v394_v27, %v394_v27  ;;  %v397_v36 = vmul.f32 %v395_v28, %v395_v28  ;;  %v409_v37 = vsub.f32 %v739_v3, %v408_v31  ;;  %v410_v38 = vsub.f32 %v749_v5, %v408_v31  ;;  %s466_s13 = sadd.s32 5, %s830_s30  ;;  %s481_s15 = sadd.s32 6, %s830_s30 }
 0x299   : >> { %v401_v23 = vrot.slane %v838_v19, %v400_v12  ;;  %v416_v24 = vrot.slane %v838_v19, %v415_v13  ;;  %v431_v26 = vrot.slane %v838_v19, %v430_v14  ;;  %v446_v29 = vrot.slane %v838_v19, %v445_v15  ;;  %s467_s16 = scvt.s32.f32 %s466_s13  ;;  %s482_s17 = scvt.s32.f32 %s481_s15 }
 0x29a   : >> { %v461_v30 = vrot.slane %v838_v19, %v460_v16  ;;  %v476_v33 = vrot.slane %v838_v19, %v475_v17  ;;  %v491_v34 = vrot.slane %v838_v19, %v490_v18  ;;  %v424_v39 = vsub.f32 %v739_v3, %v423_v32  ;;  %s496_s18 = sadd.s32 7, %s830_s30  ;;  %p383_p4 = scmp.ge.s32.totalorder %s386_s29, 2  }
 0x29b   : >> { %v425_v40 = vsub.f32 %v749_v5, %v423_v32  ;;  %v438_v41 = vstv %s437_s11  ;;  %v453_v42 = vstv %s852_s12  ;;  %v402_v43 = vadd.f32 %v401_v23, %v396_v35  ;;  %s497_s19 = scvt.s32.f32 %s496_s18 }
 0x29c   : >> { %v403_v44 = vadd.f32 %v401_v23, %v397_v36  ;;  %v411_v45 = vmul.f32 %v409_v37, %v409_v37  ;;  %v412_v46 = vmul.f32 %v410_v38, %v410_v38  ;;  %v426_v47 = vmul.f32 %v424_v39, %v424_v39 }
 0x29d   : >> { %v427_v48 = vmul.f32 %v425_v40, %v425_v40  ;;  %v439_v49 = vsub.f32 %v739_v3, %v438_v41  ;;  %v440_v50 = vsub.f32 %v749_v5, %v438_v41  ;;  %v404_v51 = vmin.f32 %v696_v11, %v402_v43 }
 0x29e   : >> { %v405_v52 = vmin.f32 %v692_v9, %v403_v44  ;;  %v417_v53 = vadd.f32 %v416_v24, %v411_v45  ;;  %v418_v54 = vadd.f32 %v416_v24, %v412_v46  ;;  %v432_v55 = vadd.f32 %v431_v26, %v426_v47 }
 0x29f   : >> { %v433_v56 = vadd.f32 %v431_v26, %v427_v48  ;;  %v441_v57 = vmul.f32 %v439_v49, %v439_v49  ;;  %v442_v58 = vmul.f32 %v440_v50, %v440_v50  ;;  %v454_v61 = vsub.f32 %v739_v3, %v453_v42 }
 0x2a0   : >> { %v419_v59 = vmin.f32 %v404_v51, %v417_v53  ;;  %v420_v60 = vmin.f32 %v405_v52, %v418_v54  ;;  %v455_v62 = vsub.f32 %v749_v5, %v453_v42  ;;  %v468_v2 = vstv %s467_s16 }
 0x2a1   : >> { %v447_v63 = vadd.f32 %v446_v29, %v441_v57  ;;  %v448_v0 = vadd.f32 %v446_v29, %v442_v58  ;;  %v483_v10 = vstv %s482_s17  ;;  %v456_v7 = vmul.f32 %v454_v61, %v454_v61 }
 0x2a2   : >> { %v434_v4 = vmin.f32 %v419_v59, %v432_v55  ;;  %v435_v6 = vmin.f32 %v420_v60, %v433_v56  ;;  %v457_v8 = vmul.f32 %v455_v62, %v455_v62  ;;  %v469_v9 = vsub.f32 %v739_v3, %v468_v2 }
 0x2a3   : >> { %v470_v11 = vsub.f32 %v749_v5, %v468_v2  ;;  %v484_v12 = vsub.f32 %v739_v3, %v483_v10  ;;  %v485_v13 = vsub.f32 %v749_v5, %v483_v10  ;;  %v462_v16 = vadd.f32 %v461_v30, %v456_v7 }
 0x2a4   : >> { %v449_v14 = vmin.f32 %v434_v4, %v447_v63  ;;  %v450_v15 = vmin.f32 %v435_v6, %v448_v0  ;;  %v463_v17 = vadd.f32 %v461_v30, %v457_v8  ;;  %v471_v18 = vmul.f32 %v469_v9, %v469_v9 }
 0x2a5   : >> { %v472_v22 = vmul.f32 %v470_v11, %v470_v11  ;;  %v486_v23 = vmul.f32 %v484_v12, %v484_v12  ;;  %v487_v24 = vmul.f32 %v485_v13, %v485_v13  ;;  %v498_v28 = vstv %s497_s19 }
 0x2a6   : >> { %v464_v26 = vmin.f32 %v449_v14, %v462_v16  ;;  %v465_v27 = vmin.f32 %v450_v15, %v463_v17  ;;  %v477_v29 = vadd.f32 %v476_v33, %v471_v18  ;;  %v499_v36 = vsub.f32 %v739_v3, %v498_v28 }
 0x2a7   : >> { %v478_v31 = vadd.f32 %v476_v33, %v472_v22  ;;  %v492_v32 = vadd.f32 %v491_v34, %v486_v23  ;;  %v493_v35 = vadd.f32 %v491_v34, %v487_v24  ;;  %v500_v37 = vsub.f32 %v749_v5, %v498_v28 }
 0x2a8   : >> { %v506_v38 = vrot.slane %v838_v19, %v505_v20  ;;  %v479_v30 = vmin.f32 %v464_v26, %v477_v29  ;;  %v501_v40 = vmul.f32 %v499_v36, %v499_v36 }
 0x2a9   : >> { %v480_v39 = vmin.f32 %v465_v27, %v478_v31  ;;  %v502_v41 = vmul.f32 %v500_v37, %v500_v37  ;;  %385 = sbr.rel (!%p383_p4) target bundleno = 658 (0x292), region = 62 }
 0x2aa   : >> { %v494_v42 = vmin.f32 %v479_v30, %v492_v32  ;;  %v507_v44 = vadd.f32 %v506_v38, %v501_v40 }
 0x2ab   : >> { %v495_v43 = vmin.f32 %v480_v39, %v493_v35  ;;  %v508_v45 = vadd.f32 %v506_v38, %v502_v41 }
 0x2ac   : >> { %v509_v46 = vmin.f32 %v494_v42, %v507_v44  }
 0x2ad   : >> { %v510_v33 = vmin.f32 %v495_v43, %v508_v45  }
 0x2ae   : >> { %v906_v11 = vmov %v509_v46  ;;  %666 = vrsqrt.f32 (%p383_p4), %v509_v46  ;;  %vm513_vm1 = vcmp.eq.f32.partialorder (%p383_p4), %v509_v46, inf  ;;  %v516_v20 = vand.u32 (%p383_p4), 2147483648, %v509_v46 }
 0x2af   : >> { %v905_v9 = vmov %v510_v33  ;;  %668 = vrsqrt.f32 (%p383_p4), %v510_v33  ;;  %vm515_vm4 = vcmp.eq.f32.partialorder (%p383_p4), %v509_v46, 0.0  ;;  %vm520_vm5 = vcmp.eq.f32.partialorder (%p383_p4), %v510_v33, inf }
 0x2b0   : > { %v523_v48 = vand.u32 2147483648, %v510_v33  ;;  %vm522_vm6 = vcmp.eq.f32.partialorder %v510_v33, 0.0 }
 0x2b8   : > { %v667_v19 = vpop.eup %666 }
 0x2b9   : > { %v669_v34 = vpop.eup %668  ;;  %v512_v47 = vmul.f32 %v667_v19, %v509_v46 }
 0x2ba   : > { %v519_v49 = vmul.f32 %v669_v34, %v510_v33 }
 0x2bb   : > { %v514_v50 = vsel %vm513_vm1, %v509_v46, %v512_v47 }
 0x2bc   : > { %v517_v51 = vsel %vm515_vm4, %v516_v20, %v514_v50  ;;  %v521_v52 = vsel %vm520_vm5, %v510_v33, %v519_v49 }
 0x2bd   : > { %v525_v53 = vmin.f32 %v517_v51, 10000.0  ;;  %v524_v54 = vsel %vm522_vm6, %v523_v48, %v521_v52 }
 0x2be   : > { %v526_v55 = vmin.f32 %v524_v54, 10000.0 }
 0x2bf   : > { %v613_v1 = vadd.f32 -1.0, %v525_v53 }
 0x2c0   : > { %v614_v3 = vadd.f32 -1.0, %v526_v55 }
 0x2c1   : > { %v529_v5 = vmax.f32 %v613_v1, 0.0 }
 0x2c2   : > { %v530_v56 = vmax.f32 %v614_v3, 0.0 }
 0x2c3   : > { %v531_v57 = vsel %vm770_vm11, 0.0, %v529_v5 }
 0x2c4   : > { %533 = vst.msk [vmem:[%s747_s14] sm:$0xff] %vm376_vm15, %v531_v57  ;;  %v532_v58 = vsel %vm782_vm0, 0.0, %v530_v56 }
 0x2c5   : > { %534 = vst.msk [vmem:[%s747_s14 + $0x8] sm:$0xff] %vm376_vm15, %v532_v58 }
 0x2c6 PF: > { %s11_s6 = sadd.s32 1, %s688_s6  }
 0x2c7   : > { %p8_p5 = scmp.ge.s32.totalorder %s11_s6, 4  }
 0x2c9   :  { %10 = sbr.rel (!%p8_p5) target bundleno = 1 (0x1), region = 73 }

// kernel: abl_ce_iou_loss.5
= control target key start
LH: loop header
LB: loop body
LE: loop exit
PB: predicated region body
PF: predicated region fallthrough
CT: control target
= control target key end

     0   :  { %s3692_s0 = inlined_call_operand.vmem [shape: f32[2,4,16,16], index: 0, kind: input, shape index: {}, may-alias: {0,1,2}]   ;;  %s3693_s1 = inlined_call_operand.vmem [shape: f32[2,4,16,16], index: 1, kind: input, shape index: {}, may-alias: {0,1,2}]   ;;  %s3694_s2 = inlined_call_operand.vmem [shape: f32[2,4,16,16], index: 2, kind: input, shape index: {}, may-alias: {0,1,2}]   ;;  %s3695_s3 = inlined_call_operand.vmem [shape: f32[2,16,16], index: 3, kind: input, shape index: {}, may-alias: {3,4,5}]   ;;  %s3696_s4 = inlined_call_operand.vmem [shape: f32[2,16,16], index: 4, kind: input, shape index: {}, may-alias: {3,4,5}]   ;;  %s3697_s5 = inlined_call_operand.vmem [shape: f32[2,16,16], index: 5, kind: input, shape index: {}, may-alias: {3,4,5}]   ;;  %s3698_s6 = inlined_call_operand.vmem [shape: f32[2,16,16], index: 6, kind: input, shape index: {}, may-alias: {6,7,8}]   ;;  %s3699_s7 = inlined_call_operand.vmem [shape: f32[2,16,16], index: 7, kind: input, shape index: {}, may-alias: {6,7,8}]   ;;  %s3700_s8 = inlined_call_operand.vmem [shape: f32[2,16,16], index: 8, kind: input, shape index: {}, may-alias: {6,7,8}]   ;;  %s3701_s9 = inlined_call_operand.vmem [shape: f32[2,2,8,128], index: 9, kind: output, shape index: {0}]   ;;  %s3702_s10 = inlined_call_operand.vmem [shape: f32[2,2,8,128], index: 10, kind: output, shape index: {1}]  }
   0x1   :  { %3705 = sst [smem:[#allocation9_spill]] %s3692_s0 }
   0x2   :  { %3706 = sst [smem:[#allocation10_spill]] %s3695_s3 }
   0x3   :  { %3707 = sst [smem:[#allocation11_spill]] %s3697_s5 }
   0x4   :  { %3708 = sst [smem:[#allocation12_spill]] %s3701_s9 }
   0x5   :  { %3709 = sst [smem:[#allocation13_spill]] %s3702_s10 }
   0x6   :  { %s2599_s13 = smov 0   ;;  %s2601_s14 = smov 0  }
   0x7   :  { %s2603_s15 = smov 0   ;;  %s2605_s16 = smov 0  }
   0x8   :  { %s2607_s17 = smov 0   ;;  %s2609_s18 = smov 0  }
   0x9   :  { %s2611_s19 = smov 0   ;;  %s2613_s20 = smov 0  }
   0xa   :  { %s2615_s21 = smov 0   ;;  %s2617_s22 = smov 0  }
   0xb   :  { %s2619_s23 = smov 0  }
   0xc LB: > { %s30_s24 = sadd.s32 1, %s2527_s21  ;;  %s33_s25 = sadd.s32 1, %s2531_s22  ;;  %s2535_s23 = sphi %s2619_s23, %s21_s23   ;;  %s2531_s22 = sphi %s2617_s22, %s3739_s22   ;;  %s2527_s21 = sphi %s2615_s21, %s3738_s21   ;;  %s2523_s20 = sphi %s2613_s20, %s3737_s20   ;;  %s2519_s19 = sphi %s2611_s19, %s3736_s19   ;;  %s2515_s18 = sphi %s2609_s18, %s3735_s18   ;;  %s2511_s17 = sphi %s2607_s17, %s3734_s17   ;;  %s2507_s16 = sphi %s2605_s16, %s3733_s16   ;;  %s2503_s15 = sphi %s2603_s15, %s3732_s15   ;;  %s2499_s14 = sphi %s2601_s14, %s3731_s14   ;;  %s2495_s13 = sphi %s2599_s13, %s3730_s13  }
   0xd   : > { %p31_p0 = scmp.ge.s32.totalorder %s30_s24, 2  ;;  %s42_s26 = sadd.s32 1, %s2515_s18 }
   0xe   : > { %p49_p1 = scmp.ne.s32.totalorder %s2515_s18, %s2511_s17  ;;  %p50_p2 = scmp.eq.s32.totalorder %s2535_s23, 0 }
   0xf   : > { %s3741_s24 = smov (%p31_p0, %s30_s24), 0  ;;  %s3743_s25 = smov (!%p31_p0, %s33_s25), %s2531_s22 }
  0x10   : > { %3710 = sst [smem:[#allocation5_spill]] %s3741_s24  ;;  %s38_s27 = ssub.s32 %s2527_s21, %s3741_s24 }
  0x11   : > { %p2667_p3 = por %p50_p2, %p49_p1  ;;  %p35_p4 = scmp.ge.s32.totalorder %s3743_s25, 2 }
  0x12   : > { %s76_s11 = sadd.s32 1, %s2507_s16  ;;  %p83_p6 = scmp.ne.s32.totalorder %s2507_s16, %s2503_s15 }
  0x13   : > { %s3745_s25 = smov (%p35_p4, %s3743_s25), 0  ;;  %p117_p9 = scmp.ne.s32.totalorder %s2499_s14, %s2495_s13 }
  0x14   : > { %3712 = sst [smem:[#allocation6_spill]] %s3745_s25  ;;  %s37_s29 = ssub.s32 %s2531_s22, %s3745_s25 }
  0x15   : > { %s39_s30 = sor.u32 %s38_s27, %s37_s29  ;;  %p2683_p7 = por %p83_p6, %p50_p2 }
  0x16   : > { %p40_p5 = scmp.eq.s32.totalorder %s39_s30, 0  ;;  %p74_p8 = scmp.eq.s32.totalorder %s37_s29, 0 }
  0x17   : > { %p2694_p10 = por %p117_p9, %p50_p2  ;;  %s110_s27 = sadd.s32 1, %s2499_s14 }
  0x18   : > { %s2679_s12 = scalar_select %p40_p5, %s2515_s18, %s42_s26  }
  0x19   : > { %s2688_s10 = scalar_select %p74_p8, %s2507_s16, %s76_s11  }
  0x1a   : > { %3713 = sst [smem:[#allocation7_spill]] %s2679_s12  ;;  %p2213_p11 = scmp.ge.s32.totalorder %s2535_s23, 4 }
  0x1b   : > { %3715 = sst [smem:[#allocation8_spill]] %s2688_s10 }
  0x1c   : > { %s2700_s25 = scalar_select %p74_p8, %s2499_s14, %s110_s27  }
  0x1d   : > { %391 = sbr.rel (%p2213_p11) target bundleno = 62 (0x3e), region = 16 }
  0x24   : > { %394 = sbr.rel (!%p2667_p3) target bundleno = 48 (0x30), region = 20  ;;  %s396_s26 = sand.u32 (%p2667_p3), 1, %s2515_s18  }
  0x25   : > { %s2215_s29 = sshll.u32 (%p2667_p3), %s2531_s22, 3  ;;  %s2214_s30 = sshll.u32 (%p2667_p3), %s396_s26, 5 }
  0x26   : > { %s400_s11 = sadd.s32 (%p2667_p3), %s2527_s21, %s2215_s29  ;;  %s3717_s0 = sld [smem:[#allocation9_spill]] (%p2667_p3) }
  0x27   : > { %s2216_s12 = sshll.u32 (%p2667_p3), %s400_s11, 3  ;;  %s398_s27 = scalar_lea.vmem (%p2667_p3), [#allocation2], %s2214_s30 }
  0x2c   : > { %s402_s3 = scalar_lea.vmem %s3717_s0, %s2216_s12 }
  0x2d   : > { %v436_v0 = vld [vmem:[%s402_s3] sm:$0xff]  ;;  %v438_v1 = vld [vmem:[%s402_s3 + $0x10] sm:$0xff] }
  0x2e   : > { %v440_v2 = vld [vmem:[%s402_s3 + $0x20] sm:$0xff]  ;;  %437 = vst [vmem:[%s398_s27] sm:$0xff] %v436_v0  ;;  %439 = vst [vmem:[%s398_s27 + $0x8] sm:$0xff] %v438_v1  ;;  %v442_v3 = vld [vmem:[%s402_s3 + $0x30] sm:$0xff] }
  0x2f   : > { %441 = vst [vmem:[%s398_s27 + $0x10] sm:$0xff] %v440_v2  ;;  %443 = vst [vmem:[%s398_s27 + $0x18] sm:$0xff] %v442_v3 }
  0x30 PF: > { %449 = sbr.rel (!%p2683_p7) target bundleno = 55 (0x37), region = 58  ;;  %s451_s28 = sand.u32 (%p2683_p7), 1, %s2507_s16  }
  0x31   : > { %s2217_s26 = sshll.u32 (%p2683_p7), %s451_s28, 5  ;;  %s2489_s29 = sshll.u32 (%p2683_p7), %s2531_s22, 6 }
  0x32   : > { %s460_s12 = scalar_lea.vmem (%p2683_p7), %s3693_s1, %s2489_s29  ;;  %s453_s30 = scalar_lea.vmem (%p2683_p7), [#allocation3], %s2217_s26 }
  0x33   : > { %v494_v4 = vld [vmem:[%s460_s12] sm:$0xff] (%p2683_p7)  ;;  %v496_v5 = vld [vmem:[%s460_s12 + $0x10] sm:$0xff] (%p2683_p7) }
  0x34   : > { %v498_v6 = vld [vmem:[%s460_s12 + $0x20] sm:$0xff] (%p2683_p7)  ;;  %495 = vst [vmem:[%s453_s30] sm:$0xff] (%p2683_p7), %v494_v4  ;;  %497 = vst [vmem:[%s453_s30 + $0x8] sm:$0xff] (%p2683_p7), %v496_v5  ;;  %v500_v7 = vld [vmem:[%s460_s12 + $0x30] sm:$0xff] (%p2683_p7) }
  0x35   : > { %499 = vst [vmem:[%s453_s30 + $0x10] sm:$0xff] (%p2683_p7), %v498_v6  ;;  %501 = vst [vmem:[%s453_s30 + $0x18] sm:$0xff] (%p2683_p7), %v500_v7 }
  0x37 PF: > { %507 = sbr.rel (!%p2694_p10) target bundleno = 62 (0x3e), region = 96  ;;  %s509_s3 = sand.u32 (%p2694_p10), 1, %s2499_s14  }
  0x38   : > { %s2221_s24 = sshll.u32 (%p2694_p10), %s509_s3, 5  ;;  %s2492_s11 = sshll.u32 (%p2694_p10), %s2531_s22, 6 }
  0x39   : > { %s2491_s27 = sadd.s32 (%p2694_p10), 8, %s2492_s11  ;;  %s511_s26 = scalar_lea.vmem (%p2694_p10), [#allocation4], %s2221_s24 }
  0x3a   : > { %s518_s5 = scalar_lea.vmem (%p2694_p10), %s3694_s2, %s2491_s27 }
  0x3b   : > { %v552_v8 = vld [vmem:[%s518_s5] sm:$0xff] (%p2694_p10)  ;;  %v554_v9 = vld [vmem:[%s518_s5 + $0x10] sm:$0xff] (%p2694_p10) }
  0x3c   : > { %v556_v10 = vld [vmem:[%s518_s5 + $0x20] sm:$0xff] (%p2694_p10)  ;;  %553 = vst [vmem:[%s511_s26] sm:$0xff] (%p2694_p10), %v552_v8  ;;  %555 = vst [vmem:[%s511_s26 + $0x8] sm:$0xff] (%p2694_p10), %v554_v9  ;;  %v558_v11 = vld [vmem:[%s518_s5 + $0x30] sm:$0xff] (%p2694_p10) }
  0x3d   : > { %557 = vst [vmem:[%s511_s26 + $0x10] sm:$0xff] (%p2694_p10), %v556_v10  ;;  %559 = vst [vmem:[%s511_s26 + $0x18] sm:$0xff] (%p2694_p10), %v558_v11 }
  0x3e PF: > { %p2224_p12 = scmp.ge.s32.totalorder %s2535_s23, 1  ;;  %p654_p13 = scmp.lt.s32.totalorder %s2535_s23, 5 }
  0x40   : > { %p655_p0 = pnand %p2224_p12, %p654_p13 }
  0x41   : > { %p797_p1 = scmp.lt.s32.totalorder (!%p655_p0), %s2523_s20, 1  ;;  %p799_p2 = scmp.lt.s32.totalorder (!%p655_p0), %s2519_s19, 1  ;;  %v2537_v12 = vmov (!%p655_p0), 15   ;;  %v2538_v13 = vmov (!%p655_p0), 0   ;;  %v1093_v14 = vlaneseq (!%p655_p0)  ;;  %vm891_vm1 = vcmask (!%p655_p0), 130048  }
  0x42   : > { %658 = sbr.rel (%p655_p0) target bundleno = 710 (0x2c6), region = 158  ;;  %s2230_s9 = sadd.s32 (!%p655_p0), 4294967295, %s2519_s19  ;;  %2370 = vset.pattern.permute.xlu0 (!%p655_p0), %v2537_v12  ;;  %2368 = vset.pattern.permute.xlu1 (!%p655_p0), %v2538_v13  ;;  %vm945_vm5 = vcmask (!%p655_p0), 122880   ;;  %vm1138_vm6 = vcmask (!%p655_p0), 121856   ;;  %vm1124_vm8 = vcmask (!%p655_p0), 7168  }
  0x43   : > { %s819_s10 = sadd.s32 (!%p655_p0), 1, %s2519_s19  ;;  %p806_p3 = scmp.gt.s32.totalorder (!%p655_p0), %s2230_s9, 0  ;;  %v2747_v15 = vshrl.u32 (!%p655_p0), %v1093_v14, 7 }
  0x44   : > { %p2231_p4 = scmp.lt.s32.totalorder (!%p655_p0), %s2230_s9, 1  ;;  %p820_p5 = scmp.lt.s32.totalorder (!%p655_p0), %s819_s10, 1 }
  0x45   : > { %p885_p6 = scmp.eq.s32.totalorder (!%p655_p0), %s2519_s19, 0  ;;  %p886_p7 = scmp.eq.s32.totalorder (!%p655_p0), %s2519_s19, 1  ;;  %v2761_v18 = vsub.s32 (!%p655_p0), 0, %v2747_v15  ;;  %vm1095_vm3 = vcmp.ge.s32.totalorder (!%p655_p0), %v2747_v15, 1  ;;  %vm1107_vm4 = vcmp.lt.s32.totalorder (!%p655_p0), %v2747_v15, 7 }
  0x46   : > { %s661_s5 = sand.u32 (!%p655_p0), 1, %s2511_s17  }
  0x49   : > { %s3747_s20 = smov (!%p797_p1, %s2523_s20), 1  ;;  %s3749_s9 = smov (!%p806_p3, %s2230_s9), 0 }
  0x4a   : > { %s800_s12 = scalar_select %p799_p2, %s2519_s19, 1 }
  0x4b   : > { %s2228_s30 = sshll.u32 %s3747_s20, 1  ;;  %s3751_s10 = smov (!%p820_p5, %s819_s10), 1 }
  0x4c   : > { %s802_s3 = sadd.s32 %s2228_s30, %s800_s12  ;;  %s3753_s9 = smov (!%p2231_p4, %s3749_s9), 1 }
  0x4d   : > { %s2735_s24 = sshll.u32 %s802_s3, 3  ;;  %s3755_s10 = smov (!%p820_p5, %s3751_s10), 1 }
  0x4e   : > { %s813_s11 = sadd.s32 %s3753_s9, %s2228_s30  ;;  %s2739_s28 = sadd.s32 %s2228_s30, %s3755_s10 }
  0x4f   : > { %s2737_s27 = sshll.u32 %s813_s11, 3  ;;  %s2242_s20 = sshll.u32 %s2739_s28, 3 }
  0x50   : > { %s840_s26 = scalar_lea.vmem %s3698_s6, %s2735_s24  ;;  %s851_s9 = scalar_lea.vmem %s3699_s7, %s2737_s27 }
  0x51   : > { %s865_s30 = scalar_lea.vmem %s3700_s8, %s2242_s20  ;;  %v1087_v16 = vld [vmem:[%s840_s26] sm:$0xff]  ;;  %s668_s19 = sand.u32 1, %s2503_s15  }
  0x52   : > { %s1048_s0 = scalar_select %p885_p6, 1, 0  ;;  %v1083_v17 = vld [vmem:[%s851_s9 + $0x7] sm:$0x1]  ;;  %v1085_v20 = vld [vmem:[%s865_s30] sm:$0x1] }
  0x53   : > { %s1056_s29 = scalar_select %p886_p7, 1, 0  ;;  %v1089_v23 = vrot.slane %v1087_v16, 7  ;;  %v1103_v26 = vrot.slane %v1087_v16, 1 }
  0x54   : > { %v1049_v19 = vstv %s1048_s0  ;;  %s2225_s0 = sshll.u32 %s661_s5, 5  ;;  %s2226_s17 = sshll.u32 %s668_s19, 5 }
  0x55   : > { %vm2763_vm0 = vcmp.eq.s32.totalorder %v1049_v19, 1  ;;  %v1057_v22 = vstv %s1056_s29  ;;  %s663_s26 = scalar_lea.vmem [#allocation2], %s2225_s0  ;;  %s675_s12 = sand.u32 1, %s2495_s13  }
  0x56   : > { %vm2768_vm2 = vcmp.eq.s32.totalorder %v1057_v22, 1  ;;  %v1084_v25 = vsel %vm2763_vm0, 0.0, %v1083_v17  ;;  %v887_v30 = vld [vmem:[%s663_s26] sm:$0xff]  ;;  %v888_v31 = vld [vmem:[%s663_s26 + $0x8] sm:$0xff]  ;;  %v889_v32 = vld [vmem:[%s663_s26 + $0x10] sm:$0xff]  ;;  %s670_s15 = scalar_lea.vmem [#allocation3], %s2226_s17  ;;  %s815_s0 = scalar_lea.vmem %s3696_s4, %s2737_s27 }
  0x57   : > { %v1086_v27 = vsel %vm2768_vm2, 0.0, %v1085_v20  ;;  %v1101_v28 = vrot.slane %v1084_v25, %v2761_v18  ;;  %v890_v34 = vld [vmem:[%s663_s26 + $0x18] sm:$0xff]  ;;  %v892_v35 = vsel %vm891_vm1, %v887_v30, -inf  ;;  %v893_v36 = vsel %vm891_vm1, %v888_v31, -inf  ;;  %v941_v38 = vld [vmem:[%s670_s15 + $0x7] sm:$0x1] }
  0x58   : > { %v1113_v29 = vrot.slane %v1086_v27, %v2761_v18  ;;  %v894_v37 = vsel %vm891_vm1, %v889_v32, -inf  ;;  %v895_v40 = vsel %vm891_vm1, %v890_v34, -inf  ;;  %v896_v41 = vmax.f32 %v892_v35, %v893_v36  ;;  %v942_v42 = vld [vmem:[%s670_s15 + $0xf] sm:$0x1]  ;;  %v943_v43 = vld [vmem:[%s670_s15 + $0x17] sm:$0x1] }
  0x59   : > { %v1102_v33 = vsel %vm1095_vm3, %v1089_v23, %v1101_v28  ;;  %v946_v44 = vsel %vm945_vm5, %v941_v38, -inf  ;;  %v897_v46 = vmax.f32 %v894_v37, %v895_v40  ;;  %v944_v47 = vld [vmem:[%s670_s15 + $0x1f] sm:$0x1]  ;;  %v947_v48 = vsel %vm945_vm5, %v942_v42, -inf  ;;  %s2227_s13 = sshll.u32 %s675_s12, 5  ;;  %s2539_s9 = smov 127  }
  0x5a   : > { %v1114_v39 = vsel %vm1107_vm4, %v1103_v26, %v1113_v29  ;;  %v948_v49 = vsel %vm945_vm5, %v943_v43, -inf  ;;  %v949_v50 = vsel %vm945_vm5, %v944_v47, -inf  ;;  %v950_v51 = vmax.f32 %v946_v44, %v947_v48  ;;  %s677_s3 = scalar_lea.vmem [#allocation4], %s2227_s13  ;;  %s2540_s11 = smov 113  }
  0x5b   : > { %v1115_v45 = vmax.f32 %v1102_v33, %v1114_v39  ;;  %v898_v53 = vmax.f32 %v896_v41, %v897_v46  ;;  %v951_v54 = vmax.f32 %v948_v49, %v949_v50  ;;  %v995_v55 = vld [vmem:[%s677_s3] sm:$0x1]  ;;  %v996_v56 = vld [vmem:[%s677_s3 + $0x8] sm:$0x1]  ;;  %v997_v57 = vld [vmem:[%s677_s3 + $0x10] sm:$0x1] }
  0x5c   : > { %v998_v58 = vld [vmem:[%s677_s3 + $0x18] sm:$0x1]  ;;  %v999_v59 = vsel %vm945_vm5, %v995_v55, -inf  ;;  %v1000_v60 = vsel %vm945_vm5, %v996_v56, -inf  ;;  %v1001_v61 = vsel %vm945_vm5, %v997_v57, -inf  ;;  %s2541_s10 = smov 15  }
  0x5d   : > { %v2794_v52 = vmax.f32 %v1087_v16, %v1115_v45  ;;  %v2803_v62 = vsub.f32 %v887_v30, %v898_v53  ;;  %v2805_v63 = vsub.f32 %v888_v31, %v898_v53  ;;  %v2807_v0 = vsub.f32 %v889_v32, %v898_v53  ;;  %s2542_s30 = smov 1   ;;  %s3722_s26 = sld [smem:[#allocation10_spill]] }
  0x5e   : > { %v1002_v1 = vsel %vm945_vm5, %v998_v58, -inf  ;;  %v2810_v2 = vsub.f32 %v890_v34, %v898_v53  ;;  %v952_v3 = vmax.f32 %v950_v51, %v951_v54  ;;  %v1003_v4 = vmax.f32 %v999_v59, %v1000_v60  ;;  %s3723_s13 = sld [smem:[#allocation11_spill]]  ;;  %s3725_s5 = sld [smem:[#allocation13_spill]] }
  0x5f   : > { %1132 = vrot.lane.b32.xlu1 %v2794_v52, %s2539_s9  ;;  %1118 = vrot.lane.b32.xlu0 %v2794_v52, %s2540_s11  ;;  %v1004_v5 = vmax.f32 %v1001_v61, %v1002_v1  ;;  %v903_v6 = vmul.f32 1.442695, %v2803_v62  ;;  %v905_v7 = vmul.f32 1.442695, %v2805_v63  ;;  %v907_v8 = vmul.f32 1.442695, %v2807_v0 }
  0x60   : > { %v909_v9 = vmul.f32 1.442695, %v2810_v2  ;;  %v2816_v10 = vsub.f32 %v941_v38, %v952_v3  ;;  %v2818_v11 = vsub.f32 %v942_v42, %v952_v3  ;;  %v2820_v16 = vsub.f32 %v943_v43, %v952_v3 }
  0x61   : > { %2375 = vpow2.f32 %v903_v6  ;;  %v2826_v17 = vsub.f32 %v944_v47, %v952_v3  ;;  %v1005_v19 = vmax.f32 %v1003_v4, %v1004_v5 }
  0x62   : > { %2377 = vpow2.f32 %v905_v7  ;;  %v957_v20 = vmul.f32 1.442695, %v2816_v10  ;;  %v959_v22 = vmul.f32 1.442695, %v2818_v11  ;;  %v961_v23 = vmul.f32 1.442695, %v2820_v16 }
  0x63   : > { %1135 = vrot.lane.b32.xlu1 %v2794_v52, %s2541_s10  ;;  %1121 = vrot.lane.b32.xlu0 %v2794_v52, %s2542_s30  ;;  %2379 = vpow2.f32 %v907_v8  ;;  %v2831_v25 = vsub.f32 %v995_v55, %v1005_v19  ;;  %v2833_v26 = vsub.f32 %v996_v56, %v1005_v19  ;;  %v963_v27 = vmul.f32 1.442695, %v2826_v17  ;;  %s804_s12 = scalar_lea.vmem %s3722_s26, %s2735_s24 }
  0x64   : > { %2381 = vpow2.f32 %v909_v9  ;;  %v2836_v28 = vsub.f32 %v997_v57, %v1005_v19  ;;  %v2838_v29 = vsub.f32 %v998_v58, %v1005_v19  ;;  %s829_s3 = scalar_lea.vmem %s3723_s13, %s2242_s20 }
  0x65   : > { %2383 = vpow2.f32 %v957_v20  ;;  %v1010_v30 = vmul.f32 1.442695, %v2831_v25  ;;  %v1012_v31 = vmul.f32 1.442695, %v2833_v26 }
  0x66   : > { %2385 = vpow2.f32 %v959_v22  ;;  %v1014_v32 = vmul.f32 1.442695, %v2836_v28  ;;  %v1016_v33 = vmul.f32 1.442695, %v2838_v29 }
  0x67   : > { %2387 = vpow2.f32 %v961_v23 }
  0x68   : > { %2389 = vpow2.f32 %v963_v27 }
  0x69   : > { %2391 = vpow2.f32 %v1010_v30 }
  0x6a   : > { %2393 = vpow2.f32 %v1012_v31 }
  0x6b   : > { %v2376_v34 = vpop.eup %2375  ;;  %2395 = vpow2.f32 %v1014_v32 }
  0x6c   : > { %v2378_v35 = vpop.eup %2377  ;;  %v911_v36 = vsel %vm891_vm1, %v2376_v34, 0.0  ;;  %2397 = vpow2.f32 %v1016_v33 }
  0x6d   : > { %v2380_v37 = vpop.eup %2379  ;;  %v912_v38 = vsel %vm891_vm1, %v2378_v35, 0.0 }
  0x6e   : > { %v2846_v39 = vpop.eup %2381  ;;  %v913_v40 = vadd.f32 %v912_v38, %v911_v36  ;;  %v914_v41 = vsel %vm891_vm1, %v2380_v37, 0.0 }
  0x6f   : > { %v2384_v42 = vpop.eup %2383  ;;  %v916_v43 = vsel %vm891_vm1, %v2846_v39, 0.0 }
  0x70   : > { %v2386_v44 = vpop.eup %2385  ;;  %v915_v45 = vadd.f32 %v914_v41, %v913_v40  ;;  %v965_v46 = vsel %vm945_vm5, %v2384_v42, 0.0 }
  0x71   : > { %v2388_v47 = vpop.eup %2387  ;;  %v966_v48 = vsel %vm945_vm5, %v2386_v44, 0.0 }
  0x72   : > { %v2853_v49 = vpop.eup %2389  ;;  %v917_v50 = vadd.f32 %v916_v43, %v915_v45  ;;  %v967_v51 = vadd.f32 %v966_v48, %v965_v46  ;;  %v968_v53 = vsel %vm945_vm5, %v2388_v47, 0.0 }
  0x73   : > { %v2856_v54 = vpop.eup %2391  ;;  %v970_v55 = vsel %vm945_vm5, %v2853_v49, 0.0 }
  0x74   : > { %v2394_v56 = vpop.eup %2393  ;;  %2399 = vrcp.f32 %v917_v50  ;;  %v969_v57 = vadd.f32 %v968_v53, %v967_v51  ;;  %v1018_v58 = vsel %vm945_vm5, %v2856_v54, 0.0 }
  0x75   : > { %v2396_v59 = vpop.eup %2395  ;;  %v1019_v60 = vsel %vm945_vm5, %v2394_v56, 0.0  ;;  %2401 = vlog2.f32 %v917_v50 }
  0x76   : > { %v2863_v61 = vpop.eup %2397  ;;  %v971_v1 = vadd.f32 %v970_v55, %v969_v57  ;;  %v1020_v3 = vadd.f32 %v1019_v60, %v1018_v58  ;;  %v1021_v4 = vsel %vm945_vm5, %v2396_v59, 0.0 }
  0x77   : > { %v1023_v6 = vsel %vm945_vm5, %v2863_v61, 0.0 }
  0x78   : > { %2403 = vrcp.f32 %v971_v1  ;;  %v1022_v5 = vadd.f32 %v1021_v4, %v1020_v3 }
  0x79   : > { %2405 = vlog2.f32 %v971_v1 }
  0x7a   : > { %v1024_v7 = vadd.f32 %v1023_v6, %v1022_v5 }
  0x7c   : > { %2407 = vlog2.f32 %v1024_v7 }
  0x7d   : > { %2409 = vrcp.f32 %v1024_v7 }
  0x7e   : > { %v2400_v8 = vpop.eup %2399 }
  0x7f   : > { %v2868_v9 = vmul.f32 %v2400_v8, %v2378_v35  ;;  %v2402_v19 = vpop.eup %2401  ;;  %v2872_v20 = vmul.f32 %v2400_v8, %v2380_v37  ;;  %v2874_v22 = vmul.f32 %v2400_v8, %v2376_v34  ;;  %v2947_v7 = vmul.f32 %v2400_v8, %v2846_v39 }
  0x80   : > { %v919_v31 = vmul.f32 0.6931472, %v2402_v19 }
  0x81   : > { %1437 = vperm.xlu0 %2370, %v2868_v9   ;;  %1343 = vperm.xlu1 %2368, %v2868_v9   ;;  %v1171_v6 = vrot.slane %v2872_v20, 7 }
  0x82   : > { %v2404_v23 = vpop.eup %2403  ;;  %v2919_v58 = vsub.f32 %v2810_v2, %v919_v31 }
  0x83   : > { %v2406_v27 = vpop.eup %2405  ;;  %v974_v32 = vmul.f32 %v2404_v23, %v2384_v42  ;;  %v976_v35 = vmul.f32 %v2404_v23, %v2388_v47  ;;  %v2883_v43 = vmul.f32 %v2404_v23, %v2386_v44  ;;  %v2888_v42 = vsub.f32 %v2803_v62, %v919_v31 }
  0x84   : > { %v979_v30 = vmul.f32 0.6931472, %v2406_v27  ;;  %v1169_v62 = vrot.slane %v2874_v22, 7  ;;  %v2902_v47 = vsub.f32 %v2807_v0, %v919_v31  ;;  %v977_v57 = vmul.f32 %v2404_v23, %v2853_v49 }
  0x85   : > { %1347 = vperm.xlu1 %2368, %v2872_v20   ;;  %1322 = vrot.lane.b32.xlu0 %v2874_v22, %s2542_s30  ;;  %v930_v53 = vmul.f32 %v2874_v22, %v2888_v42  ;;  %v1053_v60 = vsel %vm2763_vm0, %v2872_v20, %v976_v35 }
  0x86   : > { %v980_v33 = vsub.f32 %v2816_v10, %v979_v30  ;;  %v982_v36 = vsub.f32 %v2820_v16, %v979_v30  ;;  %v2408_v38 = vpop.eup %2407  ;;  %v983_v37 = vsub.f32 %v2826_v17, %v979_v30  ;;  %v981_v34 = vsub.f32 %v2818_v11, %v979_v30 }
  0x87   : > { %v1032_v10 = vmul.f32 0.6931472, %v2408_v38  ;;  %v2410_v45 = vpop.eup %2409  ;;  %v1051_v11 = vsel %vm2763_vm0, %v2874_v22, %v974_v32  ;;  %v2896_v17 = vsub.f32 %v2805_v63, %v919_v31  ;;  %v932_v2 = vmul.f32 %v2872_v20, %v2902_v47 }
  0x88   : > { %v984_v40 = vmul.f32 %v980_v33, %v974_v32  ;;  %v986_v41 = vmul.f32 %v982_v36, %v976_v35  ;;  %v985_v44 = vmul.f32 %v981_v34, %v2883_v43  ;;  %v1184_v50 = vrot.slane %v1051_v11, %v2761_v18 }
  0x89   : > { %2369 = vset.pattern.permute.xlu1 %v2537_v12  ;;  %1441 = vperm.xlu0 %2370, %v2872_v20   ;;  %v1034_v46 = vsub.f32 %v2833_v26, %v1032_v10  ;;  %v1028_v51 = vmul.f32 %v2410_v45, %v2394_v56  ;;  %v1035_v63 = vsub.f32 %v2836_v28, %v1032_v10  ;;  %v2922_v56 = vsub.s32 7, %v2747_v15 }
  0x8a   : > { %1433 = vperm.xlu1 %2369, %v2874_v22   ;;  %v988_v16 = vsel %vm945_vm5, %v984_v40, 0.0  ;;  %v989_v48 = vsel %vm945_vm5, %v985_v44, 0.0  ;;  %v2913_v26 = vmul.f32 %v2410_v45, %v2396_v59  ;;  %v931_v0 = vmul.f32 %v2868_v9, %v2896_v17 }
  0x8b   : > { %v1038_v55 = vmul.f32 %v1034_v46, %v1028_v51  ;;  %v2929_v59 = vsel %vm1095_vm3, %v1169_v62, %v1184_v50  ;;  %v934_v49 = vsel %vm891_vm1, %v930_v53, 0.0  ;;  %v2941_v3 = vmul.f32 %v2410_v45, %v2856_v54 }
  0x8c   : > { %v1039_v28 = vmul.f32 %v1035_v63, %v2913_v26  ;;  %v935_v1 = vsel %vm891_vm1, %v931_v0, 0.0  ;;  %v1033_v4 = vsub.f32 %v2831_v25, %v1032_v10  ;;  %v1030_v5 = vmul.f32 %v2410_v45, %v2863_v61 }
  0x8d   : > { %1326 = vrot.lane.b32.xlu0 %v2872_v20, %s2542_s30  ;;  %v1036_v19 = vsub.f32 %v2838_v29, %v1032_v10  ;;  %v1042_v23 = vsel %vm945_vm5, %v1038_v55, 0.0  ;;  %v1192_v27 = vrot.slane %v1053_v60, %v2761_v18  ;;  %v987_v30 = vmul.f32 %v983_v37, %v977_v57 }
  0x8e   : > { %1310 = vrot.lane.b32.xlu1 %v2874_v22, %s2540_s11  ;;  %v1037_v31 = vmul.f32 %v1033_v4, %v2941_v3  ;;  %v1044_v54 = vsel %vm945_vm5, %v1039_v28, 0.0  ;;  %v933_v25 = vmul.f32 %v2947_v7, %v2919_v58  ;;  %v936_v61 = vadd.f32 %v935_v1, %v934_v49 }
  0x8f   : > { %v1040_v32 = vmul.f32 %v1036_v19, %v1030_v5  ;;  %v1066_v39 = vrot.slane %v1030_v5, 1  ;;  %v937_v29 = vsel %vm891_vm1, %v932_v2, 0.0  ;;  %v990_v33 = vadd.f32 %v989_v48, %v988_v16 }
  0x90   : > { %v1041_v8 = vsel %vm945_vm5, %v1037_v31, 0.0  ;;  %v991_v35 = vsel %vm945_vm5, %v986_v41, 0.0  ;;  %v1054_v36 = vsel %vm2763_vm0, %v2947_v7, %v977_v57  ;;  %v1064_v38 = vrot.slane %v1028_v51, 1 }
  0x91   : > { %1404 = vrot.lane.b32.xlu0 %v2874_v22, %s2539_s9  ;;  %v1043_v37 = vadd.f32 %v1042_v23, %v1041_v8  ;;  %v1046_v34 = vsel %vm945_vm5, %v1040_v32, 0.0  ;;  %v2969_v40 = vsel %vm2768_vm2, %v2947_v7, %v1066_v39  ;;  %v992_v10 = vadd.f32 %v991_v35, %v990_v33 }
  0x92   : > { %1312 = vrot.lane.b32.xlu1 %v2868_v9, %s2540_s11  ;;  %v993_v45 = vsel %vm945_vm5, %v987_v30, 0.0  ;;  %v1172_v41 = vrot.slane %v2947_v7, 7  ;;  %v938_v16 = vadd.f32 %v937_v29, %v936_v61  ;;  %v1228_v44 = vrot.slane %v2969_v40, %v2922_v56 }
  0x93   : > { %v1045_v11 = vadd.f32 %v1044_v54, %v1043_v37  ;;  %v2981_v46 = vsel %vm1095_vm3, %v1171_v6, %v1192_v27  ;;  %v1196_v62 = vrot.slane %v1054_v36, %v2761_v18  ;;  %v939_v48 = vsel %vm891_vm1, %v933_v25, 0.0 }
  0x94   : > { %v2985_v50 = vadd.f32 %v993_v45, %v992_v10  ;;  %v1072_v51 = vsel %vm2768_vm2, %v2868_v9, %v1064_v38  ;;  %v2991_v53 = vadd.f32 %v939_v48, %v938_v16  ;;  %v1202_v57 = vrot.slane %v2868_v9, 1 }
  0x95   : > { %1532 = vperm.xlu0 %2370, %v2929_v59   ;;  %v1047_v63 = vadd.f32 %v1046_v34, %v1045_v11  ;;  %v2996_v55 = vsel %vm1095_vm3, %v1172_v41, %v1196_v62  ;;  %v1220_v28 = vrot.slane %v1072_v51, %v2922_v56  ;;  %v1052_v2 = vsel %vm2763_vm0, %v2868_v9, %v2883_v43 }
  0x96   : > { %1324 = vrot.lane.b32.xlu1 %v2868_v9, %s2542_s30  ;;  %v1170_v4 = vrot.slane %v2868_v9, 7  ;;  %v1188_v5 = vrot.slane %v1052_v2, %v2761_v18  ;;  %v1065_v6 = vrot.slane %v2913_v26, 1  ;;  %v1203_v23 = vrot.slane %v2872_v20, 1 }
  0x97   : > { %v1076_v0 = vrot.slane %v1047_v63, 1  ;;  %v3013_v1 = vsel %vm1107_vm4, %v1202_v57, %v1220_v28  ;;  %v1063_v26 = vrot.slane %v2941_v3, 1  ;;  %v1201_v3 = vrot.slane %v2874_v22, 1 }
  0x98   : > { %v3022_v43 = vsel %vm1095_vm3, %v1170_v4, %v1188_v5  ;;  %v1073_v19 = vsel %vm2768_vm2, %v2872_v20, %v1065_v6  ;;  %v1204_v61 = vrot.slane %v2947_v7, 1  ;;  %v1055_v39 = vsel %vm2763_vm0, %v2991_v53, %v2985_v50  ;;  %v1079_v4 = vld [vmem:[%s815_s0 + $0x7] sm:$0x1]  ;;  %s884_s0 = scalar_lea.vmem %s3725_s5, %s2735_s24 }
  0x99   : > { %1416 = vrot.lane.b32.xlu0 %v2874_v22, %s2541_s10  ;;  %v1078_v60 = vsel %vm2768_vm2, %v2991_v53, %v1076_v0  ;;  %v1224_v27 = vrot.slane %v1073_v19, %v2922_v56  ;;  %v1071_v31 = vsel %vm2768_vm2, %v2874_v22, %v1063_v26  ;;  %v1234_v29 = vrot.slane %v2991_v53, 7  ;;  %v3236_v6 = vld [vmem:[%s804_s12] sm:$0xff] }
  0x9a   : > { %1314 = vrot.lane.b32.xlu1 %v2872_v20, %s2540_s11  ;;  %v1248_v49 = vrot.slane %v1078_v60, %v2922_v56  ;;  %v1216_v54 = vrot.slane %v1071_v31, %v2922_v56  ;;  %v3098_v32 = vsel %vm1107_vm4, %v1204_v61, %v1228_v44  ;;  %v1240_v8 = vrot.slane %v1055_v39, %v2761_v18  ;;  %v1081_v26 = vld [vmem:[%s829_s3] sm:$0x1] }
  0x9b   : > { %v3044_v30 = vsel %vm1107_vm4, %v1203_v23, %v1224_v27  ;;  %v3182_v44 = vand.u32 127, %v1093_v14  ;;  %v1080_v23 = vsel %vm2763_vm0, 100000.0, %v1079_v4  ;;  %v1149_v31 = vrot.slane %v3236_v6, 7 }
  0x9c   : > { %v3114_v56 = vsel %vm1095_vm3, %v1234_v29, %v1240_v8  ;;  %v1157_v39 = vrot.slane %v3236_v6, 1  ;;  %v1276_v24 = vmul.f32 %v2929_v59, %v2888_v42 }
  0x9d   : > { %1540 = vperm.xlu0 %2370, %v2981_v46   ;;  %vm1140_vm7 = vcmp.lt.s32.totalorder %v3182_v44, 15  ;;  %vm1128_vm9 = vcmp.ge.s32.totalorder %v3182_v44, 1 }
  0x9e   : > { %1445 = vperm.xlu1 %2369, %v2947_v7  }
  0xa1   : > { %1544 = vperm.xlu0 %2370, %v2996_v55  }
  0xa2   : > { %1316 = vrot.lane.b32.xlu1 %v2947_v7, %s2540_s11 }
  0xa5   : > { %1636 = vperm.xlu0 %2370, %v3013_v1  }
  0xa6   : > { %1328 = vrot.lane.b32.xlu1 %v2947_v7, %s2542_s30 }
  0xa9   : > { %1410 = vrot.lane.b32.xlu0 %v2947_v7, %s2539_s9 }
  0xaa   : > { %1536 = vperm.xlu1 %2369, %v3022_v43  }
  0xad   : > { %1503 = vrot.lane.b32.xlu0 %v2929_v59, %s2539_s9 }
  0xae   : > { %1406 = vrot.lane.b32.xlu1 %v2868_v9, %s2539_s9 }
  0xb1   : > { %1515 = vrot.lane.b32.xlu0 %v2929_v59, %s2541_s10 }
  0xb2   : > { %1418 = vrot.lane.b32.xlu1 %v2868_v9, %s2541_s10  ;;  %v3060_v9 = vsel %vm1107_vm4, %v1201_v3, %v1216_v54  ;;  %v1155_v3 = vrot.slane %v1080_v23, %v2761_v18 }
  0xb4   : > { %v3258_v21 = vsel %vm1095_vm3, %v1149_v31, %v1155_v3  ;;  %v1254_v31 = vmul.f32 %v3098_v32, %v2919_v58 }
  0xb5   : > { %1640 = vperm.xlu0 %2370, %v3044_v30  }
  0xb6   : > { %1408 = vrot.lane.b32.xlu1 %v2872_v20, %s2539_s9 }
  0xb9   : > { %1361 = vrot.lane.b32.xlu0 %v2991_v53, %s2542_s30 }
  0xba   : > { %1420 = vrot.lane.b32.xlu1 %v2872_v20, %s2541_s10  ;;  %v1242_v20 = vrot.slane %v2991_v53, 1 }
  0xbc   : > { %v3087_v25 = vsel %vm1107_vm4, %v1242_v20, %v1248_v49  ;;  %v1082_v20 = vsel %vm2768_vm2, 100000.0, %v1081_v26 }
  0xbd   : > { %1519 = vrot.lane.b32.xlu0 %v2981_v46, %s2541_s10  ;;  %v1163_v29 = vrot.slane %v1082_v20, %v2761_v18 }
  0xbe   : > { %1632 = vperm.xlu1 %2369, %v3060_v9  }
  0xc1   : > { %1509 = vrot.lane.b32.xlu0 %v2996_v55, %s2539_s9 }
  0xc2   : > { %1460 = vperm.xlu1 %2369, %v2991_v53  }
  0xc5   : > { %1603 = vrot.lane.b32.xlu0 %v3060_v9, %s2539_s9 }
  0xc6   : > { %1422 = vrot.lane.b32.xlu1 %v2947_v7, %s2541_s10 }
  0xc9   : > { %1615 = vrot.lane.b32.xlu0 %v3060_v9, %s2541_s10 }
  0xca   : > { %1505 = vrot.lane.b32.xlu1 %v3022_v43, %s2539_s9 }
  0xcd   : > { %1455 = vrot.lane.b32.xlu0 %v2991_v53, %s2541_s10 }
  0xce   : > { %1517 = vrot.lane.b32.xlu1 %v3022_v43, %s2541_s10 }
  0xd1   : > { %1619 = vrot.lane.b32.xlu0 %v3044_v30, %s2541_s10 }
  0xd2   : > { %1358 = vrot.lane.b32.xlu1 %v2991_v53, %s2540_s11 }
  0xd5   : > { %1660 = vperm.xlu0 %2370, %v3087_v25  }
  0xd6   : > { %1507 = vrot.lane.b32.xlu1 %v2981_v46, %s2539_s9 }
  0xd9   : > { %2374 = vset.pattern.permute.xlu0 %v2538_v13 }
  0xda   : > { %1644 = vperm.xlu1 %2369, %v3098_v32   ;;  %1339 = vperm.xlu0 %2374, %v2874_v22   ;;  %v3135_v22 = vpop.permute.xlu0 %1118 }
  0xde   : > { %2371 = vset.pattern.permute.xlu1 %v2538_v13  ;;  %1351 = vperm.xlu0 %2374, %v2947_v7   ;;  %v3144_v33 = vpop.permute.xlu0 %1121 }
  0xdf   : > { %1731 = vperm.xlu1 %2371, %v3022_v43  }
  0xe2   : > { %1366 = vperm.xlu0 %2374, %v2991_v53  }
  0xe3   : > { %2372 = vset.pattern.permute.xlu1 %v2537_v12  ;;  %v3133_v12 = vpop.permute.xlu1 %1132 }
  0xe4   : > { %1560 = vperm.xlu1 %2372, %v3114_v56  }
  0xe6   : > { %1727 = vperm.xlu0 %2374, %v2929_v59  }
  0xe7   : > { %v3142_v7 = vpop.permute.xlu1 %1135 }
  0xe8   : > { %1521 = vrot.lane.b32.xlu1 %v2996_v55, %s2541_s10 }
  0xe9   : > { %2373 = vset.pattern.permute.xlu1 %v2538_v13 }
  0xea   : > { %1735 = vperm.xlu0 %2374, %v2981_v46  }
  0xec   : > { %1605 = vrot.lane.b32.xlu1 %v3013_v1, %s2539_s9 }
  0xee   : > { %1821 = vperm.xlu0 %2374, %v3060_v9  }
  0xf0   : > { %1617 = vrot.lane.b32.xlu1 %v3013_v1, %s2541_s10 }
  0xf2   : > { %1698 = vrot.lane.b32.xlu0 %v2929_v59, %s2540_s11 }
  0xf4   : > { %1452 = vrot.lane.b32.xlu1 %v2991_v53, %s2539_s9 }
  0xf6   : > { %1710 = vrot.lane.b32.xlu0 %v2929_v59, %s2542_s30 }
  0xf8   : > { %1607 = vrot.lane.b32.xlu1 %v3044_v30, %s2539_s9 }
  0xfa   : > { %1829 = vperm.xlu0 %2374, %v3044_v30  }
  0xfc   : > { %1739 = vperm.xlu1 %2373, %v2996_v55  }
  0xfe   : > { %1702 = vrot.lane.b32.xlu0 %v2981_v46, %s2540_s11 }
 0x100   : > { %v3149_v35 = vpop.permute.xlu0 %1437  ;;  %v3151_v36 = vpop.permute.xlu1 %1343  ;;  %1825 = vperm.xlu1 %2373, %v3013_v1  }
 0x102   : > { %1833 = vperm.xlu0 %2374, %v3098_v32  }
 0x104   : > { %v1348_v38 = vpop.permute.xlu1 %1347  ;;  %v3155_v37 = vpop.permute.xlu0 %1322  ;;  %1609 = vrot.lane.b32.xlu1 %v3098_v32, %s2539_s9 }
 0x106   : > { %1704 = vrot.lane.b32.xlu0 %v2996_v55, %s2540_s11 }
 0x108   : > { %v3161_v34 = vpop.permute.xlu0 %1441  ;;  %1621 = vrot.lane.b32.xlu1 %v3098_v32, %s2541_s10 }
 0x109   : > { %v1434_v40 = vpop.permute.xlu1 %1433 }
 0x10a   : > { %1792 = vrot.lane.b32.xlu0 %v3060_v9, %s2540_s11 }
 0x10c   : > { %v1327_v10 = vpop.permute.xlu0 %1326  ;;  %1700 = vrot.lane.b32.xlu1 %v3022_v43, %s2540_s11 }
 0x10d   : > { %v3169_v45 = vpop.permute.xlu1 %1310 }
 0x10e   : > { %1804 = vrot.lane.b32.xlu0 %v3060_v9, %s2542_s30 }
 0x110   : > { %v1405_v41 = vpop.permute.xlu0 %1404  ;;  %1712 = vrot.lane.b32.xlu1 %v3022_v43, %s2542_s30 }
 0x111   : > { %v3175_v16 = vpop.permute.xlu1 %1312 }
 0x112   : > { %1652 = vrot.lane.b32.xlu0 %v3087_v25, %s2539_s9 }
 0x114   : > { %v1533_v11 = vpop.permute.xlu0 %1532  ;;  %1552 = vrot.lane.b32.xlu1 %v3114_v56, %s2539_s9 }
 0x115   : > { %v3184_v62 = vpop.permute.xlu1 %1324 }
 0x116   : > { %1796 = vrot.lane.b32.xlu0 %v3044_v30, %s2540_s11 }
 0x118   : > { %v1417_v48 = vpop.permute.xlu0 %1416  ;;  %1555 = vrot.lane.b32.xlu1 %v3114_v56, %s2541_s10 }
 0x119   : > { %v1428_v50 = vsel %vm1138_vm6, %v1405_v41, %v1417_v48  ;;  %v1315_v51 = vpop.permute.xlu1 %1314  ;;  %v1277_v48 = vmul.f32 %v3022_v43, %v2896_v17 }
 0x11a   : > { %v1448_v14 = vsel %vm1140_vm7, %v1428_v50, %v1434_v40  ;;  %v1336_v63 = vsel %vm1124_vm8, %v1315_v51, %v1327_v10  ;;  %1848 = vperm.xlu0 %2374, %v3087_v25   ;;  %v1251_v40 = vmul.f32 %v3060_v9, %v2888_v42  ;;  %v3286_v9 = vsel %vm1107_vm4, %v1157_v39, %v1163_v29 }
 0x11b   : > { %v3199_v53 = vsel %vm1128_vm9, %v1336_v63, %v1348_v38  ;;  %v1252_v38 = vmul.f32 %v3013_v1, %v2896_v17  ;;  %v1464_v18 = vmul.f32 %v1448_v14, %v2888_v42  ;;  %v1253_v63 = vmul.f32 %v3044_v30, %v2902_v47 }
 0x11c   : > { %v3201_v0 = vpop.permute.xlu0 %1540  ;;  %1714 = vrot.lane.b32.xlu1 %v2981_v46, %s2542_s30  ;;  %vm1250_vm10 = vcmp.lt.f32.partialorder %v3286_v9, inf }
 0x11d   : > { %v3205_v57 = vpop.permute.xlu1 %1445  ;;  %v1256_v14 = vsel %vm891_vm1, %v1252_v38, 0.0  ;;  %v1468_v4 = vsel %vm891_vm1, %v1464_v18, 0.0 }
 0x11e   : > { %1810 = vrot.lane.b32.xlu0 %v3098_v32, %s2542_s30 }
 0x120   : > { %v3209_v28 = vpop.permute.xlu0 %1544  ;;  %1754 = vperm.xlu1 %2373, %v3114_v56  }
 0x121   : > { %v1317_v60 = vpop.permute.xlu1 %1316 }
 0x122   : > { %1749 = vrot.lane.b32.xlu0 %v3114_v56, %s2542_s30 }
 0x124   : > { %v3218_v2 = vpop.permute.xlu0 %1636  ;;  %1716 = vrot.lane.b32.xlu1 %v2996_v55, %s2542_s30 }
 0x125   : > { %v1329_v49 = vpop.permute.xlu1 %1328 }
 0x126   : > { %v3227_v5 = vsel %vm1124_vm8, %v1317_v60, %v1329_v49  ;;  %1843 = vrot.lane.b32.xlu0 %v3087_v25, %s2542_s30  ;;  %v1280_v60 = vsel %vm891_vm1, %v1276_v24, 0.0  ;;  %v1281_v49 = vsel %vm891_vm1, %v1277_v48, 0.0 }
 0x127   : > { %v1282_v20 = vadd.f32 %v1281_v49, %v1280_v60 }
 0x128   : > { %v3238_v19 = vpop.permute.xlu0 %1410  ;;  %1794 = vrot.lane.b32.xlu1 %v3013_v1, %s2540_s11 }
 0x129   : > { %v3244_v27 = vpop.permute.xlu1 %1536 }
 0x12a   : > { %1304 = vrot.lane.b32.xlu0 %v3236_v6, %s2542_s30 }
 0x12c   : > { %v1504_v54 = vpop.permute.xlu0 %1503  ;;  %1806 = vrot.lane.b32.xlu1 %v3013_v1, %s2542_s30 }
 0x12d   : > { %v1407_v61 = vpop.permute.xlu1 %1406 }
 0x12e   : > { %1398 = vrot.lane.b32.xlu0 %v3236_v6, %s2541_s10 }
 0x130   : > { %v1516_v8 = vpop.permute.xlu0 %1515  ;;  %1655 = vrot.lane.b32.xlu1 %v3087_v25, %s2541_s10 }
 0x131   : > { %v1527_v10 = vsel %vm1138_vm6, %v1504_v54, %v1516_v8  ;;  %v1419_v41 = vpop.permute.xlu1 %1418  ;;  %v1258_v54 = vsel %vm891_vm1, %v1253_v63, 0.0  ;;  %v3340_v63 = vsel %vm1250_vm10, %v3286_v9, inf }
 0x132   : > { %v3276_v50 = vsel %vm1140_vm7, %v1527_v10, %v1533_v11  ;;  %v1429_v59 = vsel %vm1138_vm6, %v1407_v61, %v1419_v41  ;;  %1493 = vrot.lane.b32.xlu0 %v3258_v21, %s2541_s10  ;;  %v1278_v11 = vmul.f32 %v2981_v46, %v2902_v47  ;;  %v1279_v61 = vmul.f32 %v2996_v55, %v2919_v58 }
 0x133   : > { %v1449_v1 = vsel %vm1140_vm7, %v1429_v59, %v3149_v35  ;;  %v1255_v35 = vsel %vm891_vm1, %v1251_v40, 0.0  ;;  %v1260_v55 = vsel %vm891_vm1, %v1254_v31, 0.0  ;;  %vm1275_vm11 = vcmp.lt.f32.partialorder %v3258_v21, %v3340_v63 }
 0x134   : > { %v1465_v43 = vmul.f32 %v1449_v1, %v2896_v17  ;;  %v3289_v51 = vpop.permute.xlu0 %1640  ;;  %1808 = vrot.lane.b32.xlu1 %v3044_v30, %s2542_s30  ;;  %v1257_v30 = vadd.f32 %v1256_v14, %v1255_v35  ;;  %v1283_v29 = vsel %vm891_vm1, %v1278_v11, 0.0  ;;  %v1285_v48 = vsel %vm891_vm1, %v1279_v61, 0.0 }
 0x135   : > { %v1409_v15 = vpop.permute.xlu1 %1408  ;;  %v1284_v10 = vadd.f32 %v1283_v29, %v1282_v20  ;;  %v1564_v61 = vmul.f32 %v3276_v50, %v2888_v42 }
 0x136   : > { %v1469_v23 = vsel %vm891_vm1, %v1465_v43, 0.0  ;;  %1593 = vrot.lane.b32.xlu0 %v3286_v9, %s2541_s10  ;;  %v1259_v38 = vadd.f32 %v1258_v54, %v1257_v30 }
 0x137   : > { %v1470_v46 = vadd.f32 %v1469_v23, %v1468_v4  ;;  %v1286_v43 = vadd.f32 %v1285_v48, %v1284_v10  ;;  %v1335_v10 = vsel %vm1124_vm8, %v3175_v16, %v3184_v62  ;;  %v1334_v16 = vsel %vm1124_vm8, %v3169_v45, %v3155_v37 }
 0x138   : > { %v1362_v26 = vpop.permute.xlu0 %1361  ;;  %1798 = vrot.lane.b32.xlu1 %v3098_v32, %s2540_s11  ;;  %v1261_v59 = vadd.f32 %v1260_v55, %v1259_v38 }
 0x139   : > { %v1421_v3 = vpop.permute.xlu1 %1420 }
 0x13a   : > { %v1430_v39 = vsel %vm1138_vm6, %v1409_v15, %v1421_v3  ;;  %1692 = vrot.lane.b32.xlu0 %v3258_v21, %s2542_s30  ;;  %v3337_v14 = vsub.f32 %v3087_v25, %v1261_v59  ;;  %v3343_v15 = vsub.f32 %v3114_v56, %v1286_v43 }
 0x13b   : > { %v1450_v8 = vsel %vm1140_vm7, %v1430_v39, %v3161_v34 }
 0x13c   : > { %v1466_v32 = vmul.f32 %v1450_v8, %v2902_v47  ;;  %v1520_v24 = vpop.permute.xlu0 %1519  ;;  %1746 = vrot.lane.b32.xlu1 %v3114_v56, %s2540_s11  ;;  %v1273_v49 = vsel %vm1250_vm10, %v3337_v14, 0.0 }
 0x13d   : > { %v1633_v40 = vpop.permute.xlu1 %1632  ;;  %v3364_v4 = vsel %vm1275_vm11, %v3343_v15, %v1273_v49 }
 0x13e   : > { %v1471_v41 = vsel %vm891_vm1, %v1466_v32, 0.0  ;;  %1786 = vrot.lane.b32.xlu0 %v3286_v9, %s2542_s30 }
 0x13f   : > { %v1472_v18 = vadd.f32 %v1471_v41, %v1470_v46 }
 0x140   : > { %v3327_v34 = vpop.permute.xlu0 %1509  ;;  %1840 = vrot.lane.b32.xlu1 %v3087_v25, %s2540_s11  ;;  %v3355_v25 = vsel %vm1275_vm11, %v3258_v21, %v3340_v63 }
 0x141   : > { %v3331_v1 = vpop.permute.xlu1 %1460 }
 0x144   : > { %v1604_v11 = vpop.permute.xlu0 %1603  ;;  %1301 = vrot.lane.b32.xlu1 %v3236_v6, %s2540_s11 }
 0x145   : > { %v1423_v35 = vpop.permute.xlu1 %1422 }
 0x146   : > { %v1431_v60 = vsel %vm1138_vm6, %v3238_v19, %v1423_v35 }
 0x147   : > { %v1451_v56 = vsel %vm1140_vm7, %v1431_v60, %v3205_v57  ;;  %v1372_v60 = vmul.f32 %v3199_v53, %v2902_v47 }
 0x148   : > { %v1467_v19 = vmul.f32 %v1451_v56, %v2919_v58  ;;  %v1616_v23 = vpop.permute.xlu0 %1615  ;;  %1395 = vrot.lane.b32.xlu1 %v3236_v6, %s2539_s9 }
 0x149   : > { %v1627_v46 = vsel %vm1138_vm6, %v1604_v11, %v1616_v23  ;;  %v1506_v30 = vpop.permute.xlu1 %1505 }
 0x14a   : > { %v1473_v31 = vsel %vm891_vm1, %v1467_v19, 0.0  ;;  %v3373_v57 = vsel %vm1140_vm7, %v1627_v46, %v1633_v40  ;;  %v1568_v40 = vsel %vm891_vm1, %v1564_v61, 0.0 }
 0x14b   : > { %v3375_v3 = vadd.f32 %v1473_v31, %v1472_v18  ;;  %v1355_v18 = vsel %vm1128_vm9, %v1335_v10, %v3151_v36  ;;  %v1377_v31 = vsel %vm891_vm1, %v1372_v60, 0.0 }
 0x14c   : > { %v3377_v54 = vpop.permute.xlu0 %1455  ;;  %1490 = vrot.lane.b32.xlu1 %v3258_v21, %s2539_s9  ;;  %v1371_v62 = vmul.f32 %v1355_v18, %v2896_v17 }
 0x14d   : > { %v1518_v20 = vpop.permute.xlu1 %1517 }
 0x14e   : > { %v1528_v39 = vsel %vm1138_vm6, %v1506_v30, %v1518_v20  ;;  %v1375_v37 = vsel %vm891_vm1, %v1371_v62, 0.0 }
 0x14f   : > { %v1548_v29 = vsel %vm1140_vm7, %v1528_v39, %v3244_v27 }
 0x150   : > { %v1565_v8 = vmul.f32 %v1548_v29, %v2896_v17  ;;  %v3388_v32 = vpop.permute.xlu0 %1619  ;;  %1590 = vrot.lane.b32.xlu1 %v3286_v9, %s2539_s9  ;;  %s3724_s9 = sld [smem:[#allocation12_spill]] }
 0x151   : > { %v1359_v38 = vpop.permute.xlu1 %1358 }
 0x152   : > { %v1569_v55 = vsel %vm891_vm1, %v1565_v8, 0.0  ;;  %v1364_v50 = vsel %vm1124_vm8, %v1359_v38, %v1362_v26 }
 0x153   : > { %v1570_v41 = vadd.f32 %v1569_v55, %v1568_v40 }
 0x154   : > { %v3398_v27 = vpop.permute.xlu0 %1660  ;;  %1689 = vrot.lane.b32.xlu1 %v3258_v21, %s2540_s11 }
 0x155   : > { %v1508_v48 = vpop.permute.xlu1 %1507 }
 0x156   : > { %v1529_v59 = vsel %vm1138_vm6, %v1508_v48, %v1520_v24  ;;  %v1263_v24 = vmax.f32 %v3337_v14, -1e+30 }
 0x157   : > { %v1549_v26 = vsel %vm1140_vm7, %v1529_v59, %v3201_v0 }
 0x158   : > { %v1566_v43 = vmul.f32 %v1549_v26, %v2902_v47  ;;  %1783 = vrot.lane.b32.xlu1 %v3286_v9, %s2540_s11  ;;  %v1264_v19 = vsub.f32 -1e+30, %v1263_v24  ;;  %v1268_v38 = vsub.f32 %v3337_v14, %v1263_v24  ;;  %v1288_v40 = vmax.f32 %v1263_v24, %v3343_v15  ;;  %s876_s11 = scalar_lea.vmem %s3724_s9, %s2735_s24 }
 0x159   : > { %v3416_v11 = vpop.permute.xlu1 %1644  ;;  %v1340_v36 = vpop.permute.xlu0 %1339 }
 0x15a   : > { %v1571_v35 = vsel %vm891_vm1, %v1566_v43, 0.0  ;;  %v1354_v0 = vsel %vm1128_vm9, %v1334_v16, %v1340_v36  ;;  %v1265_v29 = vmul.f32 1.442695, %v1264_v19  ;;  %v1269_v48 = vmul.f32 1.442695, %v1268_v38 }
 0x15b   : > { %v1572_v9 = vadd.f32 %v1571_v35, %v1570_v41  ;;  %v1370_v49 = vmul.f32 %v1354_v0, %v2888_v42  ;;  %v1289_v18 = vsub.f32 %v1263_v24, %v1288_v40  ;;  %v1293_v43 = vsub.f32 %v3343_v15, %v1288_v40 }
 0x15c   : > { %2411 = vpow2.f32 %v1265_v29 }
 0x15d   : > { %v1374_v45 = vsel %vm891_vm1, %v1370_v49, 0.0  ;;  %v1352_v56 = vpop.permute.xlu0 %1351  ;;  %2413 = vpow2.f32 %v1269_v48  ;;  %v1290_v62 = vmul.f32 1.442695, %v1289_v18  ;;  %v1294_v49 = vmul.f32 1.442695, %v1293_v43 }
 0x15e   : > { %v1376_v23 = vadd.f32 %v1375_v37, %v1374_v45  ;;  %v1357_v46 = vsel %vm1128_vm9, %v3227_v5, %v1352_v56  ;;  %v3430_v30 = vpop.permute.xlu1 %1731  ;;  %v1664_v56 = vmul.f32 %v3373_v57, %v2888_v42 }
 0x15f   : > { %v1373_v53 = vmul.f32 %v1357_v46, %v2919_v58  ;;  %2415 = vpow2.f32 %v1290_v62 }
 0x160   : > { %v1378_v20 = vadd.f32 %v1377_v31, %v1376_v23  ;;  %2417 = vpow2.f32 %v1294_v49  ;;  %v1668_v29 = vsel %vm891_vm1, %v1664_v56, 0.0 }
 0x161   : > { %v1379_v61 = vsel %vm891_vm1, %v1373_v53, 0.0  ;;  %v1367_v39 = vpop.permute.xlu0 %1366 }
 0x162   : > { %v1380_v8 = vadd.f32 %v1379_v61, %v1378_v20  ;;  %v1369_v55 = vsel %vm1128_vm9, %v1364_v50, %v1367_v39 }
 0x163   : > { %v3439_v5 = vpop.permute.xlu1 %1560 }
 0x164   : > { %v3441_v10 = vsub.f32 %v1369_v55, %v1380_v8 }
 0x165   : > { %v3443_v41 = vpop.permute.xlu0 %1727 }
 0x166   : > { %v1382_v36 = vmax.f32 %v1288_v40, %v3441_v10 }
 0x167   : > { %v1522_v59 = vpop.permute.xlu1 %1521 }
 0x168   : > { %v1530_v26 = vsel %vm1138_vm6, %v3327_v34, %v1522_v59  ;;  %v1383_v37 = vsub.f32 %v1288_v40, %v1382_v36  ;;  %v1387_v57 = vsub.f32 %v3441_v10, %v1382_v36 }
 0x169   : > { %v1550_v16 = vsel %vm1140_vm7, %v1530_v26, %v3209_v28  ;;  %v3451_v50 = vpop.permute.xlu0 %1735  ;;  %v2412_v28 = vpop.eup %2411 }
 0x16a   : > { %v1567_v35 = vmul.f32 %v1550_v16, %v2919_v58  ;;  %v1384_v31 = vmul.f32 1.442695, %v1383_v37  ;;  %v1267_v20 = vmul.f32 0.0, %v2412_v28  ;;  %v2414_v39 = vpop.eup %2413  ;;  %v1388_v26 = vmul.f32 1.442695, %v1387_v57 }
 0x16b   : > { %v1606_v0 = vpop.permute.xlu1 %1605  ;;  %v2416_v59 = vpop.eup %2415 }
 0x16c   : > { %v1573_v24 = vsel %vm891_vm1, %v1567_v35, 0.0  ;;  %2419 = vpow2.f32 %v1384_v31  ;;  %v1271_v48 = vadd.f32 %v2414_v39, %v1267_v20  ;;  %v2418_v37 = vpop.eup %2417 }
 0x16d   : > { %v3456_v60 = vpop.permute.xlu0 %1821  ;;  %v3458_v34 = vadd.f32 %v1573_v24, %v1572_v9  ;;  %v1297_v9 = vadd.f32 %v3343_v15, %v3337_v14  ;;  %2421 = vpow2.f32 %v1388_v26 }
 0x16e   : > { %v1292_v24 = vmul.f32 %v2416_v59, %v1271_v48 }
 0x16f   : > { %v1618_v45 = vpop.permute.xlu1 %1617  ;;  %v1391_v40 = vadd.f32 %v3441_v10, %v1297_v9 }
 0x170   : > { %v1628_v19 = vsel %vm1138_vm6, %v1606_v0, %v1618_v45 }
 0x171   : > { %v1648_v23 = vsel %vm1140_vm7, %v1628_v19, %v3218_v2  ;;  %v1699_v46 = vpop.permute.xlu0 %1698  ;;  %v1296_v19 = vadd.f32 %v2418_v37, %v1292_v24 }
 0x172   : > { %v1665_v53 = vmul.f32 %v1648_v23, %v2896_v17 }
 0x173   : > { %v1453_v61 = vpop.permute.xlu1 %1452 }
 0x174   : > { %v1669_v8 = vsel %vm891_vm1, %v1665_v53, 0.0  ;;  %v1458_v2 = vsel %vm1138_vm6, %v1453_v61, %v3377_v54 }
 0x175   : > { %v1670_v38 = vadd.f32 %v1669_v8, %v1668_v29  ;;  %v1463_v14 = vsel %vm1140_vm7, %v1458_v2, %v3331_v1  ;;  %v1711_v15 = vpop.permute.xlu0 %1710 }
 0x176   : > { %v3479_v55 = vsub.f32 %v1463_v14, %v3375_v3  ;;  %v1722_v48 = vsel %vm1124_vm8, %v1699_v46, %v1711_v15 }
 0x177   : > { %v1608_v18 = vpop.permute.xlu1 %1607 }
 0x178   : > { %v3482_v43 = vmax.f32 %v1382_v36, %v3479_v55  ;;  %v1485_v54 = vadd.f32 %v3479_v55, %v1391_v40  ;;  %v1629_v16 = vsel %vm1138_vm6, %v1608_v18, %v3388_v32 }
 0x179   : > { %v1649_v1 = vsel %vm1140_vm7, %v1629_v16, %v3289_v51  ;;  %v3490_v62 = vpop.permute.xlu0 %1829 }
 0x17a   : > { %v1477_v3 = vsub.f32 %v1382_v36, %v3482_v43  ;;  %v1481_v35 = vsub.f32 %v3479_v55, %v3482_v43  ;;  %v1666_v0 = vmul.f32 %v1649_v1, %v2902_v47  ;;  %v2420_v36 = vpop.eup %2419  ;;  %v1742_v1 = vsel %vm1128_vm9, %v1722_v48, %v3443_v41 }
 0x17b   : > { %v3496_v49 = vpop.permute.xlu1 %1739  ;;  %v1386_v31 = vmul.f32 %v2420_v36, %v1296_v19  ;;  %v2422_v61 = vpop.eup %2421  ;;  %v1758_v24 = vmul.f32 %v1742_v1, %v2888_v42 }
 0x17c   : > { %v1478_v45 = vmul.f32 1.442695, %v1477_v3  ;;  %v1482_v32 = vmul.f32 1.442695, %v1481_v35  ;;  %v1671_v28 = vsel %vm891_vm1, %v1666_v0, 0.0 }
 0x17d   : > { %v1672_v56 = vadd.f32 %v1671_v28, %v1670_v38  ;;  %v1703_v51 = vpop.permute.xlu0 %1702  ;;  %v1390_v39 = vadd.f32 %v2422_v61, %v1386_v31 }
 0x17e   : > { %2423 = vpow2.f32 %v1478_v45  ;;  %v1762_v45 = vsel %vm891_vm1, %v1758_v24, 0.0 }
 0x17f   : > { %v3499_v23 = vpop.permute.xlu1 %1825  ;;  %2425 = vpow2.f32 %v1482_v32 }
 0x181   : > { %v3501_v9 = vpop.permute.xlu0 %1833 }
 0x183   : > { %v1610_v53 = vpop.permute.xlu1 %1609 }
 0x185   : > { %v1705_v20 = vpop.permute.xlu0 %1704 }
 0x187   : > { %v1622_v29 = vpop.permute.xlu1 %1621 }
 0x188   : > { %v2424_v57 = vpop.eup %2423  ;;  %v1630_v8 = vsel %vm1138_vm6, %v1610_v53, %v1622_v29 }
 0x189   : > { %v1480_v2 = vmul.f32 %v2424_v57, %v1390_v39  ;;  %v1650_v38 = vsel %vm1140_vm7, %v1630_v8, %v3416_v11  ;;  %v1793_v14 = vpop.permute.xlu0 %1792  ;;  %v2426_v40 = vpop.eup %2425 }
 0x18a   : > { %v1667_v18 = vmul.f32 %v1650_v38, %v2919_v58 }
 0x18b   : > { %v1484_v59 = vadd.f32 %v2426_v40, %v1480_v2  ;;  %v1701_v26 = vpop.permute.xlu1 %1700 }
 0x18c   : > { %v1673_v16 = vsel %vm891_vm1, %v1667_v18, 0.0 }
 0x18d   : > { %v1674_v3 = vadd.f32 %v1673_v16, %v1672_v56  ;;  %v1805_v35 = vpop.permute.xlu0 %1804 }
 0x18f   : > { %v1713_v0 = vpop.permute.xlu1 %1712 }
 0x190   : > { %v1723_v11 = vsel %vm1124_vm8, %v1701_v26, %v1713_v0 }
 0x191   : > { %v1743_v46 = vsel %vm1128_vm9, %v1723_v11, %v3430_v30  ;;  %v1653_v41 = vpop.permute.xlu0 %1652 }
 0x192   : > { %v1759_v15 = vmul.f32 %v1743_v46, %v2896_v17 }
 0x193   : > { %v1553_v37 = vpop.permute.xlu1 %1552 }
 0x194   : > { %v1763_v32 = vsel %vm891_vm1, %v1759_v15, 0.0 }
 0x195   : > { %v1764_v28 = vadd.f32 %v1763_v32, %v1762_v45  ;;  %v1797_v30 = vpop.permute.xlu0 %1796 }
 0x197   : > { %v1556_v56 = vpop.permute.xlu1 %1555 }
 0x198   : > { %v1558_v19 = vsel %vm1138_vm6, %v1553_v37, %v1556_v56 }
 0x199   : > { %v1563_v36 = vsel %vm1140_vm7, %v1558_v19, %v3439_v5  ;;  %v3539_v18 = vpop.permute.xlu0 %1848 }
 0x19a   : > { %v3526_v31 = vsub.f32 %v1563_v36, %v3458_v34 }
 0x19b   : > { %v1715_v53 = vpop.permute.xlu1 %1714 }
 0x19c   : > { %v1576_v61 = vmax.f32 %v3482_v43, %v3526_v31  ;;  %v1585_v39 = vadd.f32 %v3526_v31, %v1485_v54  ;;  %v1724_v29 = vsel %vm1124_vm8, %v1703_v51, %v1715_v53 }
 0x19d   : > { %v1744_v57 = vsel %vm1128_vm9, %v1724_v29, %v3451_v50 }
 0x19e   : > { %v1577_v8 = vsub.f32 %v3482_v43, %v1576_v61  ;;  %v1581_v5 = vsub.f32 %v3526_v31, %v1576_v61  ;;  %v1760_v34 = vmul.f32 %v1744_v57, %v2902_v47  ;;  %v1811_v43 = vpop.permute.xlu0 %1810 }
 0x19f   : > { %v1755_v2 = vpop.permute.xlu1 %1754 }
 0x1a0   : > { %v1578_v38 = vmul.f32 1.442695, %v1577_v8  ;;  %v1582_v40 = vmul.f32 1.442695, %v1581_v5  ;;  %v1765_v48 = vsel %vm891_vm1, %v1760_v34, 0.0 }
 0x1a1   : > { %v1766_v54 = vadd.f32 %v1765_v48, %v1764_v28 }
 0x1a2   : > { %2427 = vpow2.f32 %v1578_v38  ;;  %v1750_v46 = vpop.permute.xlu0 %1749 }
 0x1a3   : > { %v1717_v51 = vpop.permute.xlu1 %1716  ;;  %2429 = vpow2.f32 %v1582_v40 }
 0x1a4   : > { %v1725_v26 = vsel %vm1124_vm8, %v1705_v20, %v1717_v51 }
 0x1a5   : > { %v1745_v50 = vsel %vm1128_vm9, %v1725_v26, %v3496_v49  ;;  %v1816_v49 = vsel %vm1124_vm8, %v1793_v14, %v1805_v35 }
 0x1a6   : > { %v1761_v16 = vmul.f32 %v1745_v50, %v2919_v58  ;;  %v1844_v36 = vpop.permute.xlu0 %1843  ;;  %v1836_v57 = vsel %vm1128_vm9, %v1816_v49, %v3456_v60 }
 0x1a7   : > { %v1795_v1 = vpop.permute.xlu1 %1794  ;;  %v1852_v5 = vmul.f32 %v1836_v57, %v2888_v42 }
 0x1a8   : > { %v1767_v0 = vsel %vm891_vm1, %v1761_v16, 0.0 }
 0x1a9   : > { %v1768_v24 = vadd.f32 %v1767_v0, %v1766_v54 }
 0x1aa   : > { %v1305_v38 = vpop.permute.xlu0 %1304 }
 0x1ab   : > { %v1807_v11 = vpop.permute.xlu1 %1806 }
 0x1ac   : > { %v2428_v15 = vpop.eup %2427  ;;  %v1817_v28 = vsel %vm1124_vm8, %v1795_v1, %v1807_v11 }
 0x1ad   : > { %v1580_v37 = vmul.f32 %v2428_v15, %v1484_v59  ;;  %v2430_v45 = vpop.eup %2429  ;;  %v1837_v53 = vsel %vm1128_vm9, %v1817_v28, %v3499_v23 }
 0x1af   : > { %v1584_v32 = vadd.f32 %v2430_v45, %v1580_v37  ;;  %v1656_v20 = vpop.permute.xlu1 %1655 }
 0x1b0   : > { %v1658_v56 = vsel %vm1138_vm6, %v1653_v41, %v1656_v20 }
 0x1b1   : > { %v1663_v19 = vsel %vm1140_vm7, %v1658_v56, %v3398_v27  ;;  %v1853_v27 = vmul.f32 %v1837_v53, %v2896_v17 }
 0x1b2   : > { %v3556_v29 = vsub.f32 %v1663_v19, %v1674_v3 }
 0x1b3   : > { %v1809_v59 = vpop.permute.xlu1 %1808 }
 0x1b4   : > { %v1676_v41 = vmax.f32 %v1576_v61, %v3556_v29  ;;  %v1685_v14 = vadd.f32 %v3556_v29, %v1585_v39  ;;  %v1818_v35 = vsel %vm1124_vm8, %v1797_v30, %v1809_v59  ;;  %v1857_v30 = vsel %vm891_vm1, %v1853_v27, 0.0 }
 0x1b5   : > { %v1838_v8 = vsel %vm1128_vm9, %v1818_v35, %v3490_v62 }
 0x1b6   : > { %v1677_v23 = vsub.f32 %v1576_v61, %v1676_v41  ;;  %v1681_v3 = vsub.f32 %v3556_v29, %v1676_v41  ;;  %v1854_v34 = vmul.f32 %v1838_v8, %v2902_v47  ;;  %v1856_v61 = vsel %vm891_vm1, %v1852_v5, 0.0 }
 0x1b7   : > { %v1799_v60 = vpop.permute.xlu1 %1798  ;;  %v1858_v54 = vadd.f32 %v1857_v30, %v1856_v61  ;;  %v1125_v30 = vsel %vm1124_vm8, %v3135_v22, %v3144_v33 }
 0x1b8   : > { %v1678_v40 = vmul.f32 1.442695, %v1677_v23  ;;  %v1819_v39 = vsel %vm1124_vm8, %v1799_v60, %v1811_v43  ;;  %v1682_v48 = vmul.f32 1.442695, %v1681_v3  ;;  %v1859_v42 = vsel %vm891_vm1, %v1854_v34, 0.0  ;;  %v1399_v43 = vpop.permute.xlu0 %1398 }
 0x1b9   : > { %v1839_v17 = vsel %vm1128_vm9, %v1819_v39, %v3501_v9  ;;  %v1860_v16 = vadd.f32 %v1859_v42, %v1858_v54  ;;  %v1139_v39 = vsel %vm1138_vm6, %v3133_v12, %v3142_v7  ;;  %v1131_v22 = vsel %vm1128_vm9, %v1125_v30, 0.0 }
 0x1ba   : > { %2431 = vpow2.f32 %v1678_v40  ;;  %v1855_v62 = vmul.f32 %v1839_v17, %v2919_v58  ;;  %v1143_v12 = vsel %vm1140_vm7, %v1139_v39, 0.0 }
 0x1bb   : > { %v1747_v47 = vpop.permute.xlu1 %1746  ;;  %2433 = vpow2.f32 %v1682_v48 }
 0x1bc   : > { %v1752_v51 = vsel %vm1124_vm8, %v1747_v47, %v1750_v46  ;;  %v1861_v26 = vsel %vm891_vm1, %v1855_v62, 0.0  ;;  %v1494_v20 = vpop.permute.xlu0 %1493 }
 0x1bd   : > { %v1757_v50 = vsel %vm1128_vm9, %v1752_v51, %v1755_v2  ;;  %v1862_v11 = vadd.f32 %v1861_v26, %v1860_v16 }
 0x1be   : > { %v3583_v9 = vsub.f32 %v1757_v50, %v1768_v24  ;;  %v1299_v24 = vsel %vm1275_vm11, 1, %v2538_v13 }
 0x1bf   : > { %v1841_v1 = vpop.permute.xlu1 %1840 }
 0x1c0   : > { %v1770_v58 = vmax.f32 %v1676_v41, %v3583_v9  ;;  %v1779_v0 = vadd.f32 %v3583_v9, %v1685_v14  ;;  %v1846_v15 = vsel %vm1124_vm8, %v1841_v1, %v1844_v36  ;;  %v1594_v34 = vpop.permute.xlu0 %1593 }
 0x1c1   : > { %v1851_v46 = vsel %vm1128_vm9, %v1846_v15, %v3539_v18 }
 0x1c2   : > { %v1771_v37 = vsub.f32 %v1676_v41, %v1770_v58  ;;  %v1775_v45 = vsub.f32 %v3583_v9, %v1770_v58  ;;  %v3592_v2 = vsub.f32 %v1851_v46, %v1862_v11  ;;  %v1144_v46 = vmax.f32 %v1131_v22, %v1143_v12 }
 0x1c3   : > { %v1302_v28 = vpop.permute.xlu1 %1301 }
 0x1c4   : > { %v2432_v56 = vpop.eup %2431  ;;  %v1772_v49 = vmul.f32 1.442695, %v1771_v37  ;;  %v1776_v19 = vmul.f32 1.442695, %v1775_v45  ;;  %v3599_v36 = vmax.f32 %v1770_v58, %v3592_v2  ;;  %v1307_v18 = vsel %vm1124_vm8, %v1302_v28, %v1305_v38  ;;  %v1693_v61 = vpop.permute.xlu0 %1692 }
 0x1c5   : > { %v1308_v53 = vsel %vm1128_vm9, %v1307_v18, 100000.0  ;;  %v1680_v59 = vmul.f32 %v2432_v56, %v1584_v32  ;;  %v3605_v57 = vadd.f32 %v3592_v2, %v1779_v0  ;;  %v2434_v63 = vpop.eup %2433 }
 0x1c6   : > { %2435 = vpow2.f32 %v1772_v49  ;;  %v1865_v13 = vsub.f32 %v1770_v58, %v3599_v36  ;;  %v1869_v21 = vsub.f32 %v3592_v2, %v3599_v36  ;;  %vm1309_vm12 = vcmp.lt.f32.partialorder %v1308_v53, %v3355_v25 }
 0x1c7   : > { %2437 = vpow2.f32 %v1776_v19  ;;  %v1392_v41 = vsel %vm1309_vm12, %v3441_v10, %v3364_v4  ;;  %v1393_v14 = vsel %vm1309_vm12, 2, %v1299_v24  ;;  %v1394_v35 = vsel %vm1309_vm12, %v1308_v53, %v3355_v25  ;;  %v1396_v32 = vpop.permute.xlu1 %1395 }
 0x1c8   : > { %v1866_v27 = vmul.f32 1.442695, %v1865_v13  ;;  %v1870_v8 = vmul.f32 1.442695, %v1869_v21  ;;  %v1401_v23 = vsel %vm1138_vm6, %v1396_v32, %v1399_v43  ;;  %v1684_v3 = vadd.f32 %v2434_v63, %v1680_v59  ;;  %v1787_v0 = vpop.permute.xlu0 %1786 }
 0x1c9   : > { %v1402_v5 = vsel %vm1140_vm7, %v1401_v23, 100000.0  ;;  %v1145_v49 = vmax.f32 %v2794_v52, %v1144_v46  ;;  %v2543_v59 = vmov 0.0  }
 0x1ca   : > { %2439 = vpow2.f32 %v1866_v27  ;;  %vm1403_vm13 = vcmp.lt.f32.partialorder %v1402_v5, %v1394_v35 }
 0x1cb   : > { %v1486_v60 = vsel %vm1403_vm13, %v3479_v55, %v1392_v41  ;;  %v1487_v38 = vsel %vm1403_vm13, 3, %v1393_v14  ;;  %v1488_v40 = vsel %vm1403_vm13, %v1402_v5, %v1394_v35  ;;  %v1491_v4 = vpop.permute.xlu1 %1490  ;;  %2441 = vpow2.f32 %v1870_v8 }
 0x1cc   : > { %v1496_v25 = vsel %vm1138_vm6, %v1491_v4, %v1494_v20  ;;  %vm1146_vm4 = vcmp.gt.f32.partialorder %v1145_v49, 0.0  ;;  %v1889_v35 = vmin.f32 %v3236_v6, 20.0 }
 0x1cd   : > { %v1497_v10 = vsel %vm1140_vm7, %v1496_v25, 100000.0 }
 0x1ce   : > { %vm1498_vm14 = vcmp.lt.f32.partialorder %v1497_v10, %v1488_v40  ;;  %v1890_v23 = vmul.f32 0.05, %v1889_v35 }
 0x1cf   : > { %v1586_v55 = vsel %vm1498_vm14, %v3526_v31, %v1486_v60  ;;  %v1587_v48 = vsel %vm1498_vm14, 4, %v1487_v38  ;;  %v1588_v17 = vsel %vm1498_vm14, %v1497_v10, %v1488_v40  ;;  %v1591_v62 = vpop.permute.xlu1 %1590 }
 0x1d0   : > { %v2436_v42 = vpop.eup %2435  ;;  %v1596_v47 = vsel %vm1138_vm6, %v1591_v62, %v1594_v34 }
 0x1d1   : > { %v2438_v54 = vpop.eup %2437  ;;  %v1597_v51 = vsel %vm1140_vm7, %v1596_v47, 100000.0  ;;  %v1774_v26 = vmul.f32 %v2436_v42, %v1684_v3 }
 0x1d2   : > { %vm1598_vm15 = vcmp.lt.f32.partialorder %v1597_v51, %v1588_v17 }
 0x1d3   : > { %v1686_v7 = vsel %vm1598_vm15, %v3556_v29, %v1586_v55  ;;  %v1687_v33 = vsel %vm1598_vm15, 5, %v1587_v48  ;;  %v1688_v31 = vsel %vm1598_vm15, %v1597_v51, %v1588_v17  ;;  %v1690_v50 = vpop.permute.xlu1 %1689  ;;  %v1778_v43 = vadd.f32 %v2438_v54, %v1774_v26 }
 0x1d4   : > { %v2440_v16 = vpop.eup %2439  ;;  %v1695_v1 = vsel %vm1124_vm8, %v1690_v50, %v1693_v61 }
 0x1d5   : > { %v1696_v58 = vsel %vm1128_vm9, %v1695_v1, 100000.0  ;;  %v1868_v11 = vmul.f32 %v2440_v16, %v1778_v43  ;;  %v2442_v15 = vpop.eup %2441 }
 0x1d6   : > { %vm1697_vm0 = vcmp.lt.f32.partialorder %v1696_v58, %v1688_v31 }
 0x1d7   : > { %v1780_v37 = vsel %vm1697_vm0, %v3583_v9, %v1686_v7  ;;  %v1781_v45 = vsel %vm1697_vm0, 6, %v1687_v33  ;;  %v1782_v24 = vsel %vm1697_vm0, %v1696_v58, %v1688_v31  ;;  %v1784_v29 = vpop.permute.xlu1 %1783  ;;  %v1872_v28 = vadd.f32 %v2442_v15, %v1868_v11 }
 0x1d8   : > { %v1789_v20 = vsel %vm1124_vm8, %v1784_v29, %v1787_v0 }
 0x1d9   : > { %v1790_v56 = vsel %vm1128_vm9, %v1789_v20, 100000.0  ;;  %2443 = vlog2.f32 %v1872_v28 }
 0x1da   : > { %vm1791_vm2 = vcmp.lt.f32.partialorder %v1790_v56, %v1782_v24 }
 0x1db   : > { %v1874_v19 = vsel %vm1791_vm2, %v3592_v2, %v1780_v37  ;;  %v1876_v18 = vsel %vm1791_vm2, %v1790_v56, %v1782_v24  ;;  %v1875_v53 = vsel %vm1791_vm2, 7, %v1781_v45 }
 0x1dc   : > { %vm1877_vm3 = vcmp.lt.f32.partialorder %v3236_v6, %v1876_v18 }
 0x1dd   : > { %v1878_v9 = vsel %vm1877_vm3, 8, %v1875_v53 }
 0x1de   : > { %vm1891_vm5 = vcmp.ne.s32.totalorder %v1878_v9, 8 }
 0x1df   : > { %vm1892_vm6 = vmand %vm1146_vm4, %vm1891_vm5 }
 0x1e0   : > { %v2262_v13 = vsel %vm1892_vm6, 1.0, %v2543_v59 }
 0x1e1   : > { %v1909_v21 = vsel %vm891_vm1, %v2262_v13, 0.0 }
 0x1e2   : > { %1910 = vadd.xlane.f32.xlu0 %v1909_v21 }
 0x1e3   : > { %v2444_v44 = vpop.eup %2443 }
 0x1e4   : > { %v1880_v63 = vmul.f32 0.6931472, %v2444_v44 }
 0x1e6   : > { %v1881_v41 = vadd.f32 %v1880_v63, %v3599_v36 }
 0x1e8   : > { %v1882_v52 = vsub.f32 %v1874_v19, %v1881_v41  ;;  %v1883_v14 = vmul.f32 8.0, %v1881_v41 }
 0x1ea   : > { %v1884_v2 = vsub.f32 %v3605_v57, %v1883_v14  ;;  %v1885_v32 = vmul.f32 0.775, %v1882_v52 }
 0x1ec   : > { %v1886_v27 = vmul.f32 0.025, %v1884_v2 }
 0x1ee   : > { %v1887_v8 = vadd.f32 %v1886_v27, %v1885_v32 }
 0x1f0   : > { %v1888_v3 = vsub.f32 0.0, %v1887_v8 }
 0x1f2   : > { %v1895_v5 = vmul.f32 %v1890_v23, %v1888_v3 }
 0x1f4   : > { %v1896_v34 = vmul.f32 %v2262_v13, %v1895_v5 }
 0x1f6   : > { %v1897_v60 = vsel %vm891_vm1, %v1896_v34, 0.0 }
 0x1f7   : > { %1898 = vadd.xlane.f32.xlu1 %v1897_v60 }
 0x26f   : > { %v1911_v38 = vpop.xlane.xlu0 %1910 }
 0x270   : > { %v1912_v40 = vrot.slane %v1911_v38, 4 }
 0x272   : > { %v1913_v36 = vadd.f32 %v1912_v40, %v1911_v38 }
 0x274   : > { %v1914_v4 = vrot.slane %v1913_v36, 2 }
 0x276   : > { %v1915_v6 = vadd.f32 %v1914_v4, %v1913_v36 }
 0x278   : > { %v1916_v55 = vrot.slane %v1915_v6, 1 }
 0x27a   : > { %v1917_v62 = vadd.f32 %v1916_v55, %v1915_v6 }
 0x284   : > { %v1899_v25 = vpop.xlane.xlu1 %1898 }
 0x285   : > { %v1900_v57 = vrot.slane %v1899_v25, 4 }
 0x287   : > { %v1901_v10 = vadd.f32 %v1900_v57, %v1899_v25 }
 0x289   : > { %v1902_v39 = vrot.slane %v1901_v10, 2 }
 0x28b   : > { %v1903_v30 = vadd.f32 %v1902_v39, %v1901_v10 }
 0x28d   : > { %v1904_v48 = vrot.slane %v1903_v30, 1 }
 0x28f   : > { %v1905_v17 = vadd.f32 %v1904_v48, %v1903_v30 }
 0x291   : > { %2269 = vpush %v1905_v17 }
 0x292   : > { %2271 = vpush %v1917_v62 }
 0x2c2   : > { %s2270_s10 = spop %2269 }
 0x2c3   : > { %v1907_v61 = vstv %s2270_s10  ;;  %s2272_s19 = spop %2271 }
 0x2c4   : > { %1908 = vst [vmem:[%s876_s11] sm:$0xff] %v1907_v61  ;;  %v1919_v42 = vstv %s2272_s19 }
 0x2c5   : > { %1920 = vst [vmem:[%s884_s0] sm:$0xff] %v1919_v42 }
 0x2c6 PF: > { %s21_s23 = sadd.s32 1, %s2535_s23   ;;  %s3726_s17 = sld [smem:[#allocation8_spill]] }
 0x2c7   : > { %p18_p8 = scmp.ge.s32.totalorder %s21_s23, 6   ;;  %s3727_s26 = sld [smem:[#allocation7_spill]] }
 0x2c8   : > { %s3728_s12 = sld [smem:[#allocation5_spill]]  ;;  %s3729_s27 = sld [smem:[#allocation6_spill]] }
 0x2c9   : > { %s3730_s13 = smov %s2499_s14  ;;  %s3731_s14 = smov %s2700_s25 }
 0x2ca   : > { %s3732_s15 = smov %s2507_s16  ;;  %s3736_s19 = smov %s2527_s21 }
 0x2cb   : > { %s3737_s20 = smov %s2531_s22  ;;  %20 = sbr.rel (!%p18_p8) target bundleno = 12 (0xc), region = 251 }
 0x2cc   : > { %s3733_s16 = smov %s3726_s17  ;;  %s3734_s17 = smov %s2515_s18 }
 0x2cd   : > { %s3735_s18 = smov %s3727_s26 }
 0x2ce   : > { %s3738_s21 = smov %s3728_s12  ;;  %s3739_s22 = smov %s3729_s27 }

</bundles_post_ra>
